<compile_context>
chip_gen: v7x
topology: tpu7x:2x2x1
jax: 0.10.0
libtpu: 0.0.40
codegen_flags: <defaults>
</compile_context>

<pallas_src>
import jax
import jax.numpy as jnp
from jax import lax
from jax.experimental import pallas as pl
from jax.experimental.pallas import tpu as pltpu


# ------------------------------------------------------------------------------
# Fused decoder kernel: LSTM stack + linear head + softmax(seq) + argmax(vocab)
# ------------------------------------------------------------------------------
def _make_decoder_kernel(num_layers, seq_len, batch, embed, hidden_size, vocab):
    S, B, E, H, V = seq_len, batch, embed, hidden_size, vocab
    G = 4 * H

    def kernel(*refs):
        x_ref = refs[0]                                  # (B, S, E)  batch-major input
        layer_refs = refs[1:1 + 3 * num_layers]          # per layer: wih(in,4H), whh(H,4H), b(1,4H)
        wlin_ref = refs[1 + 3 * num_layers]              # (H, V)   pre-transposed
        blin_ref = refs[2 + 3 * num_layers]              # (1, V)
        logits_ref = refs[3 + 3 * num_layers]            # (B, S, V) output
        idx_ref = refs[4 + 3 * num_layers]               # (B, S)    output int32
        hid_ref = refs[5 + 3 * num_layers]               # (B, S, H) VMEM scratch (reused per layer)

        for l in range(num_layers):                      # static layer loop
            wih = layer_refs[3 * l][...]                 # (in, 4H)  fused gates [i|f|g|o]
            whh = layer_refs[3 * l + 1][...]             # (H, 4H)
            b = layer_refs[3 * l + 2][...]               # (1, 4H)
            x_seq = x_ref[...] if l == 0 else hid_ref[...]          # (B, S, in)

            # Hoisted whole-sequence input projection: one big GEMM per layer, bias folded
            # in once.  (Rank-3 lhs einsum: Mosaic flattens the (B,S) leading dims.)
            pre = jnp.einsum('bsi,ig->bsg', x_seq, wih,
                             preferred_element_type=jnp.float32) + b          # (B, S, 4H)

            h = jnp.zeros((B, H), jnp.float32)
            c = jnp.zeros((B, H), jnp.float32)

            # Fully-unrolled time recurrence (S static): per step one fused 128-lane
            # recurrent dot + elementwise gate math, 3 transcendental pushes.
            for t in range(S):
                gates = pre[:, t, :] + jnp.dot(h, whh,
                                               preferred_element_type=jnp.float32)  # (B, 4H)
                s = jax.nn.sigmoid(gates)                # one EUP push over all 4H lanes
                i_g = s[:, 0 * H:1 * H]
                f_g = s[:, 1 * H:2 * H]
                o_g = s[:, 3 * H:4 * H]
                g_g = jnp.tanh(gates[:, 2 * H:3 * H])
                c = f_g * c + i_g * g_g
                h = o_g * jnp.tanh(c)
                # Batch-major store; static window (no dynamic / squeezed middle dims).
                hid_ref[:, t:t + 1, :] = h[:, None, :]

        # ---- Head: one (B*S,H)x(H,V) contraction, batch-major outputs, single full stores.
        logits = jnp.einsum('bsh,hv->bsv', hid_ref[...], wlin_ref[...],
                            preferred_element_type=jnp.float32) + blin_ref[...]     # (B, S, V)
        logits_ref[...] = logits

        # softmax over the SEQUENCE dim (matching the torch code), argmax over vocab.
        m = jnp.max(logits, axis=1, keepdims=True)       # (B, 1, V)
        e = jnp.exp(logits - m)
        z = jnp.sum(e, axis=1, keepdims=True)            # (B, 1, V)
        # Normalized probabilities never leave the kernel; reciprocal-multiply.
        # approx=False: an approximate reciprocal could flip argmax near-ties vs reference.
        p = e * pl.reciprocal(z, approx=False)           # (B, S, V)

        pmax = jnp.max(p, axis=2, keepdims=True)                         # (B, S, 1)
        iota = lax.broadcasted_iota(jnp.int32, (B, S, V), 2)             # hoisted once
        idx = jnp.min(jnp.where(p >= pmax, iota, V), axis=2)             # first-occurrence ties
        idx_ref[...] = idx.astype(jnp.int32)

    return kernel


# ------------------------------------------------------------------------------
# Decoder forward (train=True path): one fused pallas_call
# ------------------------------------------------------------------------------
def _decoder_forward(params, encoded_images, captions):
    emb_table = params['embedding']                      # (vocab, E)
    lin_w = params['linear_w']                           # (vocab, H)
    lin_b = params['linear_b']                           # (vocab,)
    num_layers = len(params['lstm_layers'])
    H = params['lstm_layers'][0]['w_hh'].shape[1]
    E = emb_table.shape[1]
    vocab = lin_w.shape[0]
    B, T = captions.shape
    S = T + 1

    # Embedding gather + image prepend, batch-major (same layout as the torch module).
    # No activation transposes anywhere (wrapper or kernel).
    # TODO(synk): at production sizes fuse the gather into the kernel via
    # PrefetchScalarGridSpec (captions as scalar prefetch + pl.Element row index_map).
    we = jnp.take(emb_table, captions, axis=0)           # (B, T, E)
    x = jnp.concatenate(
        [encoded_images[:, None, :].astype(jnp.float32),
         we.astype(jnp.float32)], axis=1)                # (B, S, E)

    # Fused-gate, pre-transposed weight layout (done once, outside the kernel).
    args = [x]
    for lp in params['lstm_layers']:
        args.append(jnp.transpose(lp['w_ih']))           # (in, 4H)  gates [i|f|g|o]
        args.append(jnp.transpose(lp['w_hh']))           # (H, 4H)
        args.append(lp['b'].reshape(1, 4 * H))           # (1, 4H)   b_ih + b_hh
    args.append(jnp.transpose(lin_w))                    # (H, vocab)
    args.append(lin_b.reshape(1, vocab))                 # (1, vocab)

    kernel = _make_decoder_kernel(num_layers, S, B, E, H, vocab)
    # TODO(synk): at production vocab the head must be V-tiled via a grid axis (mandatory
    # on v7x's 64 MiB VMEM), weights cast to bf16 for the v6e/v7x MXU, and a leading
    # 'parallel' batch grid axis added so v7x's second TensorCore isn't idle.
    vocab_output, sampled_index = pl.pallas_call(
        kernel,
        out_shape=(jax.ShapeDtypeStruct((B, S, vocab), jnp.float32),
                   jax.ShapeDtypeStruct((B, S), jnp.int32)),
        scratch_shapes=[pltpu.VMEM((B, S, H), jnp.float32)],
    )(*args)
    return vocab_output, sampled_index


decoder_forward = jax.jit(_decoder_forward)


# ------------------------------------------------------------------------------
# Pure-JAX reference (for correctness check)
# ------------------------------------------------------------------------------
def decoder_forward_ref(params, encoded_images, captions):
    emb_table = params['embedding']
    we = emb_table[captions]
    x = jnp.concatenate([encoded_images[:, None, :], we], axis=1)  # (B, S, E)
    x_tm = jnp.transpose(x, (1, 0, 2))
    for lp in params['lstm_layers']:
        w_ih, w_hh, b = lp['w_ih'], lp['w_hh'], lp['b']
        H = w_hh.shape[1]
        B = x_tm.shape[1]

        def step(carry, xt):
            h, c = carry
            gates = xt @ w_ih.T + h @ w_hh.T + b
            i, f, g, o = jnp.split(gates, 4, axis=1)
            i, f, o = jax.nn.sigmoid(i), jax.nn.sigmoid(f), jax.nn.sigmoid(o)
            g = jnp.tanh(g)
            c = f * c + i * g
            h = o * jnp.tanh(c)
            return (h, c), h

        (_, _), hs = jax.lax.scan(step,
                                  (jnp.zeros((B, H)), jnp.zeros((B, H))),
                                  x_tm)
        x_tm = hs
    hidden = jnp.transpose(x_tm, (1, 0, 2))
    logits = jnp.einsum('bsh,vh->bsv', hidden, params['linear_w']) + params['linear_b']
    p = jax.nn.softmax(logits, axis=1)
    idx = jnp.argmax(p, axis=2)
    return logits, idx


# ------------------------------------------------------------------------------
# Parameter init (deterministic, synthetic)
# ------------------------------------------------------------------------------
def init_params(key, vocab_len, embedding_size, hidden_size, num_layers):
    keys = jax.random.split(key, 3 + 4 * num_layers)
    params = {}
    scale = 0.1
    params['embedding'] = scale * jax.random.normal(
        keys[0], (vocab_len, embedding_size), jnp.float32)
    layers = []
    for l in range(num_layers):
        in_dim = embedding_size if l == 0 else hidden_size
        k0, k1, k2, k3 = keys[3 + 4 * l: 3 + 4 * (l + 1)]
        w_ih = scale * jax.random.normal(k0, (4 * hidden_size, in_dim), jnp.float32)
        w_hh = scale * jax.random.normal(k1, (4 * hidden_size, hidden_size), jnp.float32)
        b_ih = scale * jax.random.normal(k2, (4 * hidden_size,), jnp.float32)
        b_hh = scale * jax.random.normal(k3, (4 * hidden_size,), jnp.float32)
        layers.append({'w_ih': w_ih, 'w_hh': w_hh, 'b': b_ih + b_hh})
    params['lstm_layers'] = layers
    params['linear_w'] = scale * jax.random.normal(
        keys[1], (vocab_len, hidden_size), jnp.float32)
    params['linear_b'] = scale * jax.random.normal(
        keys[2], (vocab_len,), jnp.float32)
    return params


if __name__ == "__main__":
    # Synthetic config (mirrors config_data['model'] / ['generation'])
    config = {
        'model': {'num_layers': 2, 'embedding_size': 32, 'hidden_size': 32,
                  'model_type': 'LSTM'},
        'generation': {'max_length': 8, 'temperature': 1.0, 'deterministic': True},
    }
    # TODO(synk): inference (train=False) autoregressive sampling loop (host-side Python
    # loop + WeightedRandomSampler) not implemented; only the train=True path is kernelized.
    vocab_len = 64
    B, T = 2, 8                       # batch, caption length  -> sequence S = T + 1 = 9
    E = config['model']['embedding_size']
    H = config['model']['hidden_size']
    L = config['model']['num_layers']

    key = jax.random.PRNGKey(0)
    k_p, k_img, k_cap = jax.random.split(key, 3)
    params = init_params(k_p, vocab_len, E, H, L)
    encoded_images = jax.random.normal(k_img, (B, E), jnp.float32)
    captions = jax.random.randint(k_cap, (B, T), 0, vocab_len, dtype=jnp.int32)

    vocab_output, sampled_index = decoder_forward(params, encoded_images, captions)
    jax.block_until_ready((vocab_output, sampled_index))

    # Correctness check against pure-JAX reference
    ref_logits, ref_idx = decoder_forward_ref(params, encoded_images, captions)
    assert vocab_output.shape == (B, T + 1, vocab_len)
    assert sampled_index.shape == (B, T + 1)
    assert jnp.allclose(vocab_output, ref_logits, atol=1e-4, rtol=1e-4), "logits mismatch"
    assert jnp.array_equal(sampled_index, ref_idx.astype(jnp.int32)), "argmax mismatch"

    print("KERNEL_OK")
</pallas_src>

<mosaic_0001>
module attributes {stable_mosaic.version = 11 : i64} {
  func.func @kernel(%arg0: memref<2x9x32xf32, #tpu.memory_space<vmem>>, %arg1: memref<32x128xf32, #tpu.memory_space<vmem>>, %arg2: memref<32x128xf32, #tpu.memory_space<vmem>>, %arg3: memref<1x128xf32, #tpu.memory_space<vmem>>, %arg4: memref<32x128xf32, #tpu.memory_space<vmem>>, %arg5: memref<32x128xf32, #tpu.memory_space<vmem>>, %arg6: memref<1x128xf32, #tpu.memory_space<vmem>>, %arg7: memref<32x64xf32, #tpu.memory_space<vmem>>, %arg8: memref<1x64xf32, #tpu.memory_space<vmem>>, %arg9: memref<2x9x64xf32, #tpu.memory_space<vmem>>, %arg10: memref<2x9xi32, #tpu.memory_space<vmem>>, %arg11: memref<2x9x32xf32, #tpu.memory_space<vmem>>) attributes {dimension_semantics = [], scalar_prefetch = 0 : i64, scratch_operands = 1 : i64, tpu.core_type = #tpu.core_type<tc>} {
    %c0 = arith.constant 0 : index
    %c0_0 = arith.constant 0 : index
    %0 = vector.load %arg1[%c0, %c0_0] : memref<32x128xf32, #tpu.memory_space<vmem>>, vector<32x128xf32>
    %c0_1 = arith.constant 0 : index
    %c0_2 = arith.constant 0 : index
    %1 = vector.load %arg2[%c0_1, %c0_2] : memref<32x128xf32, #tpu.memory_space<vmem>>, vector<32x128xf32>
    %c0_3 = arith.constant 0 : index
    %c0_4 = arith.constant 0 : index
    %2 = vector.load %arg3[%c0_3, %c0_4] : memref<1x128xf32, #tpu.memory_space<vmem>>, vector<1x128xf32>
    %c0_5 = arith.constant 0 : index
    %c0_6 = arith.constant 0 : index
    %c0_7 = arith.constant 0 : index
    %3 = vector.load %arg0[%c0_5, %c0_6, %c0_7] : memref<2x9x32xf32, #tpu.memory_space<vmem>>, vector<2x9x32xf32>
    "tpu.trace_start"() <{level = 10 : i32, message = "bsi,ig->bsg"}> : () -> ()
    %cst = arith.constant dense<0.000000e+00> : vector<2x9x128xf32>
    %4 = tpu.matmul %3, %0, %cst {dimension_numbers = #tpu.dot_dimension_numbers<[2], [0], [0, 1], [1], [0, 0, 0, 1, 1, 1], [], []>} : vector<2x9x32xf32>, vector<32x128xf32>, vector<2x9x128xf32> -> vector<2x9x128xf32>
    "tpu.trace_stop"() : () -> ()
    %5 = vector.shape_cast %2 : vector<1x128xf32> to vector<1x1x128xf32>
    %6 = vector.broadcast %5 : vector<1x1x128xf32> to vector<2x9x128xf32>
    %7 = arith.addf %4, %6 : vector<2x9x128xf32>
    %cst_8 = arith.constant 0.000000e+00 : f32
    %8 = vector.broadcast %cst_8 : f32 to vector<2x32xf32>
    %cst_9 = arith.constant 0.000000e+00 : f32
    %9 = vector.broadcast %cst_9 : f32 to vector<2x32xf32>
    %10 = vector.extract_strided_slice %7 {offsets = [0, 0, 0], sizes = [2, 1, 128], strides = [1, 1, 1]} : vector<2x9x128xf32> to vector<2x1x128xf32>
    %11 = vector.shape_cast %10 : vector<2x1x128xf32> to vector<2x128xf32>
    %cst_10 = arith.constant dense<0.000000e+00> : vector<2x128xf32>
    %12 = tpu.matmul %8, %1, %cst_10 {dimension_numbers = #tpu.dot_dimension_numbers<[1], [0], [0], [1], [0, 0, 1, 1], [], []>} : vector<2x32xf32>, vector<32x128xf32>, vector<2x128xf32> -> vector<2x128xf32>
    %13 = arith.addf %11, %12 : vector<2x128xf32>
    %14 = arith.negf %13 : vector<2x128xf32>
    %15 = math.exp %14 : vector<2x128xf32>
    %cst_11 = arith.constant 1.000000e+00 : f32
    %16 = vector.broadcast %cst_11 : f32 to vector<2x128xf32>
    %17 = arith.addf %16, %15 : vector<2x128xf32>
    %18 = arith.divf %16, %17 : vector<2x128xf32>
    %19 = vector.extract_strided_slice %18 {offsets = [0, 0], sizes = [2, 32], strides = [1, 1]} : vector<2x128xf32> to vector<2x32xf32>
    %20 = vector.extract_strided_slice %18 {offsets = [0, 32], sizes = [2, 32], strides = [1, 1]} : vector<2x128xf32> to vector<2x32xf32>
    %21 = vector.extract_strided_slice %18 {offsets = [0, 96], sizes = [2, 32], strides = [1, 1]} : vector<2x128xf32> to vector<2x32xf32>
    %22 = vector.extract_strided_slice %13 {offsets = [0, 64], sizes = [2, 32], strides = [1, 1]} : vector<2x128xf32> to vector<2x32xf32>
    %23 = math.tanh %22 : vector<2x32xf32>
    %24 = arith.mulf %20, %9 : vector<2x32xf32>
    %25 = arith.mulf %19, %23 : vector<2x32xf32>
    %26 = arith.addf %24, %25 : vector<2x32xf32>
    %27 = math.tanh %26 : vector<2x32xf32>
    %28 = arith.mulf %21, %27 : vector<2x32xf32>
    %29 = vector.shape_cast %28 : vector<2x32xf32> to vector<2x1x32xf32>
    %c0_12 = arith.constant 0 : index
    %c0_13 = arith.constant 0 : index
    %c0_14 = arith.constant 0 : index
    %30 = vector.load %arg11[%c0_12, %c0_13, %c0_14] : memref<2x9x32xf32, #tpu.memory_space<vmem>>, vector<2x1x32xf32>
    tpu.vector_store %arg11[%c0_12, %c0_13, %c0_14], %29 {strides = array<i32>} : memref<2x9x32xf32, #tpu.memory_space<vmem>>, vector<2x1x32xf32>,
    %31 = vector.extract_strided_slice %7 {offsets = [0, 1, 0], sizes = [2, 1, 128], strides = [1, 1, 1]} : vector<2x9x128xf32> to vector<2x1x128xf32>
    %32 = vector.shape_cast %31 : vector<2x1x128xf32> to vector<2x128xf32>
    %cst_15 = arith.constant dense<0.000000e+00> : vector<2x128xf32>
    %33 = tpu.matmul %28, %1, %cst_15 {dimension_numbers = #tpu.dot_dimension_numbers<[1], [0], [0], [1], [0, 0, 1, 1], [], []>} : vector<2x32xf32>, vector<32x128xf32>, vector<2x128xf32> -> vector<2x128xf32>
    %34 = arith.addf %32, %33 : vector<2x128xf32>
    %35 = arith.negf %34 : vector<2x128xf32>
    %36 = math.exp %35 : vector<2x128xf32>
    %cst_16 = arith.constant 1.000000e+00 : f32
    %37 = vector.broadcast %cst_16 : f32 to vector<2x128xf32>
    %38 = arith.addf %37, %36 : vector<2x128xf32>
    %39 = arith.divf %37, %38 : vector<2x128xf32>
    %40 = vector.extract_strided_slice %39 {offsets = [0, 0], sizes = [2, 32], strides = [1, 1]} : vector<2x128xf32> to vector<2x32xf32>
    %41 = vector.extract_strided_slice %39 {offsets = [0, 32], sizes = [2, 32], strides = [1, 1]} : vector<2x128xf32> to vector<2x32xf32>
    %42 = vector.extract_strided_slice %39 {offsets = [0, 96], sizes = [2, 32], strides = [1, 1]} : vector<2x128xf32> to vector<2x32xf32>
    %43 = vector.extract_strided_slice %34 {offsets = [0, 64], sizes = [2, 32], strides = [1, 1]} : vector<2x128xf32> to vector<2x32xf32>
    %44 = math.tanh %43 : vector<2x32xf32>
    %45 = arith.mulf %41, %26 : vector<2x32xf32>
    %46 = arith.mulf %40, %44 : vector<2x32xf32>
    %47 = arith.addf %45, %46 : vector<2x32xf32>
    %48 = math.tanh %47 : vector<2x32xf32>
    %49 = arith.mulf %42, %48 : vector<2x32xf32>
    %50 = vector.shape_cast %49 : vector<2x32xf32> to vector<2x1x32xf32>
    %c0_17 = arith.constant 0 : index
    %c1 = arith.constant 1 : index
    %c0_18 = arith.constant 0 : index
    %51 = vector.load %arg11[%c0_17, %c1, %c0_18] : memref<2x9x32xf32, #tpu.memory_space<vmem>>, vector<2x1x32xf32>
    tpu.vector_store %arg11[%c0_17, %c1, %c0_18], %50 {strides = array<i32>} : memref<2x9x32xf32, #tpu.memory_space<vmem>>, vector<2x1x32xf32>,
    %52 = vector.extract_strided_slice %7 {offsets = [0, 2, 0], sizes = [2, 1, 128], strides = [1, 1, 1]} : vector<2x9x128xf32> to vector<2x1x128xf32>
    %53 = vector.shape_cast %52 : vector<2x1x128xf32> to vector<2x128xf32>
    %cst_19 = arith.constant dense<0.000000e+00> : vector<2x128xf32>
    %54 = tpu.matmul %49, %1, %cst_19 {dimension_numbers = #tpu.dot_dimension_numbers<[1], [0], [0], [1], [0, 0, 1, 1], [], []>} : vector<2x32xf32>, vector<32x128xf32>, vector<2x128xf32> -> vector<2x128xf32>
    %55 = arith.addf %53, %54 : vector<2x128xf32>
    %56 = arith.negf %55 : vector<2x128xf32>
    %57 = math.exp %56 : vector<2x128xf32>
    %cst_20 = arith.constant 1.000000e+00 : f32
    %58 = vector.broadcast %cst_20 : f32 to vector<2x128xf32>
    %59 = arith.addf %58, %57 : vector<2x128xf32>
    %60 = arith.divf %58, %59 : vector<2x128xf32>
    %61 = vector.extract_strided_slice %60 {offsets = [0, 0], sizes = [2, 32], strides = [1, 1]} : vector<2x128xf32> to vector<2x32xf32>
    %62 = vector.extract_strided_slice %60 {offsets = [0, 32], sizes = [2, 32], strides = [1, 1]} : vector<2x128xf32> to vector<2x32xf32>
    %63 = vector.extract_strided_slice %60 {offsets = [0, 96], sizes = [2, 32], strides = [1, 1]} : vector<2x128xf32> to vector<2x32xf32>
    %64 = vector.extract_strided_slice %55 {offsets = [0, 64], sizes = [2, 32], strides = [1, 1]} : vector<2x128xf32> to vector<2x32xf32>
    %65 = math.tanh %64 : vector<2x32xf32>
    %66 = arith.mulf %62, %47 : vector<2x32xf32>
    %67 = arith.mulf %61, %65 : vector<2x32xf32>
    %68 = arith.addf %66, %67 : vector<2x32xf32>
    %69 = math.tanh %68 : vector<2x32xf32>
    %70 = arith.mulf %63, %69 : vector<2x32xf32>
    %71 = vector.shape_cast %70 : vector<2x32xf32> to vector<2x1x32xf32>
    %c0_21 = arith.constant 0 : index
    %c2 = arith.constant 2 : index
    %c0_22 = arith.constant 0 : index
    %72 = vector.load %arg11[%c0_21, %c2, %c0_22] : memref<2x9x32xf32, #tpu.memory_space<vmem>>, vector<2x1x32xf32>
    tpu.vector_store %arg11[%c0_21, %c2, %c0_22], %71 {strides = array<i32>} : memref<2x9x32xf32, #tpu.memory_space<vmem>>, vector<2x1x32xf32>,
    %73 = vector.extract_strided_slice %7 {offsets = [0, 3, 0], sizes = [2, 1, 128], strides = [1, 1, 1]} : vector<2x9x128xf32> to vector<2x1x128xf32>
    %74 = vector.shape_cast %73 : vector<2x1x128xf32> to vector<2x128xf32>
    %cst_23 = arith.constant dense<0.000000e+00> : vector<2x128xf32>
    %75 = tpu.matmul %70, %1, %cst_23 {dimension_numbers = #tpu.dot_dimension_numbers<[1], [0], [0], [1], [0, 0, 1, 1], [], []>} : vector<2x32xf32>, vector<32x128xf32>, vector<2x128xf32> -> vector<2x128xf32>
    %76 = arith.addf %74, %75 : vector<2x128xf32>
    %77 = arith.negf %76 : vector<2x128xf32>
    %78 = math.exp %77 : vector<2x128xf32>
    %cst_24 = arith.constant 1.000000e+00 : f32
    %79 = vector.broadcast %cst_24 : f32 to vector<2x128xf32>
    %80 = arith.addf %79, %78 : vector<2x128xf32>
    %81 = arith.divf %79, %80 : vector<2x128xf32>
    %82 = vector.extract_strided_slice %81 {offsets = [0, 0], sizes = [2, 32], strides = [1, 1]} : vector<2x128xf32> to vector<2x32xf32>
    %83 = vector.extract_strided_slice %81 {offsets = [0, 32], sizes = [2, 32], strides = [1, 1]} : vector<2x128xf32> to vector<2x32xf32>
    %84 = vector.extract_strided_slice %81 {offsets = [0, 96], sizes = [2, 32], strides = [1, 1]} : vector<2x128xf32> to vector<2x32xf32>
    %85 = vector.extract_strided_slice %76 {offsets = [0, 64], sizes = [2, 32], strides = [1, 1]} : vector<2x128xf32> to vector<2x32xf32>
    %86 = math.tanh %85 : vector<2x32xf32>
    %87 = arith.mulf %83, %68 : vector<2x32xf32>
    %88 = arith.mulf %82, %86 : vector<2x32xf32>
    %89 = arith.addf %87, %88 : vector<2x32xf32>
    %90 = math.tanh %89 : vector<2x32xf32>
    %91 = arith.mulf %84, %90 : vector<2x32xf32>
    %92 = vector.shape_cast %91 : vector<2x32xf32> to vector<2x1x32xf32>
    %c0_25 = arith.constant 0 : index
    %c3 = arith.constant 3 : index
    %c0_26 = arith.constant 0 : index
    %93 = vector.load %arg11[%c0_25, %c3, %c0_26] : memref<2x9x32xf32, #tpu.memory_space<vmem>>, vector<2x1x32xf32>
    tpu.vector_store %arg11[%c0_25, %c3, %c0_26], %92 {strides = array<i32>} : memref<2x9x32xf32, #tpu.memory_space<vmem>>, vector<2x1x32xf32>,
    %94 = vector.extract_strided_slice %7 {offsets = [0, 4, 0], sizes = [2, 1, 128], strides = [1, 1, 1]} : vector<2x9x128xf32> to vector<2x1x128xf32>
    %95 = vector.shape_cast %94 : vector<2x1x128xf32> to vector<2x128xf32>
    %cst_27 = arith.constant dense<0.000000e+00> : vector<2x128xf32>
    %96 = tpu.matmul %91, %1, %cst_27 {dimension_numbers = #tpu.dot_dimension_numbers<[1], [0], [0], [1], [0, 0, 1, 1], [], []>} : vector<2x32xf32>, vector<32x128xf32>, vector<2x128xf32> -> vector<2x128xf32>
    %97 = arith.addf %95, %96 : vector<2x128xf32>
    %98 = arith.negf %97 : vector<2x128xf32>
    %99 = math.exp %98 : vector<2x128xf32>
    %cst_28 = arith.constant 1.000000e+00 : f32
    %100 = vector.broadcast %cst_28 : f32 to vector<2x128xf32>
    %101 = arith.addf %100, %99 : vector<2x128xf32>
    %102 = arith.divf %100, %101 : vector<2x128xf32>
    %103 = vector.extract_strided_slice %102 {offsets = [0, 0], sizes = [2, 32], strides = [1, 1]} : vector<2x128xf32> to vector<2x32xf32>
    %104 = vector.extract_strided_slice %102 {offsets = [0, 32], sizes = [2, 32], strides = [1, 1]} : vector<2x128xf32> to vector<2x32xf32>
    %105 = vector.extract_strided_slice %102 {offsets = [0, 96], sizes = [2, 32], strides = [1, 1]} : vector<2x128xf32> to vector<2x32xf32>
    %106 = vector.extract_strided_slice %97 {offsets = [0, 64], sizes = [2, 32], strides = [1, 1]} : vector<2x128xf32> to vector<2x32xf32>
    %107 = math.tanh %106 : vector<2x32xf32>
    %108 = arith.mulf %104, %89 : vector<2x32xf32>
    %109 = arith.mulf %103, %107 : vector<2x32xf32>
    %110 = arith.addf %108, %109 : vector<2x32xf32>
    %111 = math.tanh %110 : vector<2x32xf32>
    %112 = arith.mulf %105, %111 : vector<2x32xf32>
    %113 = vector.shape_cast %112 : vector<2x32xf32> to vector<2x1x32xf32>
    %c0_29 = arith.constant 0 : index
    %c4 = arith.constant 4 : index
    %c0_30 = arith.constant 0 : index
    %114 = vector.load %arg11[%c0_29, %c4, %c0_30] : memref<2x9x32xf32, #tpu.memory_space<vmem>>, vector<2x1x32xf32>
    tpu.vector_store %arg11[%c0_29, %c4, %c0_30], %113 {strides = array<i32>} : memref<2x9x32xf32, #tpu.memory_space<vmem>>, vector<2x1x32xf32>,
    %115 = vector.extract_strided_slice %7 {offsets = [0, 5, 0], sizes = [2, 1, 128], strides = [1, 1, 1]} : vector<2x9x128xf32> to vector<2x1x128xf32>
    %116 = vector.shape_cast %115 : vector<2x1x128xf32> to vector<2x128xf32>
    %cst_31 = arith.constant dense<0.000000e+00> : vector<2x128xf32>
    %117 = tpu.matmul %112, %1, %cst_31 {dimension_numbers = #tpu.dot_dimension_numbers<[1], [0], [0], [1], [0, 0, 1, 1], [], []>} : vector<2x32xf32>, vector<32x128xf32>, vector<2x128xf32> -> vector<2x128xf32>
    %118 = arith.addf %116, %117 : vector<2x128xf32>
    %119 = arith.negf %118 : vector<2x128xf32>
    %120 = math.exp %119 : vector<2x128xf32>
    %cst_32 = arith.constant 1.000000e+00 : f32
    %121 = vector.broadcast %cst_32 : f32 to vector<2x128xf32>
    %122 = arith.addf %121, %120 : vector<2x128xf32>
    %123 = arith.divf %121, %122 : vector<2x128xf32>
    %124 = vector.extract_strided_slice %123 {offsets = [0, 0], sizes = [2, 32], strides = [1, 1]} : vector<2x128xf32> to vector<2x32xf32>
    %125 = vector.extract_strided_slice %123 {offsets = [0, 32], sizes = [2, 32], strides = [1, 1]} : vector<2x128xf32> to vector<2x32xf32>
    %126 = vector.extract_strided_slice %123 {offsets = [0, 96], sizes = [2, 32], strides = [1, 1]} : vector<2x128xf32> to vector<2x32xf32>
    %127 = vector.extract_strided_slice %118 {offsets = [0, 64], sizes = [2, 32], strides = [1, 1]} : vector<2x128xf32> to vector<2x32xf32>
    %128 = math.tanh %127 : vector<2x32xf32>
    %129 = arith.mulf %125, %110 : vector<2x32xf32>
    %130 = arith.mulf %124, %128 : vector<2x32xf32>
    %131 = arith.addf %129, %130 : vector<2x32xf32>
    %132 = math.tanh %131 : vector<2x32xf32>
    %133 = arith.mulf %126, %132 : vector<2x32xf32>
    %134 = vector.shape_cast %133 : vector<2x32xf32> to vector<2x1x32xf32>
    %c0_33 = arith.constant 0 : index
    %c5 = arith.constant 5 : index
    %c0_34 = arith.constant 0 : index
    %135 = vector.load %arg11[%c0_33, %c5, %c0_34] : memref<2x9x32xf32, #tpu.memory_space<vmem>>, vector<2x1x32xf32>
    tpu.vector_store %arg11[%c0_33, %c5, %c0_34], %134 {strides = array<i32>} : memref<2x9x32xf32, #tpu.memory_space<vmem>>, vector<2x1x32xf32>,
    %136 = vector.extract_strided_slice %7 {offsets = [0, 6, 0], sizes = [2, 1, 128], strides = [1, 1, 1]} : vector<2x9x128xf32> to vector<2x1x128xf32>
    %137 = vector.shape_cast %136 : vector<2x1x128xf32> to vector<2x128xf32>
    %cst_35 = arith.constant dense<0.000000e+00> : vector<2x128xf32>
    %138 = tpu.matmul %133, %1, %cst_35 {dimension_numbers = #tpu.dot_dimension_numbers<[1], [0], [0], [1], [0, 0, 1, 1], [], []>} : vector<2x32xf32>, vector<32x128xf32>, vector<2x128xf32> -> vector<2x128xf32>
    %139 = arith.addf %137, %138 : vector<2x128xf32>
    %140 = arith.negf %139 : vector<2x128xf32>
    %141 = math.exp %140 : vector<2x128xf32>
    %cst_36 = arith.constant 1.000000e+00 : f32
    %142 = vector.broadcast %cst_36 : f32 to vector<2x128xf32>
    %143 = arith.addf %142, %141 : vector<2x128xf32>
    %144 = arith.divf %142, %143 : vector<2x128xf32>
    %145 = vector.extract_strided_slice %144 {offsets = [0, 0], sizes = [2, 32], strides = [1, 1]} : vector<2x128xf32> to vector<2x32xf32>
    %146 = vector.extract_strided_slice %144 {offsets = [0, 32], sizes = [2, 32], strides = [1, 1]} : vector<2x128xf32> to vector<2x32xf32>
    %147 = vector.extract_strided_slice %144 {offsets = [0, 96], sizes = [2, 32], strides = [1, 1]} : vector<2x128xf32> to vector<2x32xf32>
    %148 = vector.extract_strided_slice %139 {offsets = [0, 64], sizes = [2, 32], strides = [1, 1]} : vector<2x128xf32> to vector<2x32xf32>
    %149 = math.tanh %148 : vector<2x32xf32>
    %150 = arith.mulf %146, %131 : vector<2x32xf32>
    %151 = arith.mulf %145, %149 : vector<2x32xf32>
    %152 = arith.addf %150, %151 : vector<2x32xf32>
    %153 = math.tanh %152 : vector<2x32xf32>
    %154 = arith.mulf %147, %153 : vector<2x32xf32>
    %155 = vector.shape_cast %154 : vector<2x32xf32> to vector<2x1x32xf32>
    %c0_37 = arith.constant 0 : index
    %c6 = arith.constant 6 : index
    %c0_38 = arith.constant 0 : index
    %156 = vector.load %arg11[%c0_37, %c6, %c0_38] : memref<2x9x32xf32, #tpu.memory_space<vmem>>, vector<2x1x32xf32>
    tpu.vector_store %arg11[%c0_37, %c6, %c0_38], %155 {strides = array<i32>} : memref<2x9x32xf32, #tpu.memory_space<vmem>>, vector<2x1x32xf32>,
    %157 = vector.extract_strided_slice %7 {offsets = [0, 7, 0], sizes = [2, 1, 128], strides = [1, 1, 1]} : vector<2x9x128xf32> to vector<2x1x128xf32>
    %158 = vector.shape_cast %157 : vector<2x1x128xf32> to vector<2x128xf32>
    %cst_39 = arith.constant dense<0.000000e+00> : vector<2x128xf32>
    %159 = tpu.matmul %154, %1, %cst_39 {dimension_numbers = #tpu.dot_dimension_numbers<[1], [0], [0], [1], [0, 0, 1, 1], [], []>} : vector<2x32xf32>, vector<32x128xf32>, vector<2x128xf32> -> vector<2x128xf32>
    %160 = arith.addf %158, %159 : vector<2x128xf32>
    %161 = arith.negf %160 : vector<2x128xf32>
    %162 = math.exp %161 : vector<2x128xf32>
    %cst_40 = arith.constant 1.000000e+00 : f32
    %163 = vector.broadcast %cst_40 : f32 to vector<2x128xf32>
    %164 = arith.addf %163, %162 : vector<2x128xf32>
    %165 = arith.divf %163, %164 : vector<2x128xf32>
    %166 = vector.extract_strided_slice %165 {offsets = [0, 0], sizes = [2, 32], strides = [1, 1]} : vector<2x128xf32> to vector<2x32xf32>
    %167 = vector.extract_strided_slice %165 {offsets = [0, 32], sizes = [2, 32], strides = [1, 1]} : vector<2x128xf32> to vector<2x32xf32>
    %168 = vector.extract_strided_slice %165 {offsets = [0, 96], sizes = [2, 32], strides = [1, 1]} : vector<2x128xf32> to vector<2x32xf32>
    %169 = vector.extract_strided_slice %160 {offsets = [0, 64], sizes = [2, 32], strides = [1, 1]} : vector<2x128xf32> to vector<2x32xf32>
    %170 = math.tanh %169 : vector<2x32xf32>
    %171 = arith.mulf %167, %152 : vector<2x32xf32>
    %172 = arith.mulf %166, %170 : vector<2x32xf32>
    %173 = arith.addf %171, %172 : vector<2x32xf32>
    %174 = math.tanh %173 : vector<2x32xf32>
    %175 = arith.mulf %168, %174 : vector<2x32xf32>
    %176 = vector.shape_cast %175 : vector<2x32xf32> to vector<2x1x32xf32>
    %c0_41 = arith.constant 0 : index
    %c7 = arith.constant 7 : index
    %c0_42 = arith.constant 0 : index
    %177 = vector.load %arg11[%c0_41, %c7, %c0_42] : memref<2x9x32xf32, #tpu.memory_space<vmem>>, vector<2x1x32xf32>
    tpu.vector_store %arg11[%c0_41, %c7, %c0_42], %176 {strides = array<i32>} : memref<2x9x32xf32, #tpu.memory_space<vmem>>, vector<2x1x32xf32>,
    %178 = vector.extract_strided_slice %7 {offsets = [0, 8, 0], sizes = [2, 1, 128], strides = [1, 1, 1]} : vector<2x9x128xf32> to vector<2x1x128xf32>
    %179 = vector.shape_cast %178 : vector<2x1x128xf32> to vector<2x128xf32>
    %cst_43 = arith.constant dense<0.000000e+00> : vector<2x128xf32>
    %180 = tpu.matmul %175, %1, %cst_43 {dimension_numbers = #tpu.dot_dimension_numbers<[1], [0], [0], [1], [0, 0, 1, 1], [], []>} : vector<2x32xf32>, vector<32x128xf32>, vector<2x128xf32> -> vector<2x128xf32>
    %181 = arith.addf %179, %180 : vector<2x128xf32>
    %182 = arith.negf %181 : vector<2x128xf32>
    %183 = math.exp %182 : vector<2x128xf32>
    %cst_44 = arith.constant 1.000000e+00 : f32
    %184 = vector.broadcast %cst_44 : f32 to vector<2x128xf32>
    %185 = arith.addf %184, %183 : vector<2x128xf32>
    %186 = arith.divf %184, %185 : vector<2x128xf32>
    %187 = vector.extract_strided_slice %186 {offsets = [0, 0], sizes = [2, 32], strides = [1, 1]} : vector<2x128xf32> to vector<2x32xf32>
    %188 = vector.extract_strided_slice %186 {offsets = [0, 32], sizes = [2, 32], strides = [1, 1]} : vector<2x128xf32> to vector<2x32xf32>
    %189 = vector.extract_strided_slice %186 {offsets = [0, 96], sizes = [2, 32], strides = [1, 1]} : vector<2x128xf32> to vector<2x32xf32>
    %190 = vector.extract_strided_slice %181 {offsets = [0, 64], sizes = [2, 32], strides = [1, 1]} : vector<2x128xf32> to vector<2x32xf32>
    %191 = math.tanh %190 : vector<2x32xf32>
    %192 = arith.mulf %188, %173 : vector<2x32xf32>
    %193 = arith.mulf %187, %191 : vector<2x32xf32>
    %194 = arith.addf %192, %193 : vector<2x32xf32>
    %195 = math.tanh %194 : vector<2x32xf32>
    %196 = arith.mulf %189, %195 : vector<2x32xf32>
    %197 = vector.shape_cast %196 : vector<2x32xf32> to vector<2x1x32xf32>
    %c0_45 = arith.constant 0 : index
    %c8 = arith.constant 8 : index
    %c0_46 = arith.constant 0 : index
    %198 = vector.load %arg11[%c0_45, %c8, %c0_46] : memref<2x9x32xf32, #tpu.memory_space<vmem>>, vector<2x1x32xf32>
    tpu.vector_store %arg11[%c0_45, %c8, %c0_46], %197 {strides = array<i32>} : memref<2x9x32xf32, #tpu.memory_space<vmem>>, vector<2x1x32xf32>,
    %c0_47 = arith.constant 0 : index
    %c0_48 = arith.constant 0 : index
    %199 = vector.load %arg4[%c0_47, %c0_48] : memref<32x128xf32, #tpu.memory_space<vmem>>, vector<32x128xf32>
    %c0_49 = arith.constant 0 : index
    %c0_50 = arith.constant 0 : index
    %200 = vector.load %arg5[%c0_49, %c0_50] : memref<32x128xf32, #tpu.memory_space<vmem>>, vector<32x128xf32>
    %c0_51 = arith.constant 0 : index
    %c0_52 = arith.constant 0 : index
    %201 = vector.load %arg6[%c0_51, %c0_52] : memref<1x128xf32, #tpu.memory_space<vmem>>, vector<1x128xf32>
    %c0_53 = arith.constant 0 : index
    %c0_54 = arith.constant 0 : index
    %c0_55 = arith.constant 0 : index
    %202 = vector.load %arg11[%c0_53, %c0_54, %c0_55] : memref<2x9x32xf32, #tpu.memory_space<vmem>>, vector<2x9x32xf32>
    "tpu.trace_start"() <{level = 10 : i32, message = "bsi,ig->bsg"}> : () -> ()
    %cst_56 = arith.constant dense<0.000000e+00> : vector<2x9x128xf32>
    %203 = tpu.matmul %202, %199, %cst_56 {dimension_numbers = #tpu.dot_dimension_numbers<[2], [0], [0, 1], [1], [0, 0, 0, 1, 1, 1], [], []>} : vector<2x9x32xf32>, vector<32x128xf32>, vector<2x9x128xf32> -> vector<2x9x128xf32>
    "tpu.trace_stop"() : () -> ()
    %204 = vector.shape_cast %201 : vector<1x128xf32> to vector<1x1x128xf32>
    %205 = vector.broadcast %204 : vector<1x1x128xf32> to vector<2x9x128xf32>
    %206 = arith.addf %203, %205 : vector<2x9x128xf32>
    %cst_57 = arith.constant 0.000000e+00 : f32
    %207 = vector.broadcast %cst_57 : f32 to vector<2x32xf32>
    %cst_58 = arith.constant 0.000000e+00 : f32
    %208 = vector.broadcast %cst_58 : f32 to vector<2x32xf32>
    %209 = vector.extract_strided_slice %206 {offsets = [0, 0, 0], sizes = [2, 1, 128], strides = [1, 1, 1]} : vector<2x9x128xf32> to vector<2x1x128xf32>
    %210 = vector.shape_cast %209 : vector<2x1x128xf32> to vector<2x128xf32>
    %cst_59 = arith.constant dense<0.000000e+00> : vector<2x128xf32>
    %211 = tpu.matmul %207, %200, %cst_59 {dimension_numbers = #tpu.dot_dimension_numbers<[1], [0], [0], [1], [0, 0, 1, 1], [], []>} : vector<2x32xf32>, vector<32x128xf32>, vector<2x128xf32> -> vector<2x128xf32>
    %212 = arith.addf %210, %211 : vector<2x128xf32>
    %213 = arith.negf %212 : vector<2x128xf32>
    %214 = math.exp %213 : vector<2x128xf32>
    %cst_60 = arith.constant 1.000000e+00 : f32
    %215 = vector.broadcast %cst_60 : f32 to vector<2x128xf32>
    %216 = arith.addf %215, %214 : vector<2x128xf32>
    %217 = arith.divf %215, %216 : vector<2x128xf32>
    %218 = vector.extract_strided_slice %217 {offsets = [0, 0], sizes = [2, 32], strides = [1, 1]} : vector<2x128xf32> to vector<2x32xf32>
    %219 = vector.extract_strided_slice %217 {offsets = [0, 32], sizes = [2, 32], strides = [1, 1]} : vector<2x128xf32> to vector<2x32xf32>
    %220 = vector.extract_strided_slice %217 {offsets = [0, 96], sizes = [2, 32], strides = [1, 1]} : vector<2x128xf32> to vector<2x32xf32>
    %221 = vector.extract_strided_slice %212 {offsets = [0, 64], sizes = [2, 32], strides = [1, 1]} : vector<2x128xf32> to vector<2x32xf32>
    %222 = math.tanh %221 : vector<2x32xf32>
    %223 = arith.mulf %219, %208 : vector<2x32xf32>
    %224 = arith.mulf %218, %222 : vector<2x32xf32>
    %225 = arith.addf %223, %224 : vector<2x32xf32>
    %226 = math.tanh %225 : vector<2x32xf32>
    %227 = arith.mulf %220, %226 : vector<2x32xf32>
    %228 = vector.shape_cast %227 : vector<2x32xf32> to vector<2x1x32xf32>
    %c0_61 = arith.constant 0 : index
    %c0_62 = arith.constant 0 : index
    %c0_63 = arith.constant 0 : index
    %229 = vector.load %arg11[%c0_61, %c0_62, %c0_63] : memref<2x9x32xf32, #tpu.memory_space<vmem>>, vector<2x1x32xf32>
    tpu.vector_store %arg11[%c0_61, %c0_62, %c0_63], %228 {strides = array<i32>} : memref<2x9x32xf32, #tpu.memory_space<vmem>>, vector<2x1x32xf32>,
    %230 = vector.extract_strided_slice %206 {offsets = [0, 1, 0], sizes = [2, 1, 128], strides = [1, 1, 1]} : vector<2x9x128xf32> to vector<2x1x128xf32>
    %231 = vector.shape_cast %230 : vector<2x1x128xf32> to vector<2x128xf32>
    %cst_64 = arith.constant dense<0.000000e+00> : vector<2x128xf32>
    %232 = tpu.matmul %227, %200, %cst_64 {dimension_numbers = #tpu.dot_dimension_numbers<[1], [0], [0], [1], [0, 0, 1, 1], [], []>} : vector<2x32xf32>, vector<32x128xf32>, vector<2x128xf32> -> vector<2x128xf32>
    %233 = arith.addf %231, %232 : vector<2x128xf32>
    %234 = arith.negf %233 : vector<2x128xf32>
    %235 = math.exp %234 : vector<2x128xf32>
    %cst_65 = arith.constant 1.000000e+00 : f32
    %236 = vector.broadcast %cst_65 : f32 to vector<2x128xf32>
    %237 = arith.addf %236, %235 : vector<2x128xf32>
    %238 = arith.divf %236, %237 : vector<2x128xf32>
    %239 = vector.extract_strided_slice %238 {offsets = [0, 0], sizes = [2, 32], strides = [1, 1]} : vector<2x128xf32> to vector<2x32xf32>
    %240 = vector.extract_strided_slice %238 {offsets = [0, 32], sizes = [2, 32], strides = [1, 1]} : vector<2x128xf32> to vector<2x32xf32>
    %241 = vector.extract_strided_slice %238 {offsets = [0, 96], sizes = [2, 32], strides = [1, 1]} : vector<2x128xf32> to vector<2x32xf32>
    %242 = vector.extract_strided_slice %233 {offsets = [0, 64], sizes = [2, 32], strides = [1, 1]} : vector<2x128xf32> to vector<2x32xf32>
    %243 = math.tanh %242 : vector<2x32xf32>
    %244 = arith.mulf %240, %225 : vector<2x32xf32>
    %245 = arith.mulf %239, %243 : vector<2x32xf32>
    %246 = arith.addf %244, %245 : vector<2x32xf32>
    %247 = math.tanh %246 : vector<2x32xf32>
    %248 = arith.mulf %241, %247 : vector<2x32xf32>
    %249 = vector.shape_cast %248 : vector<2x32xf32> to vector<2x1x32xf32>
    %c0_66 = arith.constant 0 : index
    %c1_67 = arith.constant 1 : index
    %c0_68 = arith.constant 0 : index
    %250 = vector.load %arg11[%c0_66, %c1_67, %c0_68] : memref<2x9x32xf32, #tpu.memory_space<vmem>>, vector<2x1x32xf32>
    tpu.vector_store %arg11[%c0_66, %c1_67, %c0_68], %249 {strides = array<i32>} : memref<2x9x32xf32, #tpu.memory_space<vmem>>, vector<2x1x32xf32>,
    %251 = vector.extract_strided_slice %206 {offsets = [0, 2, 0], sizes = [2, 1, 128], strides = [1, 1, 1]} : vector<2x9x128xf32> to vector<2x1x128xf32>
    %252 = vector.shape_cast %251 : vector<2x1x128xf32> to vector<2x128xf32>
    %cst_69 = arith.constant dense<0.000000e+00> : vector<2x128xf32>
    %253 = tpu.matmul %248, %200, %cst_69 {dimension_numbers = #tpu.dot_dimension_numbers<[1], [0], [0], [1], [0, 0, 1, 1], [], []>} : vector<2x32xf32>, vector<32x128xf32>, vector<2x128xf32> -> vector<2x128xf32>
    %254 = arith.addf %252, %253 : vector<2x128xf32>
    %255 = arith.negf %254 : vector<2x128xf32>
    %256 = math.exp %255 : vector<2x128xf32>
    %cst_70 = arith.constant 1.000000e+00 : f32
    %257 = vector.broadcast %cst_70 : f32 to vector<2x128xf32>
    %258 = arith.addf %257, %256 : vector<2x128xf32>
    %259 = arith.divf %257, %258 : vector<2x128xf32>
    %260 = vector.extract_strided_slice %259 {offsets = [0, 0], sizes = [2, 32], strides = [1, 1]} : vector<2x128xf32> to vector<2x32xf32>
    %261 = vector.extract_strided_slice %259 {offsets = [0, 32], sizes = [2, 32], strides = [1, 1]} : vector<2x128xf32> to vector<2x32xf32>
    %262 = vector.extract_strided_slice %259 {offsets = [0, 96], sizes = [2, 32], strides = [1, 1]} : vector<2x128xf32> to vector<2x32xf32>
    %263 = vector.extract_strided_slice %254 {offsets = [0, 64], sizes = [2, 32], strides = [1, 1]} : vector<2x128xf32> to vector<2x32xf32>
    %264 = math.tanh %263 : vector<2x32xf32>
    %265 = arith.mulf %261, %246 : vector<2x32xf32>
    %266 = arith.mulf %260, %264 : vector<2x32xf32>
    %267 = arith.addf %265, %266 : vector<2x32xf32>
    %268 = math.tanh %267 : vector<2x32xf32>
    %269 = arith.mulf %262, %268 : vector<2x32xf32>
    %270 = vector.shape_cast %269 : vector<2x32xf32> to vector<2x1x32xf32>
    %c0_71 = arith.constant 0 : index
    %c2_72 = arith.constant 2 : index
    %c0_73 = arith.constant 0 : index
    %271 = vector.load %arg11[%c0_71, %c2_72, %c0_73] : memref<2x9x32xf32, #tpu.memory_space<vmem>>, vector<2x1x32xf32>
    tpu.vector_store %arg11[%c0_71, %c2_72, %c0_73], %270 {strides = array<i32>} : memref<2x9x32xf32, #tpu.memory_space<vmem>>, vector<2x1x32xf32>,
    %272 = vector.extract_strided_slice %206 {offsets = [0, 3, 0], sizes = [2, 1, 128], strides = [1, 1, 1]} : vector<2x9x128xf32> to vector<2x1x128xf32>
    %273 = vector.shape_cast %272 : vector<2x1x128xf32> to vector<2x128xf32>
    %cst_74 = arith.constant dense<0.000000e+00> : vector<2x128xf32>
    %274 = tpu.matmul %269, %200, %cst_74 {dimension_numbers = #tpu.dot_dimension_numbers<[1], [0], [0], [1], [0, 0, 1, 1], [], []>} : vector<2x32xf32>, vector<32x128xf32>, vector<2x128xf32> -> vector<2x128xf32>
    %275 = arith.addf %273, %274 : vector<2x128xf32>
    %276 = arith.negf %275 : vector<2x128xf32>
    %277 = math.exp %276 : vector<2x128xf32>
    %cst_75 = arith.constant 1.000000e+00 : f32
    %278 = vector.broadcast %cst_75 : f32 to vector<2x128xf32>
    %279 = arith.addf %278, %277 : vector<2x128xf32>
    %280 = arith.divf %278, %279 : vector<2x128xf32>
    %281 = vector.extract_strided_slice %280 {offsets = [0, 0], sizes = [2, 32], strides = [1, 1]} : vector<2x128xf32> to vector<2x32xf32>
    %282 = vector.extract_strided_slice %280 {offsets = [0, 32], sizes = [2, 32], strides = [1, 1]} : vector<2x128xf32> to vector<2x32xf32>
    %283 = vector.extract_strided_slice %280 {offsets = [0, 96], sizes = [2, 32], strides = [1, 1]} : vector<2x128xf32> to vector<2x32xf32>
    %284 = vector.extract_strided_slice %275 {offsets = [0, 64], sizes = [2, 32], strides = [1, 1]} : vector<2x128xf32> to vector<2x32xf32>
    %285 = math.tanh %284 : vector<2x32xf32>
    %286 = arith.mulf %282, %267 : vector<2x32xf32>
    %287 = arith.mulf %281, %285 : vector<2x32xf32>
    %288 = arith.addf %286, %287 : vector<2x32xf32>
    %289 = math.tanh %288 : vector<2x32xf32>
    %290 = arith.mulf %283, %289 : vector<2x32xf32>
    %291 = vector.shape_cast %290 : vector<2x32xf32> to vector<2x1x32xf32>
    %c0_76 = arith.constant 0 : index
    %c3_77 = arith.constant 3 : index
    %c0_78 = arith.constant 0 : index
    %292 = vector.load %arg11[%c0_76, %c3_77, %c0_78] : memref<2x9x32xf32, #tpu.memory_space<vmem>>, vector<2x1x32xf32>
    tpu.vector_store %arg11[%c0_76, %c3_77, %c0_78], %291 {strides = array<i32>} : memref<2x9x32xf32, #tpu.memory_space<vmem>>, vector<2x1x32xf32>,
    %293 = vector.extract_strided_slice %206 {offsets = [0, 4, 0], sizes = [2, 1, 128], strides = [1, 1, 1]} : vector<2x9x128xf32> to vector<2x1x128xf32>
    %294 = vector.shape_cast %293 : vector<2x1x128xf32> to vector<2x128xf32>
    %cst_79 = arith.constant dense<0.000000e+00> : vector<2x128xf32>
    %295 = tpu.matmul %290, %200, %cst_79 {dimension_numbers = #tpu.dot_dimension_numbers<[1], [0], [0], [1], [0, 0, 1, 1], [], []>} : vector<2x32xf32>, vector<32x128xf32>, vector<2x128xf32> -> vector<2x128xf32>
    %296 = arith.addf %294, %295 : vector<2x128xf32>
    %297 = arith.negf %296 : vector<2x128xf32>
    %298 = math.exp %297 : vector<2x128xf32>
    %cst_80 = arith.constant 1.000000e+00 : f32
    %299 = vector.broadcast %cst_80 : f32 to vector<2x128xf32>
    %300 = arith.addf %299, %298 : vector<2x128xf32>
    %301 = arith.divf %299, %300 : vector<2x128xf32>
    %302 = vector.extract_strided_slice %301 {offsets = [0, 0], sizes = [2, 32], strides = [1, 1]} : vector<2x128xf32> to vector<2x32xf32>
    %303 = vector.extract_strided_slice %301 {offsets = [0, 32], sizes = [2, 32], strides = [1, 1]} : vector<2x128xf32> to vector<2x32xf32>
    %304 = vector.extract_strided_slice %301 {offsets = [0, 96], sizes = [2, 32], strides = [1, 1]} : vector<2x128xf32> to vector<2x32xf32>
    %305 = vector.extract_strided_slice %296 {offsets = [0, 64], sizes = [2, 32], strides = [1, 1]} : vector<2x128xf32> to vector<2x32xf32>
    %306 = math.tanh %305 : vector<2x32xf32>
    %307 = arith.mulf %303, %288 : vector<2x32xf32>
    %308 = arith.mulf %302, %306 : vector<2x32xf32>
    %309 = arith.addf %307, %308 : vector<2x32xf32>
    %310 = math.tanh %309 : vector<2x32xf32>
    %311 = arith.mulf %304, %310 : vector<2x32xf32>
    %312 = vector.shape_cast %311 : vector<2x32xf32> to vector<2x1x32xf32>
    %c0_81 = arith.constant 0 : index
    %c4_82 = arith.constant 4 : index
    %c0_83 = arith.constant 0 : index
    %313 = vector.load %arg11[%c0_81, %c4_82, %c0_83] : memref<2x9x32xf32, #tpu.memory_space<vmem>>, vector<2x1x32xf32>
    tpu.vector_store %arg11[%c0_81, %c4_82, %c0_83], %312 {strides = array<i32>} : memref<2x9x32xf32, #tpu.memory_space<vmem>>, vector<2x1x32xf32>,
    %314 = vector.extract_strided_slice %206 {offsets = [0, 5, 0], sizes = [2, 1, 128], strides = [1, 1, 1]} : vector<2x9x128xf32> to vector<2x1x128xf32>
    %315 = vector.shape_cast %314 : vector<2x1x128xf32> to vector<2x128xf32>
    %cst_84 = arith.constant dense<0.000000e+00> : vector<2x128xf32>
    %316 = tpu.matmul %311, %200, %cst_84 {dimension_numbers = #tpu.dot_dimension_numbers<[1], [0], [0], [1], [0, 0, 1, 1], [], []>} : vector<2x32xf32>, vector<32x128xf32>, vector<2x128xf32> -> vector<2x128xf32>
    %317 = arith.addf %315, %316 : vector<2x128xf32>
    %318 = arith.negf %317 : vector<2x128xf32>
    %319 = math.exp %318 : vector<2x128xf32>
    %cst_85 = arith.constant 1.000000e+00 : f32
    %320 = vector.broadcast %cst_85 : f32 to vector<2x128xf32>
    %321 = arith.addf %320, %319 : vector<2x128xf32>
    %322 = arith.divf %320, %321 : vector<2x128xf32>
    %323 = vector.extract_strided_slice %322 {offsets = [0, 0], sizes = [2, 32], strides = [1, 1]} : vector<2x128xf32> to vector<2x32xf32>
    %324 = vector.extract_strided_slice %322 {offsets = [0, 32], sizes = [2, 32], strides = [1, 1]} : vector<2x128xf32> to vector<2x32xf32>
    %325 = vector.extract_strided_slice %322 {offsets = [0, 96], sizes = [2, 32], strides = [1, 1]} : vector<2x128xf32> to vector<2x32xf32>
    %326 = vector.extract_strided_slice %317 {offsets = [0, 64], sizes = [2, 32], strides = [1, 1]} : vector<2x128xf32> to vector<2x32xf32>
    %327 = math.tanh %326 : vector<2x32xf32>
    %328 = arith.mulf %324, %309 : vector<2x32xf32>
    %329 = arith.mulf %323, %327 : vector<2x32xf32>
    %330 = arith.addf %328, %329 : vector<2x32xf32>
    %331 = math.tanh %330 : vector<2x32xf32>
    %332 = arith.mulf %325, %331 : vector<2x32xf32>
    %333 = vector.shape_cast %332 : vector<2x32xf32> to vector<2x1x32xf32>
    %c0_86 = arith.constant 0 : index
    %c5_87 = arith.constant 5 : index
    %c0_88 = arith.constant 0 : index
    %334 = vector.load %arg11[%c0_86, %c5_87, %c0_88] : memref<2x9x32xf32, #tpu.memory_space<vmem>>, vector<2x1x32xf32>
    tpu.vector_store %arg11[%c0_86, %c5_87, %c0_88], %333 {strides = array<i32>} : memref<2x9x32xf32, #tpu.memory_space<vmem>>, vector<2x1x32xf32>,
    %335 = vector.extract_strided_slice %206 {offsets = [0, 6, 0], sizes = [2, 1, 128], strides = [1, 1, 1]} : vector<2x9x128xf32> to vector<2x1x128xf32>
    %336 = vector.shape_cast %335 : vector<2x1x128xf32> to vector<2x128xf32>
    %cst_89 = arith.constant dense<0.000000e+00> : vector<2x128xf32>
    %337 = tpu.matmul %332, %200, %cst_89 {dimension_numbers = #tpu.dot_dimension_numbers<[1], [0], [0], [1], [0, 0, 1, 1], [], []>} : vector<2x32xf32>, vector<32x128xf32>, vector<2x128xf32> -> vector<2x128xf32>
    %338 = arith.addf %336, %337 : vector<2x128xf32>
    %339 = arith.negf %338 : vector<2x128xf32>
    %340 = math.exp %339 : vector<2x128xf32>
    %cst_90 = arith.constant 1.000000e+00 : f32
    %341 = vector.broadcast %cst_90 : f32 to vector<2x128xf32>
    %342 = arith.addf %341, %340 : vector<2x128xf32>
    %343 = arith.divf %341, %342 : vector<2x128xf32>
    %344 = vector.extract_strided_slice %343 {offsets = [0, 0], sizes = [2, 32], strides = [1, 1]} : vector<2x128xf32> to vector<2x32xf32>
    %345 = vector.extract_strided_slice %343 {offsets = [0, 32], sizes = [2, 32], strides = [1, 1]} : vector<2x128xf32> to vector<2x32xf32>
    %346 = vector.extract_strided_slice %343 {offsets = [0, 96], sizes = [2, 32], strides = [1, 1]} : vector<2x128xf32> to vector<2x32xf32>
    %347 = vector.extract_strided_slice %338 {offsets = [0, 64], sizes = [2, 32], strides = [1, 1]} : vector<2x128xf32> to vector<2x32xf32>
    %348 = math.tanh %347 : vector<2x32xf32>
    %349 = arith.mulf %345, %330 : vector<2x32xf32>
    %350 = arith.mulf %344, %348 : vector<2x32xf32>
    %351 = arith.addf %349, %350 : vector<2x32xf32>
    %352 = math.tanh %351 : vector<2x32xf32>
    %353 = arith.mulf %346, %352 : vector<2x32xf32>
    %354 = vector.shape_cast %353 : vector<2x32xf32> to vector<2x1x32xf32>
    %c0_91 = arith.constant 0 : index
    %c6_92 = arith.constant 6 : index
    %c0_93 = arith.constant 0 : index
    %355 = vector.load %arg11[%c0_91, %c6_92, %c0_93] : memref<2x9x32xf32, #tpu.memory_space<vmem>>, vector<2x1x32xf32>
    tpu.vector_store %arg11[%c0_91, %c6_92, %c0_93], %354 {strides = array<i32>} : memref<2x9x32xf32, #tpu.memory_space<vmem>>, vector<2x1x32xf32>,
    %356 = vector.extract_strided_slice %206 {offsets = [0, 7, 0], sizes = [2, 1, 128], strides = [1, 1, 1]} : vector<2x9x128xf32> to vector<2x1x128xf32>
    %357 = vector.shape_cast %356 : vector<2x1x128xf32> to vector<2x128xf32>
    %cst_94 = arith.constant dense<0.000000e+00> : vector<2x128xf32>
    %358 = tpu.matmul %353, %200, %cst_94 {dimension_numbers = #tpu.dot_dimension_numbers<[1], [0], [0], [1], [0, 0, 1, 1], [], []>} : vector<2x32xf32>, vector<32x128xf32>, vector<2x128xf32> -> vector<2x128xf32>
    %359 = arith.addf %357, %358 : vector<2x128xf32>
    %360 = arith.negf %359 : vector<2x128xf32>
    %361 = math.exp %360 : vector<2x128xf32>
    %cst_95 = arith.constant 1.000000e+00 : f32
    %362 = vector.broadcast %cst_95 : f32 to vector<2x128xf32>
    %363 = arith.addf %362, %361 : vector<2x128xf32>
    %364 = arith.divf %362, %363 : vector<2x128xf32>
    %365 = vector.extract_strided_slice %364 {offsets = [0, 0], sizes = [2, 32], strides = [1, 1]} : vector<2x128xf32> to vector<2x32xf32>
    %366 = vector.extract_strided_slice %364 {offsets = [0, 32], sizes = [2, 32], strides = [1, 1]} : vector<2x128xf32> to vector<2x32xf32>
    %367 = vector.extract_strided_slice %364 {offsets = [0, 96], sizes = [2, 32], strides = [1, 1]} : vector<2x128xf32> to vector<2x32xf32>
    %368 = vector.extract_strided_slice %359 {offsets = [0, 64], sizes = [2, 32], strides = [1, 1]} : vector<2x128xf32> to vector<2x32xf32>
    %369 = math.tanh %368 : vector<2x32xf32>
    %370 = arith.mulf %366, %351 : vector<2x32xf32>
    %371 = arith.mulf %365, %369 : vector<2x32xf32>
    %372 = arith.addf %370, %371 : vector<2x32xf32>
    %373 = math.tanh %372 : vector<2x32xf32>
    %374 = arith.mulf %367, %373 : vector<2x32xf32>
    %375 = vector.shape_cast %374 : vector<2x32xf32> to vector<2x1x32xf32>
    %c0_96 = arith.constant 0 : index
    %c7_97 = arith.constant 7 : index
    %c0_98 = arith.constant 0 : index
    %376 = vector.load %arg11[%c0_96, %c7_97, %c0_98] : memref<2x9x32xf32, #tpu.memory_space<vmem>>, vector<2x1x32xf32>
    tpu.vector_store %arg11[%c0_96, %c7_97, %c0_98], %375 {strides = array<i32>} : memref<2x9x32xf32, #tpu.memory_space<vmem>>, vector<2x1x32xf32>,
    %377 = vector.extract_strided_slice %206 {offsets = [0, 8, 0], sizes = [2, 1, 128], strides = [1, 1, 1]} : vector<2x9x128xf32> to vector<2x1x128xf32>
    %378 = vector.shape_cast %377 : vector<2x1x128xf32> to vector<2x128xf32>
    %cst_99 = arith.constant dense<0.000000e+00> : vector<2x128xf32>
    %379 = tpu.matmul %374, %200, %cst_99 {dimension_numbers = #tpu.dot_dimension_numbers<[1], [0], [0], [1], [0, 0, 1, 1], [], []>} : vector<2x32xf32>, vector<32x128xf32>, vector<2x128xf32> -> vector<2x128xf32>
    %380 = arith.addf %378, %379 : vector<2x128xf32>
    %381 = arith.negf %380 : vector<2x128xf32>
    %382 = math.exp %381 : vector<2x128xf32>
    %cst_100 = arith.constant 1.000000e+00 : f32
    %383 = vector.broadcast %cst_100 : f32 to vector<2x128xf32>
    %384 = arith.addf %383, %382 : vector<2x128xf32>
    %385 = arith.divf %383, %384 : vector<2x128xf32>
    %386 = vector.extract_strided_slice %385 {offsets = [0, 0], sizes = [2, 32], strides = [1, 1]} : vector<2x128xf32> to vector<2x32xf32>
    %387 = vector.extract_strided_slice %385 {offsets = [0, 32], sizes = [2, 32], strides = [1, 1]} : vector<2x128xf32> to vector<2x32xf32>
    %388 = vector.extract_strided_slice %385 {offsets = [0, 96], sizes = [2, 32], strides = [1, 1]} : vector<2x128xf32> to vector<2x32xf32>
    %389 = vector.extract_strided_slice %380 {offsets = [0, 64], sizes = [2, 32], strides = [1, 1]} : vector<2x128xf32> to vector<2x32xf32>
    %390 = math.tanh %389 : vector<2x32xf32>
    %391 = arith.mulf %387, %372 : vector<2x32xf32>
    %392 = arith.mulf %386, %390 : vector<2x32xf32>
    %393 = arith.addf %391, %392 : vector<2x32xf32>
    %394 = math.tanh %393 : vector<2x32xf32>
    %395 = arith.mulf %388, %394 : vector<2x32xf32>
    %396 = vector.shape_cast %395 : vector<2x32xf32> to vector<2x1x32xf32>
    %c0_101 = arith.constant 0 : index
    %c8_102 = arith.constant 8 : index
    %c0_103 = arith.constant 0 : index
    %397 = vector.load %arg11[%c0_101, %c8_102, %c0_103] : memref<2x9x32xf32, #tpu.memory_space<vmem>>, vector<2x1x32xf32>
    tpu.vector_store %arg11[%c0_101, %c8_102, %c0_103], %396 {strides = array<i32>} : memref<2x9x32xf32, #tpu.memory_space<vmem>>, vector<2x1x32xf32>,
    %c0_104 = arith.constant 0 : index
    %c0_105 = arith.constant 0 : index
    %c0_106 = arith.constant 0 : index
    %398 = vector.load %arg11[%c0_104, %c0_105, %c0_106] : memref<2x9x32xf32, #tpu.memory_space<vmem>>, vector<2x9x32xf32>
    %c0_107 = arith.constant 0 : index
    %c0_108 = arith.constant 0 : index
    %399 = vector.load %arg7[%c0_107, %c0_108] : memref<32x64xf32, #tpu.memory_space<vmem>>, vector<32x64xf32>
    "tpu.trace_start"() <{level = 10 : i32, message = "bsh,hv->bsv"}> : () -> ()
    %cst_109 = arith.constant dense<0.000000e+00> : vector<2x9x64xf32>
    %400 = tpu.matmul %398, %399, %cst_109 {dimension_numbers = #tpu.dot_dimension_numbers<[2], [0], [0, 1], [1], [0, 0, 0, 1, 1, 1], [], []>} : vector<2x9x32xf32>, vector<32x64xf32>, vector<2x9x64xf32> -> vector<2x9x64xf32>
    "tpu.trace_stop"() : () -> ()
    %c0_110 = arith.constant 0 : index
    %c0_111 = arith.constant 0 : index
    %401 = vector.load %arg8[%c0_110, %c0_111] : memref<1x64xf32, #tpu.memory_space<vmem>>, vector<1x64xf32>
    %402 = vector.shape_cast %401 : vector<1x64xf32> to vector<1x1x64xf32>
    %403 = vector.broadcast %402 : vector<1x1x64xf32> to vector<2x9x64xf32>
    %404 = arith.addf %400, %403 : vector<2x9x64xf32>
    %c0_112 = arith.constant 0 : index
    %c0_113 = arith.constant 0 : index
    %c0_114 = arith.constant 0 : index
    %405 = vector.load %arg9[%c0_112, %c0_113, %c0_114] : memref<2x9x64xf32, #tpu.memory_space<vmem>>, vector<2x9x64xf32>
    tpu.vector_store %arg9[%c0_112, %c0_113, %c0_114], %404 {strides = array<i32>} : memref<2x9x64xf32, #tpu.memory_space<vmem>>, vector<2x9x64xf32>,
    %cst_115 = arith.constant dense<0xFF800000> : vector<2x64xf32>
    %406 = vector.multi_reduction <maximumf>, %404, %cst_115 [1] : vector<2x9x64xf32> to vector<2x64xf32>
    %407 = vector.shape_cast %406 : vector<2x64xf32> to vector<2x1x64xf32>
    %408 = vector.broadcast %407 : vector<2x1x64xf32> to vector<2x9x64xf32>
    %409 = arith.subf %404, %408 : vector<2x9x64xf32>
    %410 = math.exp %409 : vector<2x9x64xf32>
    %cst_116 = arith.constant dense<0.000000e+00> : vector<2x64xf32>
    %411 = vector.multi_reduction <add>, %410, %cst_116 [1] : vector<2x9x64xf32> to vector<2x64xf32>
    %412 = vector.shape_cast %411 : vector<2x64xf32> to vector<2x1x64xf32>
    %413 = tpu.reciprocal %412 : vector<2x1x64xf32> -> vector<2x1x64xf32>
    %414 = vector.broadcast %413 : vector<2x1x64xf32> to vector<2x9x64xf32>
    %415 = arith.mulf %410, %414 : vector<2x9x64xf32>
    %cst_117 = arith.constant dense<0xFF800000> : vector<2x9xf32>
    %416 = vector.multi_reduction <maximumf>, %415, %cst_117 [2] : vector<2x9x64xf32> to vector<2x9xf32>
    %417 = vector.shape_cast %416 : vector<2x9xf32> to vector<2x9x1xf32>
    %418 = tpu.iota {dimensions = array<i32: 2>} : vector<2x9x64xi32>
    %419 = vector.broadcast %417 : vector<2x9x1xf32> to vector<2x9x64xf32>
    %420 = arith.cmpf oge, %415, %419 : vector<2x9x64xf32>
    %c64_i32 = arith.constant 64 : i32
    %421 = vector.broadcast %c64_i32 : i32 to vector<2x9x64xi32>
    %422 = arith.select %420, %418, %421 : vector<2x9x64xi1>, vector<2x9x64xi32>
    %cst_118 = arith.constant dense<2147483647> : vector<2x9xi32>
    %423 = vector.multi_reduction <minsi>, %422, %cst_118 [2] : vector<2x9x64xi32> to vector<2x9xi32>
    %c0_119 = arith.constant 0 : index
    %c0_120 = arith.constant 0 : index
    %424 = vector.load %arg10[%c0_119, %c0_120] : memref<2x9xi32, #tpu.memory_space<vmem>>, vector<2x9xi32>
    tpu.vector_store %arg10[%c0_119, %c0_120], %423 {strides = array<i32>} : memref<2x9xi32, #tpu.memory_space<vmem>>, vector<2x9xi32>,
    return
  }
}

</mosaic_0001>

<bundles_post_ra>
// kernel: _decoder_forward.1
= control target key start
LH: loop header
LB: loop body
LE: loop exit
PB: predicated region body
PF: predicated region fallthrough
CT: control target
= control target key end

     0   :  { %v61_v3 = vlaneseq  ;;  %v7361_v4 = vmov 0.0|0.0   ;;  %vm7362_vm0 = vmmov 0   ;;  %v7363_v10 = vmov 0.0   ;;  %s8975_s0 = inlined_call_operand.vmem [shape: f32[2,9,32], index: 0, kind: input, shape index: {}]   ;;  %s8976_s1 = inlined_call_operand.vmem [shape: f32[32,128], index: 1, kind: input, shape index: {}]   ;;  %s8977_s2 = inlined_call_operand.vmem [shape: f32[32,128], index: 2, kind: input, shape index: {}]   ;;  %s8978_s3 = inlined_call_operand.vmem [shape: f32[1,128], index: 3, kind: input, shape index: {}]   ;;  %s8979_s4 = inlined_call_operand.vmem [shape: f32[32,128], index: 4, kind: input, shape index: {}]   ;;  %s8980_s5 = inlined_call_operand.vmem [shape: f32[32,128], index: 5, kind: input, shape index: {}]   ;;  %s8981_s6 = inlined_call_operand.vmem [shape: f32[1,128], index: 6, kind: input, shape index: {}]   ;;  %s8982_s7 = inlined_call_operand.vmem [shape: f32[32,64], index: 7, kind: input, shape index: {}]   ;;  %s8983_s8 = inlined_call_operand.vmem [shape: f32[1,64], index: 8, kind: input, shape index: {}]   ;;  %s8984_s9 = inlined_call_operand.vmem [shape: f32[2,9,64], index: 9, kind: output, shape index: {0}]   ;;  %s8985_s10 = inlined_call_operand.hbm [shape: s32[2,9], index: 10, kind: output, shape index: {1}]  }
   0x1   :  { %v35_v0 = vld [vmem:[%s8976_s1] sm:$0xff]  ;;  %v36_v1 = vld [vmem:[%s8976_s1 + $0x8] sm:$0xff]  ;;  %6872 = vmatprep.subr.bf16.mxu0 %v7361_v4  ;;  %6878 = vmatprep.subr.bf16.mxu1 %v7361_v4  ;;  %v37_v7 = vld [vmem:[%s8976_s1 + $0x10] sm:$0xff]  ;;  %v7364_v14 = vmov 1966171168  }
   0x2   :  { %v39_v2 = vld [vmem:[%s8977_s2] sm:$0xff]  ;;  %v6873_v5 = vpack.c.bf16 %v36_v1, %v35_v0  ;;  %v40_v6 = vld [vmem:[%s8977_s2 + $0x8] sm:$0xff]  ;;  %v38_v8 = vld [vmem:[%s8976_s1 + $0x18] sm:$0xff]  ;;  %6631 = vmatprep.mubr.msk.f32.mxu0 %vm7362_vm0, %v7363_v10  ;;  %v59_v15 = vunpack.c.l.s4 %v7364_v14  ;;  %v7457_v16 = vshrl.u32 %v61_v3, 7  ;;  %6648 = vmatprep.mubr.msk.f32.mxu1 %vm7362_vm0, %v7363_v10 }
   0x3   :  { %v7443_v9 = vpack.c.bf16 %v40_v6, %v39_v2  ;;  %v41_v11 = vld [vmem:[%s8977_s2 + $0x10] sm:$0xff]  ;;  %v42_v12 = vld [vmem:[%s8977_s2 + $0x18] sm:$0xff]  ;;  %v44_v13 = vld [vmem:[%s8975_s0] sm:$0xff]  ;;  %v6876_v17 = vpack.c.bf16 %v38_v8, %v37_v7 }
   0x4   :  { %6874 = vmatpush3.bf16.msra.mxu0 %v6873_v5  ;;  %v46_v18 = vld [vmem:[%s8975_s0 + $0x10] sm:$0xff]  ;;  %v7466_v19 = vpack.c.bf16 %v42_v12, %v41_v11  ;;  %v57_v20 = vcombine.high %v44_v13, %v44_v13  ;;  %v60_v21 = vunpack.c.0.s8 %v59_v15 }
   0x5   :  { %6880 = vmatpush3.bf16.msra.mxu1 %v7443_v9  ;;  %6875 = vmatprep.subr.bf16.mxu0 %v7361_v4 }
   0x6   :  { %16 = vsyncpa [#allocation4], 0  ;;  %6881 = vmatprep.subr.bf16.mxu1 %v7361_v4  ;;  %v120_v22 = vcombine.high %v46_v18, %v46_v18  ;;  %v7470_v23 = vsub.s32 %v60_v21, %v7457_v16  ;;  %v6429_v24 = vld.sshfl [vmem:[%s8975_s0 + $0x8] sm:$0x1 pattern:$0x75316420] }
   0x7   :  { %vm461_vm1 = vcmask 261120   ;;  %v6428_v11 = vld [vmem:[%s8978_s3] ss:$0 sm:$0xff]  ;;  %s7365_s3 = smov 64   ;;  %s7366_s15 = smov 32   ;;  %vm853_vm2 = vcmask 253952  }
   0x8   :  { %6877 = vmatpush3.bf16.msra.mxu0 %v6876_v17  ;;  %v64_v25 = vrot.slane %v44_v13, %v7470_v23  ;;  %v71_v26 = vrot.slane %v57_v20, %v7470_v23  ;;  %v127_v27 = vrot.slane %v46_v18, %v7470_v23  ;;  %v119_v28 = vrot.slane %v6429_v24, %v7470_v23 }
   0x9   :  { %6883 = vmatpush3.bf16.msra.mxu1 %v7466_v19  ;;  %v134_v29 = vrot.slane %v120_v22, %v7470_v23  ;;  %6902 = vmatprep.subr.bf16.mxu0 %v7361_v4  ;;  %v183_v12 = vcombine.high %v6428_v11, %v6428_v11  ;;  %v190_v13 = vrot.slane %v6428_v11, %v7470_v23  ;;  %vm5363_vm3 = vcmask 523264  }
   0xa   :  { %6884 = vmatprep.subr.bf16.mxu1 %v7361_v4  ;;  %v72_v30 = vcombine.high %v64_v25, %v64_v25  ;;  %v73_v31 = vcombine.high %v71_v26, %v71_v26  ;;  %v80_v32 = vrot.slane %v64_v25, %v7470_v23  ;;  %v87_v33 = vrot.slane %v71_v26, %v7470_v23 }
   0xb   :  { %v135_v34 = vcombine.high %v127_v27, %v127_v27  ;;  %v136_v35 = vcombine.high %v134_v29, %v134_v29  ;;  %v143_v36 = vrot.slane %v127_v27, %v7470_v23  ;;  %v150_v37 = vrot.slane %v134_v29, %v7470_v23 }
   0xc   :  { %6649 = vmatmul.mubr.f32.vlgmr.msra.gmra.mrb[0].mxu1 %v7363_v10  ;;  %v94_v38 = vrot.slane %v72_v30, %v7470_v23  ;;  %v101_v39 = vrot.slane %v73_v31, %v7470_v23  ;;  %v197_v14 = vrot.slane %v183_v12, %v7470_v23  ;;  %v198_v15 = vcombine.high %v190_v13, %v190_v13 }
   0xd   :  { %6886 = vmatpush3.bf16.msra.mxu1 %v7443_v9  ;;  %v157_v40 = vrot.slane %v135_v34, %v7470_v23  ;;  %v7493_v41 = vrot.slane %v136_v35, %v7470_v23  ;;  %v165_v42 = vcombine.high %v143_v36, %v143_v36  ;;  %v166_v43 = vcombine.high %v150_v37, %v150_v37 }
   0xe   :  { %6887 = vmatprep.subr.bf16.mxu1 %v7361_v4  ;;  %v232_v44 = vcombine.low %v80_v32, %v94_v38  ;;  %v6431_v45 = vcombine.high %v80_v32, %v94_v38  ;;  %v234_v46 = vcombine.low %v87_v33, %v101_v39  ;;  %v6432_v47 = vcombine.high %v87_v33, %v101_v39 }
   0xf   :  { %6659 = vmatprep.mubr.msk.f32.mxu1 %vm7362_vm0, %v7363_v10  ;;  %v167_v48 = vcombine.high %v157_v40, %v157_v40  ;;  %v281_v49 = vcombine.low %v119_v28, %v143_v36  ;;  %v282_v50 = vcombine.low %v157_v40, %v165_v42  ;;  %v284_v51 = vcombine.low %v7493_v41, %v166_v43 }
  0x10   :  { %v242_v52 = vrot.slane %v232_v44, %v7470_v23  ;;  %v249_v53 = vrot.slane %v6431_v45, %v7470_v23  ;;  %v256_v54 = vrot.slane %v234_v46, %v7470_v23  ;;  %v263_v55 = vrot.slane %v6432_v47, %v7470_v23 }
  0x11   :  { %6889 = vmatpush3.bf16.msra.mxu1 %v7466_v19  ;;  %v283_v56 = vcombine.low %v167_v48, %v150_v37  ;;  %v291_v57 = vrot.slane %v281_v49, %v7470_v23  ;;  %v298_v58 = vrot.slane %v282_v50, %v7470_v23  ;;  %v312_v59 = vrot.slane %v284_v51, %v7470_v23 }
  0x12   :  { %6890 = vmatprep.subr.bf16.mxu1 %v7361_v4  ;;  %v264_v60 = vcombine.low %v242_v52, %v249_v53  ;;  %v265_v61 = vcombine.low %v256_v54, %v263_v55  ;;  %v199_v17 = vcombine.high %v197_v14, %v197_v14  ;;  %v7529_v18 = vrot.slane %v190_v13, %v7470_v23 }
  0x13   :  { %v305_v62 = vrot.slane %v283_v56, %v7470_v23  ;;  %v313_v63 = vcombine.low %v291_v57, %v298_v58  ;;  %v213_v20 = vrot.slane %v197_v14, %v7470_v23  ;;  %v220_v21 = vrot.slane %v198_v15, %v7470_v23 }
  0x14   :  { %v272_v0 = vrot.slane %v264_v60, %v7470_v23  ;;  %v279_v1 = vrot.slane %v265_v61, %v7470_v23  ;;  %v7534_v22 = vrot.slane %v199_v17, %v7470_v23  ;;  %v228_v28 = vcombine.high %v7529_v18, %v7529_v18 }
  0x15   :  { %v314_v2 = vcombine.low %v305_v62, %v312_v59  ;;  %v321_v5 = vrot.slane %v313_v63, %v7470_v23  ;;  %v345_v24 = vcombine.low %v7529_v18, %v220_v21  ;;  %v6433_v25 = vcombine.high %v7529_v18, %v220_v21 }
  0x16   :  { %v280_v6 = vcombine.low %v272_v0, %v279_v1  ;;  %v347_v26 = vcombine.low %v213_v20, %v7534_v22  ;;  %v6434_v27 = vcombine.high %v213_v20, %v7534_v22  ;;  %v229_v29 = vcombine.high %v213_v20, %v213_v20 }
  0x17   :  { %v328_v7 = vrot.slane %v314_v2, %v7470_v23  ;;  %v230_v30 = vcombine.high %v220_v21, %v220_v21  ;;  %v355_v31 = vrot.slane %v345_v24, %v7470_v23  ;;  %v362_v32 = vrot.slane %v6433_v25, %v7470_v23 }
  0x18   :  { %6632 = vmatmul.mubr.msk.f32.vlgmr.msra.gmra.mrb[0].mxu0 %vm461_vm1, %v280_v6  ;;  %v369_v33 = vrot.slane %v347_v26, %v7470_v23  ;;  %v376_v34 = vrot.slane %v6434_v27, %v7470_v23  ;;  %v394_v35 = vcombine.low %v7529_v18, %v7529_v18  ;;  %v395_v36 = vcombine.low %v220_v21, %v228_v28 }
  0x19   :  { %6634 = vmatprep.mubr.msk.f32.mxu0 %vm7362_vm0, %v7363_v10  ;;  %v329_v8 = vcombine.low %v321_v5, %v328_v7  ;;  %6904 = vmatpush3.bf16.msra.mxu0 %v7443_v9  ;;  %v396_v37 = vcombine.low %v230_v30, %v213_v20  ;;  %v397_v38 = vcombine.low %v7534_v22, %v229_v29  ;;  %vm5365_vm4 = vcmask 516096  }
  0x1a   :  { %6905 = vmatprep.subr.bf16.mxu0 %v7361_v4  ;;  %v377_v40 = vcombine.low %v355_v31, %v362_v32  ;;  %v378_v42 = vcombine.low %v369_v33, %v376_v34  ;;  %v404_v44 = vrot.slane %v394_v35, %v7470_v23  ;;  %v411_v45 = vrot.slane %v395_v36, %v7470_v23 }
  0x1b   :  { %v418_v46 = vrot.slane %v396_v37, %v7470_v23  ;;  %v425_v47 = vrot.slane %v397_v38, %v7470_v23 }
  0x1c   :  { %6635 = vmatmul.mubr.msk.f32.gmra.mrb[2].mxu0 %vm461_vm1, %v329_v8  ;;  %v385_v48 = vrot.slane %v377_v40, %v7470_v23  ;;  %v392_v49 = vrot.slane %v378_v42, %v7470_v23  ;;  %v426_v50 = vcombine.low %v404_v44, %v411_v45 }
  0x1d   :  { %6637 = vmatprep.mubr.msk.f32.mxu0 %vm7362_vm0, %v7363_v10  ;;  %6907 = vmatpush3.bf16.msra.mxu0 %v7466_v19  ;;  %v427_v51 = vcombine.low %v418_v46, %v425_v47 }
  0x1e   :  { %6914 = vmatprep.subr.bf16.mxu0 %v7361_v4  ;;  %v393_v52 = vcombine.low %v385_v48, %v392_v49  ;;  %v434_v53 = vrot.slane %v426_v50, %v7470_v23 }
  0x1f   :  { %v441_v54 = vrot.slane %v427_v51, %v7470_v23 }
  0x21   :  { %v442_v59 = vcombine.low %v434_v53, %v441_v54 }
  0xdf   :  { %v758_v39 = vpop.f32.mrb[0].mxu1 }
  0xe0   :  { %v6650_v43 = vpop.f32.mrb[1].mxu1  ;;  %v769_v55 = vrot.slane %v758_v39, %v7470_v23 }
  0xe2   :  { %v777_v61 = vrot.slane %v769_v55, %v7470_v23  ;;  %v770_v2 = vcombine.high %v769_v55, %v769_v55 }
  0xe4   :  { %v784_v8 = vrot.slane %v770_v2, %v7470_v23 }
  0xeb   :  { %v534_v56 = vpop.f32.mrb[0].mxu0 }
  0xec   :  { %v7558_v57 = vadd.f32 %v534_v56, %v393_v52  ;;  %v6633_v58 = vpop.f32.mrb[1].mxu0 }
  0xee   :  { %v7562_v60 = vrot.slane %v7558_v57, %v7470_v23 }
  0xef   :  { %v539_v62 = vpop.f32.mrb[2].mxu0 }
  0xf0   :  { %v7567_v63 = vrot.slane %v7562_v60, %v7470_v23  ;;  %v7569_v0 = vadd.f32 %v539_v62, %v442_v59  ;;  %v6636_v1 = vpop.f32.mrb[3].mxu0  ;;  %v566_v49 = vcombine.high %v7562_v60, %v7562_v60 }
  0xf2   :  { %v787_v5 = vadd.f32 %v777_v61, %v7567_v63  ;;  %v607_v6 = vrot.slane %v7569_v0, %v7470_v23  ;;  %v7608_v54 = vrot.slane %v566_v49, %v7470_v23 }
  0xf4   :  { %7009 = vtanh.f32 %v787_v5  ;;  %v615_v7 = vcombine.high %v607_v6, %v607_v6  ;;  %v6438_v15 = vmul.f32 -1.442695, %v787_v5  ;;  %v7604_v51 = vrot.slane %v607_v6, %v7470_v23 }
  0xf6   :  { %v7576_v11 = vrot.slane %v615_v7, %v7470_v23  ;;  %v645_v58 = vcombine.high %v7604_v51, %v7604_v51 }
  0xf8   :  { %v788_v12 = vadd.f32 %v784_v8, %v7576_v11  ;;  %v647_v49 = vcombine.high %v7576_v11, %v7576_v11 }
  0xfa   :  { %7011 = vtanh.f32 %v788_v12  ;;  %v6439_v17 = vmul.f32 -1.442695, %v788_v12 }
  0xfb   :  { %7013 = vpow2.f32 %v6438_v15 }
  0xfc   :  { %7015 = vpow2.f32 %v6439_v17 }
  0xfe   :  { %v7010_v13 = vpop.eup %7009 }
  0xff   :  { %807 = vrot.lane.b32.xlu0 %v7010_v13, %s7365_s3 }
 0x104   :  { %v7012_v14 = vpop.eup %7011 }
 0x105   :  { %809 = vrot.lane.b32.xlu0 %v7012_v14, %s7365_s3  ;;  %v7014_v20 = vpop.eup %7013 }
 0x106   :  { %v795_v21 = vadd.f32 1.0, %v7014_v20  ;;  %v7016_v24 = vpop.eup %7015 }
 0x107   :  { %v796_v25 = vadd.f32 1.0, %v7016_v24 }
 0x108   :  { %7017 = vrcp.f32 %v795_v21 }
 0x109   :  { %7019 = vrcp.f32 %v796_v25 }
 0x112   :  { %v7018_v26 = vpop.eup %7017 }
 0x113   :  { %v7020_v29 = vpop.eup %7019  ;;  %v803_v32 = vmul.f32 0.0, %v7018_v26 }
 0x114   :  { %v804_v35 = vmul.f32 0.0, %v7020_v29 }
 0x171   :  { %v808_v27 = vpop.permute.xlu0 %807 }
 0x172   :  { %v813_v28 = vmul.f32 %v7018_v26, %v808_v27 }
 0x174   :  { %817 = vrot.lane.b32.xlu1 %v813_v28, %s7366_s15 }
 0x177   :  { %v810_v30 = vpop.permute.xlu0 %809 }
 0x178   :  { %v814_v31 = vmul.f32 %v7020_v29, %v810_v30 }
 0x17a   :  { %819 = vrot.lane.b32.xlu1 %v814_v31, %s7366_s15 }
 0x1e6   :  { %v818_v33 = vpop.permute.xlu1 %817 }
 0x1e7   :  { %v823_v34 = vadd.f32 %v818_v33, %v803_v32 }
 0x1e9   :  { %7021 = vtanh.f32 %v823_v34 }
 0x1ec   :  { %v820_v36 = vpop.permute.xlu1 %819 }
 0x1ed   :  { %v824_v37 = vadd.f32 %v820_v36, %v804_v35 }
 0x1ef   :  { %7023 = vtanh.f32 %v824_v37 }
 0x1f3   :  { %v7022_v38 = vpop.eup %7021 }
 0x1f4   :  { %829 = vrot.lane.b32.xlu0 %v7022_v38, %s7365_s3 }
 0x1f9   :  { %v7024_v39 = vpop.eup %7023 }
 0x1fa   :  { %831 = vrot.lane.b32.xlu1 %v7024_v39, %s7365_s3 }
 0x266   :  { %v830_v40 = vpop.permute.xlu0 %829 }
 0x267   :  { %v7585_v43 = vmul.f32 %v7018_v26, %v830_v40 }
 0x26c   :  { %v832_v42 = vpop.permute.xlu1 %831 }
 0x26d   :  { %v7587_v44 = vmul.f32 %v7020_v29, %v832_v42 }
 0x26f   :  { %v856_v45 = vcombine.low %v7585_v43, %v7587_v44 }
 0x271   :  { %v863_v46 = vrot.slane %v856_v45, %v7470_v23 }
 0x273   :  { %v870_v47 = vrot.slane %v863_v46, %v7470_v23  ;;  %v596_v46 = vcombine.high %v7567_v63, %v7567_v63 }
 0x275   :  { %871 = vrot.lane.b32.xlu0 %v870_v47, %s7366_s15 }
 0x2e7   :  { %v872_v48 = vpop.permute.xlu0 %871 }
 0x2e8   :  { %6660 = vmatmul.mubr.msk.f32.vlgmr.msra.gmra.mrb[2].mxu1 %vm461_vm1, %v872_v48 }
 0x2e9   :  { %6892 = vmatpush3.bf16.msra.mxu1 %v7443_v9  ;;  %6670 = vmatprep.mubr.msk.f32.mxu1 %vm7362_vm0, %v7363_v10 }
 0x2ea   :  { %6893 = vmatprep.subr.bf16.mxu1 %v7361_v4 }
 0x2ed   :  { %6895 = vmatpush3.bf16.msra.mxu1 %v7466_v19 }
 0x2ee   :  { %6896 = vmatprep.subr.bf16.mxu1 %v7361_v4 }
 0x3bb   :  { %v941_v50 = vpop.f32.mrb[2].mxu1 }
 0x3bc   :  { %v952_v52 = vrot.slane %v941_v50, %v7470_v23  ;;  %v6661_v53 = vpop.f32.mrb[3].mxu1 }
 0x3be   :  { %v953_v55 = vcombine.high %v952_v52, %v952_v52  ;;  %v960_v56 = vrot.slane %v952_v52, %v7470_v23 }
 0x3c0   :  { %v967_v59 = vrot.slane %v953_v55, %v7470_v23  ;;  %v970_v60 = vadd.f32 %v960_v56, %v7608_v54 }
 0x3c2   :  { %v971_v61 = vadd.f32 %v967_v59, %v645_v58  ;;  %7025 = vtanh.f32 %v970_v60  ;;  %v6441_v2 = vmul.f32 -1.442695, %v970_v60 }
 0x3c4   :  { %7027 = vtanh.f32 %v971_v61  ;;  %v6442_v5 = vmul.f32 -1.442695, %v971_v61 }
 0x3c5   :  { %7029 = vpow2.f32 %v6441_v2 }
 0x3c6   :  { %7031 = vpow2.f32 %v6442_v5 }
 0x3cc   :  { %v7026_v62 = vpop.eup %7025 }
 0x3cd   :  { %990 = vrot.lane.b32.xlu1 %v7026_v62, %s7365_s3 }
 0x3ce   :  { %v7028_v1 = vpop.eup %7027 }
 0x3cf   :  { %992 = vrot.lane.b32.xlu0 %v7028_v1, %s7365_s3  ;;  %v7030_v6 = vpop.eup %7029 }
 0x3d0   :  { %v7032_v7 = vpop.eup %7031  ;;  %v978_v8 = vadd.f32 1.0, %v7030_v6 }
 0x3d1   :  { %v979_v12 = vadd.f32 1.0, %v7032_v7 }
 0x3d2   :  { %7033 = vrcp.f32 %v978_v8 }
 0x3d3   :  { %7035 = vrcp.f32 %v979_v12 }
 0x3dc   :  { %v7034_v13 = vpop.eup %7033 }
 0x3dd   :  { %v7036_v17 = vpop.eup %7035  ;;  %v986_v24 = vmul.f32 %v7034_v13, %v823_v34 }
 0x3de   :  { %v987_v27 = vmul.f32 %v7036_v17, %v824_v37 }
 0x43f   :  { %v991_v14 = vpop.permute.xlu1 %990 }
 0x440   :  { %v996_v15 = vmul.f32 %v7034_v13, %v991_v14 }
 0x441   :  { %v993_v20 = vpop.permute.xlu0 %992 }
 0x442   :  { %1000 = vrot.lane.b32.xlu1 %v996_v15, %s7366_s15  ;;  %v997_v21 = vmul.f32 %v7036_v17, %v993_v20 }
 0x444   :  { %1002 = vrot.lane.b32.xlu0 %v997_v21, %s7366_s15 }
 0x4b4   :  { %v1001_v25 = vpop.permute.xlu1 %1000 }
 0x4b5   :  { %v1006_v26 = vadd.f32 %v1001_v25, %v986_v24 }
 0x4b6   :  { %v1003_v28 = vpop.permute.xlu0 %1002 }
 0x4b7   :  { %7037 = vtanh.f32 %v1006_v26  ;;  %v1007_v29 = vadd.f32 %v1003_v28, %v987_v27 }
 0x4b9   :  { %7039 = vtanh.f32 %v1007_v29 }
 0x4c1   :  { %v7038_v30 = vpop.eup %7037 }
 0x4c2   :  { %1012 = vrot.lane.b32.xlu1 %v7038_v30, %s7365_s3 }
 0x4c3   :  { %v7040_v31 = vpop.eup %7039 }
 0x4c4   :  { %1014 = vrot.lane.b32.xlu0 %v7040_v31, %s7365_s3 }
 0x534   :  { %v1013_v32 = vpop.permute.xlu1 %1012 }
 0x535   :  { %v7621_v35 = vmul.f32 %v7034_v13, %v1013_v32  ;;  %v600_v32 = vcombine.high %v7569_v0, %v7569_v0 }
 0x536   :  { %v1015_v33 = vpop.permute.xlu0 %1014 }
 0x537   :  { %v7623_v36 = vmul.f32 %v7036_v17, %v1015_v33 }
 0x539   :  { %v1038_v34 = vcombine.low %v7621_v35, %v7623_v36 }
 0x53b   :  { %v1045_v37 = vrot.slane %v1038_v34, %v7470_v23  ;;  %v7669_v34 = vrot.slane %v600_v32, %v7470_v23 }
 0x53d   :  { %v1052_v38 = vrot.slane %v1045_v37, %v7470_v23 }
 0x53f   :  { %1053 = vrot.lane.b32.xlu1 %v1052_v38, %s7366_s15 }
 0x5b1   :  { %v1054_v39 = vpop.permute.xlu1 %1053 }
 0x5b2   :  { %6671 = vmatmul.mubr.msk.f32.vlgmr.msra.gmra.mrb[4].mxu1 %vm461_vm1, %v1054_v39  ;;  %v598_v39 = vcombine.high %v7608_v54, %v7608_v54 }
 0x5b3   :  { %6898 = vmatpush3.bf16.msra.mxu1 %v7443_v9  ;;  %6681 = vmatprep.mubr.msk.f32.mxu1 %vm7362_vm0, %v7363_v10 }
 0x5b4   :  { %6899 = vmatprep.subr.bf16.mxu1 %v7361_v4 }
 0x5b7   :  { %6901 = vmatpush3.bf16.msra.mxu1 %v7466_v19 }
 0x5b8   :  { %6908 = vmatprep.subr.bf16.mxu1 %v7361_v4 }
 0x685   :  { %v1123_v40 = vpop.f32.mrb[4].mxu1 }
 0x686   :  { %v1134_v42 = vrot.slane %v1123_v40, %v7470_v23  ;;  %v6672_v45 = vpop.f32.mrb[5].mxu1 }
 0x687   :  { %v7677_v45 = vrot.slane %v7669_v34, %v7470_v23 }
 0x688   :  { %v1135_v47 = vcombine.high %v1134_v42, %v1134_v42  ;;  %v1142_v48 = vrot.slane %v1134_v42, %v7470_v23 }
 0x68a   :  { %v1149_v50 = vrot.slane %v1135_v47, %v7470_v23  ;;  %v1152_v52 = vadd.f32 %v1142_v48, %v596_v46 }
 0x68c   :  { %v1153_v53 = vadd.f32 %v1149_v50, %v647_v49  ;;  %7041 = vtanh.f32 %v1152_v52  ;;  %v6444_v58 = vmul.f32 -1.442695, %v1152_v52 }
 0x68e   :  { %7043 = vtanh.f32 %v1153_v53  ;;  %v6445_v63 = vmul.f32 -1.442695, %v1153_v53 }
 0x68f   :  { %7045 = vpow2.f32 %v6444_v58 }
 0x690   :  { %7047 = vpow2.f32 %v6445_v63 }
 0x696   :  { %v7042_v55 = vpop.eup %7041 }
 0x697   :  { %1172 = vrot.lane.b32.xlu0 %v7042_v55, %s7365_s3 }
 0x698   :  { %v7044_v56 = vpop.eup %7043 }
 0x699   :  { %1174 = vrot.lane.b32.xlu1 %v7044_v56, %s7365_s3  ;;  %v7046_v59 = vpop.eup %7045 }
 0x69a   :  { %v7048_v60 = vpop.eup %7047  ;;  %v1160_v61 = vadd.f32 1.0, %v7046_v59 }
 0x69b   :  { %v1161_v11 = vadd.f32 1.0, %v7048_v60 }
 0x69c   :  { %7049 = vrcp.f32 %v1160_v61 }
 0x69d   :  { %7051 = vrcp.f32 %v1161_v11 }
 0x6a6   :  { %v7050_v62 = vpop.eup %7049 }
 0x6a7   :  { %v7052_v5 = vpop.eup %7051  ;;  %v1168_v8 = vmul.f32 %v7050_v62, %v1006_v26 }
 0x6a8   :  { %v1169_v14 = vmul.f32 %v7052_v5, %v1007_v29 }
 0x709   :  { %v1173_v1 = vpop.permute.xlu0 %1172 }
 0x70a   :  { %v1178_v2 = vmul.f32 %v7050_v62, %v1173_v1 }
 0x70b   :  { %v1175_v6 = vpop.permute.xlu1 %1174 }
 0x70c   :  { %1182 = vrot.lane.b32.xlu0 %v1178_v2, %s7366_s15  ;;  %v1179_v7 = vmul.f32 %v7052_v5, %v1175_v6 }
 0x70e   :  { %1184 = vrot.lane.b32.xlu1 %v1179_v7, %s7366_s15 }
 0x77e   :  { %v1183_v12 = vpop.permute.xlu0 %1182 }
 0x77f   :  { %v1188_v13 = vadd.f32 %v1183_v12, %v1168_v8  ;;  %v6430_v8 = vld.sshfl [vmem:[%s8975_s0 + $0x18] sm:$0x1 pattern:$0x75316420]  ;;  %v168_v12 = vcombine.high %v7493_v41, %v7493_v41 }
 0x780   :  { %v1185_v15 = vpop.permute.xlu1 %1184 }
 0x781   :  { %7053 = vtanh.f32 %v1188_v13  ;;  %v1189_v17 = vadd.f32 %v1185_v15, %v1169_v14 }
 0x783   :  { %7055 = vtanh.f32 %v1189_v17 }
 0x78b   :  { %v7054_v20 = vpop.eup %7053 }
 0x78c   :  { %1194 = vrot.lane.b32.xlu0 %v7054_v20, %s7365_s3 }
 0x78d   :  { %v7056_v21 = vpop.eup %7055 }
 0x78e   :  { %1196 = vrot.lane.b32.xlu1 %v7056_v21, %s7365_s3 }
 0x7fe   :  { %v1195_v24 = vpop.permute.xlu0 %1194 }
 0x7ff   :  { %v7650_v27 = vmul.f32 %v7050_v62, %v1195_v24 }
 0x800   :  { %v1197_v25 = vpop.permute.xlu1 %1196 }
 0x801   :  { %v7652_v28 = vmul.f32 %v7052_v5, %v1197_v25 }
 0x803   :  { %v1220_v26 = vcombine.low %v7650_v27, %v7652_v28 }
 0x805   :  { %v1227_v29 = vrot.slane %v1220_v26, %v7470_v23 }
 0x807   :  { %v1234_v30 = vrot.slane %v1227_v29, %v7470_v23 }
 0x809   :  { %1235 = vrot.lane.b32.xlu0 %v1234_v30, %s7366_s15 }
 0x87b   :  { %v1236_v31 = vpop.permute.xlu0 %1235 }
 0x87c   :  { %6682 = vmatmul.mubr.msk.f32.vlgmr.msra.gmra.mrb[6].mxu1 %vm461_vm1, %v1236_v31 }
 0x87d   :  { %6910 = vmatpush3.bf16.msra.mxu1 %v7443_v9  ;;  %6703 = vmatprep.mubr.msk.f32.mxu1 %vm7362_vm0, %v7363_v10 }
 0x87e   :  { %6911 = vmatprep.subr.bf16.mxu1 %v7361_v4 }
 0x881   :  { %6913 = vmatpush3.bf16.msra.mxu1 %v7466_v19 }
 0x882   :  { %6920 = vmatprep.subr.bf16.mxu1 %v7361_v4 }
 0x94f   :  { %v1305_v33 = vpop.f32.mrb[6].mxu1 }
 0x950   :  { %v1316_v37 = vrot.slane %v1305_v33, %v7470_v23  ;;  %v6683_v38 = vpop.f32.mrb[7].mxu1 }
 0x951   :  { %v551_v38 = vcombine.high %v7558_v57, %v7558_v57 }
 0x952   :  { %v1317_v40 = vcombine.high %v1316_v37, %v1316_v37  ;;  %v1324_v42 = vrot.slane %v1316_v37, %v7470_v23 }
 0x954   :  { %v1331_v46 = vrot.slane %v1317_v40, %v7470_v23  ;;  %v1334_v0 = vadd.f32 %v1324_v42, %v598_v39  ;;  %v7725_v39 = vrot.slane %v551_v38, %v7470_v23  ;;  %v616_v42 = vcombine.high %v7669_v34, %v7669_v34 }
 0x956   :  { %v1335_v47 = vadd.f32 %v1331_v46, %v7677_v45  ;;  %7057 = vtanh.f32 %v1334_v0  ;;  %v6447_v54 = vmul.f32 -1.442695, %v1334_v0 }
 0x958   :  { %7059 = vtanh.f32 %v1335_v47  ;;  %v6448_v50 = vmul.f32 -1.442695, %v1335_v47  ;;  %v7732_v47 = vrot.slane %v7725_v39, %v7470_v23 }
 0x959   :  { %7061 = vpow2.f32 %v6447_v54  ;;  %v7736_v54 = vrot.slane %v616_v42, %v7470_v23 }
 0x95a   :  { %7063 = vpow2.f32 %v6448_v50 }
 0x960   :  { %v7058_v48 = vpop.eup %7057 }
 0x961   :  { %1354 = vrot.lane.b32.xlu1 %v7058_v48, %s7365_s3 }
 0x962   :  { %v7060_v49 = vpop.eup %7059 }
 0x963   :  { %1356 = vrot.lane.b32.xlu0 %v7060_v49, %s7365_s3  ;;  %v7062_v52 = vpop.eup %7061 }
 0x964   :  { %v7064_v53 = vpop.eup %7063  ;;  %v1342_v55 = vadd.f32 1.0, %v7062_v52 }
 0x965   :  { %v1343_v56 = vadd.f32 1.0, %v7064_v53 }
 0x966   :  { %7065 = vrcp.f32 %v1342_v55 }
 0x967   :  { %7067 = vrcp.f32 %v1343_v56 }
 0x970   :  { %v7066_v58 = vpop.eup %7065 }
 0x971   :  { %v7068_v60 = vpop.eup %7067  ;;  %v1350_v62 = vmul.f32 %v7066_v58, %v1188_v13  ;;  %v182_v13 = vrot.slane %v6430_v8, %v7470_v23 }
 0x972   :  { %v1351_v5 = vmul.f32 %v7068_v60, %v1189_v17 }
 0x973   :  { %v330_v15 = vcombine.low %v168_v12, %v182_v13 }
 0x975   :  { %v337_v20 = vrot.slane %v330_v15, %v7470_v23 }
 0x977   :  { %v344_v21 = vrot.slane %v337_v20, %v7470_v23 }
 0x979   :  { %6638 = vmatmul.mubr.msk.f32.gmra.mrb[4].mxu0 %vm461_vm1, %v344_v21 }
 0x97a   :  { %6692 = vmatprep.mubr.msk.f32.mxu0 %vm7362_vm0, %v7363_v10 }
 0x9d3   :  { %v1355_v63 = vpop.permute.xlu1 %1354 }
 0x9d4   :  { %v1360_v59 = vmul.f32 %v7066_v58, %v1355_v63 }
 0x9d5   :  { %v1357_v61 = vpop.permute.xlu0 %1356 }
 0x9d6   :  { %1364 = vrot.lane.b32.xlu1 %v1360_v59, %s7366_s15  ;;  %v1361_v11 = vmul.f32 %v7068_v60, %v1357_v61 }
 0x9d8   :  { %1366 = vrot.lane.b32.xlu0 %v1361_v11, %s7366_s15 }
 0xa48   :  { %v1365_v1 = vpop.permute.xlu1 %1364 }
 0xa49   :  { %v7685_v2 = vadd.f32 %v1365_v1, %v1350_v62 }
 0xa4a   :  { %v1367_v6 = vpop.permute.xlu0 %1366 }
 0xa4b   :  { %7069 = vtanh.f32 %v7685_v2  ;;  %v7688_v7 = vadd.f32 %v1367_v6, %v1351_v5 }
 0xa4c   :  { %v7713_v32 = vpop.f32.mrb[4].mxu0 }
 0xa4d   :  { %7071 = vtanh.f32 %v7688_v7  ;;  %v6639_v33 = vpop.f32.mrb[5].mxu0 }
 0xa55   :  { %v7070_v14 = vpop.eup %7069 }
 0xa56   :  { %1376 = vrot.lane.b32.xlu1 %v7070_v14, %s7365_s3 }
 0xa57   :  { %v7072_v17 = vpop.eup %7071 }
 0xa58   :  { %1378 = vrot.lane.b32.xlu0 %v7072_v17, %s7365_s3 }
 0xac8   :  { %v1377_v24 = vpop.permute.xlu1 %1376 }
 0xac9   :  { %v7704_v25 = vmul.f32 %v7066_v58, %v1377_v24 }
 0xaca   :  { %v1379_v41 = vpop.permute.xlu0 %1378 }
 0xacb   :  { %v7706_v26 = vmul.f32 %v7068_v60, %v1379_v41 }
 0xacd   :  { %v1402_v29 = vcombine.low %v7704_v25, %v7706_v26 }
 0xacf   :  { %v1409_v30 = vrot.slane %v1402_v29, %v7470_v23 }
 0xad1   :  { %v1416_v31 = vrot.slane %v1409_v30, %v7470_v23 }
 0xad3   :  { %1417 = vrot.lane.b32.xlu1 %v1416_v31, %s7366_s15 }
 0xb45   :  { %v1418_v37 = vpop.permute.xlu1 %1417 }
 0xb46   :  { %6693 = vmatmul.mubr.msk.f32.vlgmr.msra.gmra.mrb[6].mxu0 %vm461_vm1, %v1418_v37  ;;  %v567_v37 = vcombine.high %v7725_v39, %v7725_v39 }
 0xb47   :  { %6916 = vmatpush3.bf16.msra.mxu0 %v7443_v9  ;;  %6714 = vmatprep.mubr.msk.f32.mxu0 %vm7362_vm0, %v7363_v10 }
 0xb48   :  { %6917 = vmatprep.subr.bf16.mxu0 %v7361_v4 }
 0xb4b   :  { %6919 = vmatpush3.bf16.msra.mxu0 %v7466_v19 }
 0xb4c   :  { %6926 = vmatprep.subr.bf16.mxu0 %v7361_v4 }
 0xc19   :  { %v1487_v40 = vpop.f32.mrb[6].mxu0 }
 0xc1a   :  { %v1498_v46 = vrot.slane %v1487_v40, %v7470_v23  ;;  %v6694_v0 = vpop.f32.mrb[7].mxu0 }
 0xc1c   :  { %v1499_v48 = vcombine.high %v1498_v46, %v1498_v46  ;;  %v1506_v49 = vrot.slane %v1498_v46, %v7470_v23  ;;  %v7769_v46 = vrot.slane %v567_v37, %v7470_v23 }
 0xc1e   :  { %v1513_v57 = vrot.slane %v1499_v48, %v7470_v23  ;;  %v1516_v50 = vadd.f32 %v1506_v49, %v7732_v47  ;;  %v646_v49 = vcombine.high %v7677_v45, %v7677_v45 }
 0xc20   :  { %v1517_v52 = vadd.f32 %v1513_v57, %v7736_v54  ;;  %7073 = vtanh.f32 %v1516_v50  ;;  %v6450_v55 = vmul.f32 -1.442695, %v1516_v50 }
 0xc22   :  { %7075 = vtanh.f32 %v1517_v52  ;;  %v6451_v56 = vmul.f32 -1.442695, %v1517_v52 }
 0xc23   :  { %7077 = vpow2.f32 %v6450_v55 }
 0xc24   :  { %7079 = vpow2.f32 %v6451_v56 }
 0xc2a   :  { %v7074_v34 = vpop.eup %7073 }
 0xc2b   :  { %1536 = vrot.lane.b32.xlu0 %v7074_v34, %s7365_s3 }
 0xc2c   :  { %v7076_v53 = vpop.eup %7075 }
 0xc2d   :  { %1538 = vrot.lane.b32.xlu1 %v7076_v53, %s7365_s3  ;;  %v7078_v58 = vpop.eup %7077 }
 0xc2e   :  { %v7080_v63 = vpop.eup %7079  ;;  %v1524_v59 = vadd.f32 1.0, %v7078_v58 }
 0xc2f   :  { %v1525_v60 = vadd.f32 1.0, %v7080_v63 }
 0xc30   :  { %7081 = vrcp.f32 %v1524_v59 }
 0xc31   :  { %7083 = vrcp.f32 %v1525_v60 }
 0xc3a   :  { %v7082_v61 = vpop.eup %7081 }
 0xc3b   :  { %v7084_v1 = vpop.eup %7083  ;;  %v1532_v8 = vmul.f32 %v7082_v61, %v7685_v2 }
 0xc3c   :  { %v1533_v13 = vmul.f32 %v7084_v1, %v7688_v7 }
 0xc9d   :  { %v1537_v11 = vpop.permute.xlu0 %1536 }
 0xc9e   :  { %v1542_v62 = vmul.f32 %v7082_v61, %v1537_v11 }
 0xc9f   :  { %v1539_v5 = vpop.permute.xlu1 %1538 }
 0xca0   :  { %1546 = vrot.lane.b32.xlu0 %v1542_v62, %s7366_s15  ;;  %v1543_v6 = vmul.f32 %v7084_v1, %v1539_v5 }
 0xca2   :  { %1548 = vrot.lane.b32.xlu1 %v1543_v6, %s7366_s15 }
 0xd12   :  { %v1547_v12 = vpop.permute.xlu0 %1546 }
 0xd13   :  { %v1552_v14 = vadd.f32 %v1547_v12, %v1532_v8 }
 0xd14   :  { %v1549_v15 = vpop.permute.xlu1 %1548 }
 0xd15   :  { %7085 = vtanh.f32 %v1552_v14  ;;  %v1553_v17 = vadd.f32 %v1549_v15, %v1533_v13 }
 0xd17   :  { %7087 = vtanh.f32 %v1553_v17 }
 0xd1f   :  { %v7086_v20 = vpop.eup %7085 }
 0xd20   :  { %1558 = vrot.lane.b32.xlu0 %v7086_v20, %s7365_s3 }
 0xd21   :  { %v7088_v21 = vpop.eup %7087 }
 0xd22   :  { %1560 = vrot.lane.b32.xlu1 %v7088_v21, %s7365_s3 }
 0xd92   :  { %v1559_v24 = vpop.permute.xlu0 %1558 }
 0xd93   :  { %v7749_v29 = vmul.f32 %v7082_v61, %v1559_v24 }
 0xd94   :  { %v1561_v41 = vpop.permute.xlu1 %1560 }
 0xd95   :  { %v7751_v30 = vmul.f32 %v7084_v1, %v1561_v41 }
 0xd97   :  { %v1584_v2 = vcombine.low %v7749_v29, %v7751_v30 }
 0xd99   :  { %v1591_v7 = vrot.slane %v1584_v2, %v7470_v23 }
 0xd9b   :  { %v1598_v31 = vrot.slane %v1591_v7, %v7470_v23 }
 0xd9d   :  { %1599 = vrot.lane.b32.xlu0 %v1598_v31, %s7366_s15 }
 0xe0f   :  { %v1600_v33 = vpop.permute.xlu0 %1599 }
 0xe10   :  { %6704 = vmatmul.mubr.msk.f32.vlgmr.msra.gmra.mrb[8].mxu1 %vm461_vm1, %v1600_v33 }
 0xe11   :  { %6922 = vmatpush3.bf16.msra.mxu1 %v7443_v9  ;;  %6725 = vmatprep.mubr.msk.f32.mxu1 %vm7362_vm0, %v7363_v10 }
 0xe12   :  { %6923 = vmatprep.subr.bf16.mxu1 %v7361_v4 }
 0xe15   :  { %6925 = vmatpush3.bf16.msra.mxu1 %v7466_v19 }
 0xe16   :  { %6932 = vmatprep.subr.bf16.mxu1 %v7361_v4 }
 0xee3   :  { %v1669_v38 = vpop.f32.mrb[8].mxu1 }
 0xee4   :  { %v1680_v40 = vrot.slane %v1669_v38, %v7470_v23  ;;  %v6705_v42 = vpop.f32.mrb[9].mxu1 }
 0xee5   :  { %v597_v42 = vcombine.high %v7732_v47, %v7732_v47 }
 0xee6   :  { %v1681_v0 = vcombine.high %v1680_v40, %v1680_v40  ;;  %v1688_v48 = vrot.slane %v1680_v40, %v7470_v23 }
 0xee8   :  { %v1695_v57 = vrot.slane %v1681_v0, %v7470_v23  ;;  %v1698_v50 = vadd.f32 %v1688_v48, %v7769_v46 }
 0xeea   :  { %v1699_v52 = vadd.f32 %v1695_v57, %v646_v49  ;;  %7089 = vtanh.f32 %v1698_v50  ;;  %v6453_v53 = vmul.f32 -1.442695, %v1698_v50 }
 0xeec   :  { %7091 = vtanh.f32 %v1699_v52  ;;  %v6454_v55 = vmul.f32 -1.442695, %v1699_v52 }
 0xeed   :  { %7093 = vpow2.f32 %v6453_v53 }
 0xeee   :  { %7095 = vpow2.f32 %v6454_v55 }
 0xef4   :  { %v7090_v39 = vpop.eup %7089 }
 0xef5   :  { %1718 = vrot.lane.b32.xlu1 %v7090_v39, %s7365_s3 }
 0xef6   :  { %v7092_v34 = vpop.eup %7091 }
 0xef7   :  { %1720 = vrot.lane.b32.xlu0 %v7092_v34, %s7365_s3  ;;  %v7094_v56 = vpop.eup %7093 }
 0xef8   :  { %v7096_v58 = vpop.eup %7095  ;;  %v1706_v45 = vadd.f32 1.0, %v7094_v56 }
 0xef9   :  { %v1707_v63 = vadd.f32 1.0, %v7096_v58 }
 0xefa   :  { %7097 = vrcp.f32 %v1706_v45 }
 0xefb   :  { %7099 = vrcp.f32 %v1707_v63 }
 0xf04   :  { %v7098_v59 = vpop.eup %7097 }
 0xf05   :  { %v7100_v11 = vpop.eup %7099  ;;  %v1714_v5 = vmul.f32 %v7098_v59, %v1552_v14 }
 0xf06   :  { %v1715_v12 = vmul.f32 %v7100_v11, %v1553_v17 }
 0xf67   :  { %v1719_v60 = vpop.permute.xlu1 %1718 }
 0xf68   :  { %v1724_v61 = vmul.f32 %v7098_v59, %v1719_v60 }
 0xf69   :  { %v1721_v62 = vpop.permute.xlu0 %1720 }
 0xf6a   :  { %1728 = vrot.lane.b32.xlu1 %v1724_v61, %s7366_s15  ;;  %v1725_v1 = vmul.f32 %v7100_v11, %v1721_v62 }
 0xf6c   :  { %1730 = vrot.lane.b32.xlu0 %v1725_v1, %s7366_s15 }
 0xfdc   :  { %v1729_v6 = vpop.permute.xlu1 %1728 }
 0xfdd   :  { %v1734_v8 = vadd.f32 %v1729_v6, %v1714_v5 }
 0xfde   :  { %v1731_v13 = vpop.permute.xlu0 %1730 }
 0xfdf   :  { %7101 = vtanh.f32 %v1734_v8  ;;  %v1735_v15 = vadd.f32 %v1731_v13, %v1715_v12 }
 0xfe1   :  { %7103 = vtanh.f32 %v1735_v15 }
 0xfe9   :  { %v7102_v20 = vpop.eup %7101 }
 0xfea   :  { %1740 = vrot.lane.b32.xlu1 %v7102_v20, %s7365_s3 }
 0xfeb   :  { %v7104_v21 = vpop.eup %7103 }
 0xfec   :  { %1742 = vrot.lane.b32.xlu0 %v7104_v21, %s7365_s3 }
0x105c   :  { %v1741_v24 = vpop.permute.xlu1 %1740 }
0x105d   :  { %v7782_v2 = vmul.f32 %v7098_v59, %v1741_v24 }
0x105e   :  { %v1743_v41 = vpop.permute.xlu0 %1742 }
0x105f   :  { %v7784_v7 = vmul.f32 %v7100_v11, %v1743_v41 }
0x1061   :  { %v1766_v14 = vcombine.low %v7782_v2, %v7784_v7 }
0x1063   :  { %v1773_v17 = vrot.slane %v1766_v14, %v7470_v23 }
0x1065   :  { %v1780_v31 = vrot.slane %v1773_v17, %v7470_v23 }
0x1067   :  { %1781 = vrot.lane.b32.xlu1 %v1780_v31, %s7366_s15  ;;  %v231_v31 = vcombine.high %v7534_v22, %v7534_v22 }
0x10d9   :  { %v1782_v33 = vpop.permute.xlu1 %1781 }
0x10da   :  { %6715 = vmatmul.mubr.msk.f32.vlgmr.msra.gmra.mrb[8].mxu0 %vm461_vm1, %v1782_v33  ;;  %v443_v33 = vcombine.low %v231_v31, %v7529_v18 }
0x10db   :  { %6928 = vmatpush3.bf16.msra.mxu0 %v7443_v9  ;;  %6736 = vmatprep.mubr.msk.f32.mxu0 %vm7362_vm0, %v7363_v10  ;;  %v648_v9 = vcombine.high %v7736_v54, %v7736_v54 }
0x10dc   :  { %6929 = vmatprep.subr.bf16.mxu0 %v7361_v4 }
0x10df   :  { %6931 = vmatpush3.bf16.msra.mxu0 %v7466_v19 }
0x10e0   :  { %6938 = vmatprep.subr.bf16.mxu0 %v7361_v4 }
0x11ad   :  { %v1851_v37 = vpop.f32.mrb[8].mxu0 }
0x11ae   :  { %v1862_v38 = vrot.slane %v1851_v37, %v7470_v23  ;;  %v6716_v40 = vpop.f32.mrb[9].mxu0  ;;  %v450_v37 = vrot.slane %v443_v33, %v7470_v23 }
0x11b0   :  { %v1863_v0 = vcombine.high %v1862_v38, %v1862_v38  ;;  %v1870_v48 = vrot.slane %v1862_v38, %v7470_v23  ;;  %v457_v38 = vrot.slane %v450_v37, %v7470_v23 }
0x11b2   :  { %v1877_v49 = vrot.slane %v1863_v0, %v7470_v23  ;;  %v1880_v57 = vadd.f32 %v1870_v48, %v597_v42  ;;  %v545_v40 = vadd.f32 %v7713_v32, %v457_v38 }
0x11b4   :  { %v1881_v50 = vadd.f32 %v1877_v49, %v648_v9  ;;  %7105 = vtanh.f32 %v1880_v57  ;;  %v6456_v39 = vmul.f32 -1.442695, %v1880_v57  ;;  %v7830_v0 = vrot.slane %v545_v40, %v7470_v23 }
0x11b5   :  { %v599_v49 = vcombine.high %v7769_v46, %v7769_v46 }
0x11b6   :  { %7107 = vtanh.f32 %v1881_v50  ;;  %v6457_v47 = vmul.f32 -1.442695, %v1881_v50  ;;  %v663_v18 = vrot.slane %v7830_v0, %v7470_v23  ;;  %v656_v38 = vcombine.high %v7830_v0, %v7830_v0 }
0x11b7   :  { %7109 = vpow2.f32 %v6456_v39 }
0x11b8   :  { %7111 = vpow2.f32 %v6457_v47 }
0x11be   :  { %v7106_v19 = vpop.eup %7105 }
0x11bf   :  { %1900 = vrot.lane.b32.xlu0 %v7106_v19, %s7365_s3 }
0x11c0   :  { %v7108_v52 = vpop.eup %7107 }
0x11c1   :  { %1902 = vrot.lane.b32.xlu1 %v7108_v52, %s7365_s3  ;;  %v7110_v34 = vpop.eup %7109 }
0x11c2   :  { %v7112_v53 = vpop.eup %7111  ;;  %v1888_v55 = vadd.f32 1.0, %v7110_v34 }
0x11c3   :  { %v1889_v54 = vadd.f32 1.0, %v7112_v53 }
0x11c4   :  { %7113 = vrcp.f32 %v1888_v55 }
0x11c5   :  { %7115 = vrcp.f32 %v1889_v54 }
0x11ce   :  { %v7114_v56 = vpop.eup %7113 }
0x11cf   :  { %v7116_v63 = vpop.eup %7115  ;;  %v1896_v61 = vmul.f32 %v7114_v56, %v1734_v8 }
0x11d0   :  { %v1897_v1 = vmul.f32 %v7116_v63, %v1735_v15 }
0x1231   :  { %v1901_v58 = vpop.permute.xlu0 %1900 }
0x1232   :  { %v1906_v45 = vmul.f32 %v7114_v56, %v1901_v58 }
0x1233   :  { %v1903_v59 = vpop.permute.xlu1 %1902 }
0x1234   :  { %1910 = vrot.lane.b32.xlu0 %v1906_v45, %s7366_s15  ;;  %v1907_v60 = vmul.f32 %v7116_v63, %v1903_v59 }
0x1236   :  { %1912 = vrot.lane.b32.xlu1 %v1907_v60, %s7366_s15 }
0x12a6   :  { %v1911_v11 = vpop.permute.xlu0 %1910 }
0x12a7   :  { %v1916_v62 = vadd.f32 %v1911_v11, %v1896_v61 }
0x12a8   :  { %v1913_v5 = vpop.permute.xlu1 %1912 }
0x12a9   :  { %7117 = vtanh.f32 %v1916_v62  ;;  %v1917_v6 = vadd.f32 %v1913_v5, %v1897_v1 }
0x12ab   :  { %7119 = vtanh.f32 %v1917_v6 }
0x12b3   :  { %v7118_v12 = vpop.eup %7117 }
0x12b4   :  { %1922 = vrot.lane.b32.xlu0 %v7118_v12, %s7365_s3 }
0x12b5   :  { %v7120_v13 = vpop.eup %7119 }
0x12b6   :  { %1924 = vrot.lane.b32.xlu1 %v7120_v13, %s7365_s3 }
0x1326   :  { %v1923_v20 = vpop.permute.xlu0 %1922 }
0x1327   :  { %v7811_v24 = vmul.f32 %v7114_v56, %v1923_v20 }
0x1328   :  { %v1925_v21 = vpop.permute.xlu1 %1924 }
0x1329   :  { %v7813_v41 = vmul.f32 %v7116_v63, %v1925_v21 }
0x132b   :  { %v1948_v8 = vcombine.low %v7811_v24, %v7813_v41 }
0x132d   :  { %v1955_v15 = vrot.slane %v1948_v8, %v7470_v23 }
0x132f   :  { %v1962_v14 = vrot.slane %v1955_v15, %v7470_v23 }
0x1331   :  { %1963 = vrot.lane.b32.xlu0 %v1962_v14, %s7366_s15 }
0x13a3   :  { %v1964_v17 = vpop.permute.xlu0 %1963 }
0x13a4   :  { %6726 = vmatmul.mubr.msk.f32.vlgmr.msra.gmra.mrb[10].mxu1 %vm461_vm1, %v1964_v17 }
0x13a5   :  { %6747 = vmatprep.mubr.msk.f32.mxu1 %vm7362_vm0, %v7363_v10 }
0x1477   :  { %v2033_v42 = vpop.f32.mrb[10].mxu1 }
0x1478   :  { %v2044_v48 = vrot.slane %v2033_v42, %v7470_v23  ;;  %v6727_v9 = vpop.f32.mrb[11].mxu1 }
0x147a   :  { %v2045_v57 = vcombine.high %v2044_v48, %v2044_v48  ;;  %v2052_v22 = vrot.slane %v2044_v48, %v7470_v23 }
0x147c   :  { %v2059_v50 = vrot.slane %v2045_v57, %v7470_v23  ;;  %v2062_v19 = vadd.f32 %v2052_v22, %v599_v49  ;;  %v670_v49 = vrot.slane %v656_v38, %v7470_v23 }
0x147e   :  { %v2063_v32 = vadd.f32 %v2059_v50, %v663_v18  ;;  %7121 = vtanh.f32 %v2062_v19  ;;  %v6459_v47 = vmul.f32 -1.442695, %v2062_v19 }
0x1480   :  { %7123 = vtanh.f32 %v2063_v32  ;;  %v6460_v46 = vmul.f32 -1.442695, %v2063_v32 }
0x1481   :  { %7125 = vpow2.f32 %v6459_v47  ;;  %v7873_v47 = vsub.s32 0, %v7457_v16 }
0x1482   :  { %7127 = vpow2.f32 %v6460_v46 }
0x1488   :  { %v7122_v52 = vpop.eup %7121 }
0x1489   :  { %2082 = vrot.lane.b32.xlu1 %v7122_v52, %s7365_s3 }
0x148a   :  { %v7124_v39 = vpop.eup %7123 }
0x148b   :  { %2084 = vrot.lane.b32.xlu0 %v7124_v39, %s7365_s3  ;;  %v7126_v34 = vpop.eup %7125 }
0x148c   :  { %v7128_v53 = vpop.eup %7127  ;;  %v2070_v55 = vadd.f32 1.0, %v7126_v34  ;;  %v1207_v34 = vrot.slane %v7650_v27, %v7873_v47  ;;  %v1211_v27 = vrot.slane %v7652_v28, %v7873_v47 }
0x148d   :  { %v2071_v54 = vadd.f32 1.0, %v7128_v53  ;;  %v1571_v53 = vrot.slane %v7749_v29, %v7873_v47  ;;  %v1575_v29 = vrot.slane %v7751_v30, %v7873_v47 }
0x148e   :  { %7129 = vrcp.f32 %v2070_v55  ;;  %v1935_v55 = vrot.slane %v7811_v24, %v7873_v47  ;;  %v1939_v24 = vrot.slane %v7813_v41, %v7873_v47  ;;  %v1025_v41 = vrot.slane %v7621_v35, %v7873_v47 }
0x148f   :  { %7131 = vrcp.f32 %v2071_v54 }
0x1498   :  { %v7130_v56 = vpop.eup %7129 }
0x1499   :  { %v7132_v63 = vpop.eup %7131  ;;  %v2078_v61 = vmul.f32 %v7130_v56, %v1916_v62 }
0x149a   :  { %v2079_v5 = vmul.f32 %v7132_v63, %v1917_v6 }
0x14fb   :  { %v2083_v58 = vpop.permute.xlu1 %2082 }
0x14fc   :  { %v2088_v45 = vmul.f32 %v7130_v56, %v2083_v58 }
0x14fd   :  { %v2085_v59 = vpop.permute.xlu0 %2084 }
0x14fe   :  { %2092 = vrot.lane.b32.xlu1 %v2088_v45, %s7366_s15  ;;  %v2089_v60 = vmul.f32 %v7132_v63, %v2085_v59  ;;  %v1389_v59 = vrot.slane %v7704_v25, %v7873_v47  ;;  %v1029_v25 = vrot.slane %v7623_v36, %v7873_v47  ;;  %v2316_v36 = vld [vmem:[%s8980_s5] sm:$0xff] }
0x1500   :  { %2094 = vrot.lane.b32.xlu0 %v2089_v60, %s7366_s15 }
0x1570   :  { %v2093_v11 = vpop.permute.xlu1 %2092 }
0x1571   :  { %v2098_v1 = vadd.f32 %v2093_v11, %v2078_v61  ;;  %v1753_v61 = vrot.slane %v7782_v2, %v7873_v47  ;;  %v2312_v2 = vld [vmem:[%s8979_s4] sm:$0xff] }
0x1572   :  { %v2095_v12 = vpop.permute.xlu0 %2094 }
0x1573   :  { %7133 = vtanh.f32 %v2098_v1  ;;  %v7843_v13 = vadd.f32 %v2095_v12, %v2079_v5  ;;  %v2313_v12 = vld [vmem:[%s8979_s4 + $0x8] sm:$0xff] }
0x1575   :  { %7135 = vtanh.f32 %v7843_v13 }
0x157d   :  { %v7134_v20 = vpop.eup %7133 }
0x157e   :  { %2104 = vrot.lane.b32.xlu1 %v7134_v20, %s7365_s3  ;;  %v6933_v20 = vpack.c.bf16 %v2313_v12, %v2312_v2 }
0x157f   :  { %v7136_v21 = vpop.eup %7135 }
0x1580   :  { %2106 = vrot.lane.b32.xlu0 %v7136_v21, %s7365_s3  ;;  %v1393_v21 = vrot.slane %v7706_v26, %v7873_v47  ;;  %6934 = vmatpush3.bf16.msra.mxu1 %v6933_v20  ;;  %v2315_v26 = vld [vmem:[%s8979_s4 + $0x18] sm:$0xff] }
0x1581   :  { %6935 = vmatprep.subr.bf16.mxu1 %v7361_v4 }
0x15f0   :  { %v2105_v8 = vpop.permute.xlu1 %2104 }
0x15f1   :  { %v7848_v14 = vmul.f32 %v7130_v56, %v2105_v8  ;;  %v2317_v8 = vld [vmem:[%s8980_s5 + $0x8] sm:$0xff] }
0x15f2   :  { %v2107_v15 = vpop.permute.xlu0 %2106 }
0x15f3   :  { %v7850_v62 = vmul.f32 %v7132_v63, %v2107_v15  ;;  %v2117_v35 = vrot.slane %v7848_v14, %v7873_v47  ;;  %v7940_v15 = vpack.c.bf16 %v2317_v8, %v2316_v36 }
0x15f5   :  { %v2130_v6 = vcombine.low %v7848_v14, %v7850_v62  ;;  %v2314_v14 = vld [vmem:[%s8979_s4 + $0x10] sm:$0xff] }
0x15f7   :  { %v2137_v17 = vrot.slane %v2130_v6, %v7470_v23  ;;  %v6936_v6 = vpack.c.bf16 %v2315_v26, %v2314_v14 }
0x15f9   :  { %v2144_v31 = vrot.slane %v2137_v17, %v7470_v23  ;;  %v1757_v17 = vrot.slane %v7784_v7, %v7873_v47  ;;  %6937 = vmatpush3.bf16.msra.mxu1 %v6936_v6  ;;  %v2121_v7 = vrot.slane %v7850_v62, %v7873_v47 }
0x15fa   :  { %6950 = vmatprep.subr.bf16.mxu1 %v7361_v4 }
0x15fb   :  { %2145 = vrot.lane.b32.xlu1 %v2144_v31, %s7366_s15  ;;  %v2318_v31 = vld [vmem:[%s8980_s5 + $0x10] sm:$0xff] }
0x166d   :  { %v2146_v33 = vpop.permute.xlu1 %2145 }
0x166e   :  { %6737 = vmatmul.mubr.msk.f32.vlgmr.msra.gmra.mrb[10].mxu0 %vm461_vm1, %v2146_v33  ;;  %v2319_v33 = vld [vmem:[%s8980_s5 + $0x18] sm:$0xff] }
0x166f   :  { %6764 = vmatprep.mubr.msk.f32.mxu0 %vm7362_vm0, %v7363_v10  ;;  %6940 = vmatpush3.bf16.msra.mxu0 %v7940_v15 }
0x1670   :  { %6941 = vmatprep.subr.bf16.mxu0 %v7361_v4 }
0x1741   :  { %v2215_v37 = vpop.f32.mrb[10].mxu0 }
0x1742   :  { %v2226_v40 = vrot.slane %v2215_v37, %v7470_v23  ;;  %v6738_v42 = vpop.f32.mrb[11].mxu0  ;;  %v7960_v37 = vpack.c.bf16 %v2319_v33, %v2318_v31 }
0x1744   :  { %v2227_v48 = vcombine.high %v2226_v40, %v2226_v40  ;;  %v2234_v9 = vrot.slane %v2226_v40, %v7470_v23  ;;  %6943 = vmatpush3.bf16.msra.mxu0 %v7960_v37 }
0x1745   :  { %6944 = vmatprep.subr.bf16.mxu0 %v7361_v4 }
0x1746   :  { %v2241_v57 = vrot.slane %v2227_v48, %v7470_v23  ;;  %v2244_v22 = vadd.f32 %v2234_v9, %v7604_v51  ;;  %v842_v51 = vrot.slane %v7585_v43, %v7873_v47  ;;  %v846_v43 = vrot.slane %v7587_v44, %v7873_v47 }
0x1747   :  { %6765 = vmatmul.mubr.f32.vlgmr.msra.gmra.mrb[12].mxu0 %v7363_v10 }
0x1748   :  { %v7867_v18 = vadd.f32 %v2241_v57, %v670_v49  ;;  %7137 = vtanh.f32 %v2244_v22  ;;  %v6462_v19 = vmul.f32 -1.442695, %v2244_v22  ;;  %6946 = vmatpush3.bf16.msra.mxu0 %v7940_v15  ;;  %6775 = vmatprep.mubr.msk.f32.mxu0 %vm7362_vm0, %v7363_v10 }
0x1749   :  { %6947 = vmatprep.subr.bf16.mxu0 %v7361_v4 }
0x174a   :  { %7139 = vpow2.f32 %v6462_v19 }
0x174c   :  { %6949 = vmatpush3.bf16.msra.mxu0 %v7960_v37 }
0x174d   :  { %6956 = vmatprep.subr.bf16.mxu0 %v7361_v4 }
0x1752   :  { %v7138_v50 = vpop.eup %7137 }
0x1753   :  { %2264 = vrot.lane.b32.xlu0 %v7138_v50, %s7365_s3 }
0x1754   :  { %v7140_v0 = vpop.eup %7139 }
0x1755   :  { %v2252_v32 = vadd.f32 1.0, %v7140_v0 }
0x1757   :  { %7141 = vrcp.f32 %v2252_v32 }
0x1761   :  { %v7870_v52 = vpop.eup %7141 }
0x1762   :  { %v2260_v54 = vmul.f32 %v7870_v52, %v2098_v1 }
0x17c5   :  { %v2265_v39 = vpop.permute.xlu0 %2264 }
0x17c6   :  { %v2270_v46 = vmul.f32 %v7870_v52, %v2265_v39 }
0x17c8   :  { %2274 = vrot.lane.b32.xlu1 %v2270_v46, %s7366_s15 }
0x17cc   :  { %847 = vrot.lane.b32.xlu1 %v842_v51, %s7366_s15 }
0x17d0   :  { %1212 = vrot.lane.b32.xlu1 %v1207_v34, %s7366_s15 }
0x17d4   :  { %1576 = vrot.lane.b32.xlu1 %v1571_v53, %s7366_s15 }
0x17d8   :  { %1940 = vrot.lane.b32.xlu1 %v1935_v55, %s7366_s15 }
0x17dc   :  { %849 = vrot.lane.b32.xlu1 %v846_v43, %s7366_s15 }
0x17e0   :  { %1214 = vrot.lane.b32.xlu1 %v1211_v27, %s7366_s15 }
0x17e4   :  { %1578 = vrot.lane.b32.xlu1 %v1575_v29, %s7366_s15 }
0x17e8   :  { %1942 = vrot.lane.b32.xlu1 %v1939_v24, %s7366_s15 }
0x183a   :  { %v2275_v44 = vpop.permute.xlu1 %2274 }
0x183b   :  { %v2280_v56 = vadd.f32 %v2275_v44, %v2260_v54 }
0x183d   :  { %7143 = vtanh.f32 %v2280_v56 }
0x183e   :  { %v848_v58 = vpop.permute.xlu1 %847 }
0x183f   :  { %854 = vst.msk [vmem:[#allocation2] sm:$0x1] %vm853_vm2, %v848_v58 }
0x1842   :  { %v1213_v28 = vpop.permute.xlu1 %1212 }
0x1843   :  { %1218 = vst.msk [vmem:[#allocation2 + $0x2] sm:$0x1] %vm853_vm2, %v1213_v28 }
0x1846   :  { %v1577_v30 = vpop.permute.xlu1 %1576 }
0x1847   :  { %v7144_v45 = vpop.eup %7143  ;;  %1582 = vst.msk [vmem:[#allocation2 + $0x4] sm:$0x1] %vm853_vm2, %v1577_v30 }
0x1848   :  { %2286 = vrot.lane.b32.xlu0 %v7144_v45, %s7365_s3 }
0x184a   :  { %v1941_v63 = vpop.permute.xlu1 %1940 }
0x184b   :  { %1946 = vst.msk [vmem:[#allocation2 + $0x6] sm:$0x1] %vm853_vm2, %v1941_v63 }
0x184c   :  { %1030 = vrot.lane.b32.xlu0 %v1025_v41, %s7366_s15 }
0x184e   :  { %v850_v60 = vpop.permute.xlu1 %849 }
0x184f   :  { %855 = vst.msk [vmem:[#allocation2 + $0x10] sm:$0x1] %vm853_vm2, %v850_v60 }
0x1850   :  { %1394 = vrot.lane.b32.xlu0 %v1389_v59, %s7366_s15 }
0x1852   :  { %v1215_v11 = vpop.permute.xlu1 %1214 }
0x1853   :  { %1219 = vst.msk [vmem:[#allocation2 + $0x12] sm:$0x1] %vm853_vm2, %v1215_v11 }
0x1854   :  { %1758 = vrot.lane.b32.xlu0 %v1753_v61, %s7366_s15 }
0x1856   :  { %v1579_v1 = vpop.permute.xlu1 %1578 }
0x1857   :  { %1583 = vst.msk [vmem:[#allocation2 + $0x14] sm:$0x1] %vm853_vm2, %v1579_v1 }
0x1858   :  { %2122 = vrot.lane.b32.xlu0 %v2117_v35, %s7366_s15 }
0x185a   :  { %v1943_v5 = vpop.permute.xlu1 %1942 }
0x185b   :  { %1947 = vst.msk [vmem:[#allocation2 + $0x16] sm:$0x1] %vm853_vm2, %v1943_v5 }
0x185c   :  { %1032 = vrot.lane.b32.xlu0 %v1029_v25, %s7366_s15 }
0x1860   :  { %1396 = vrot.lane.b32.xlu0 %v1393_v21, %s7366_s15 }
0x1864   :  { %1760 = vrot.lane.b32.xlu0 %v1757_v17, %s7366_s15 }
0x1868   :  { %2124 = vrot.lane.b32.xlu0 %v2121_v7, %s7366_s15 }
0x18ba   :  { %v2287_v38 = vpop.permute.xlu0 %2286 }
0x18bb   :  { %v2292_v62 = vmul.f32 %v7870_v52, %v2287_v38 }
0x18bd   :  { %v2299_v40 = vrot.slane %v2292_v62, %v7873_v47  ;;  %v3031_v62 = vpop.f32.mrb[12].mxu0 }
0x18be   :  { %v1031_v42 = vpop.permute.xlu0 %1030 }
0x18bf   :  { %1036 = vst.msk [vmem:[#allocation2 + $0x1] sm:$0x1] %vm853_vm2, %v1031_v42  ;;  %2304 = vrot.lane.b32.xlu1 %v2299_v40, %s7366_s15  ;;  %v6766_v42 = vpop.f32.mrb[13].mxu0 }
0x18c2   :  { %v1395_v48 = vpop.permute.xlu0 %1394 }
0x18c3   :  { %1400 = vst.msk [vmem:[#allocation2 + $0x3] sm:$0x1] %vm853_vm2, %v1395_v48 }
0x18c6   :  { %v1759_v9 = vpop.permute.xlu0 %1758 }
0x18c7   :  { %1764 = vst.msk [vmem:[#allocation2 + $0x5] sm:$0x1] %vm853_vm2, %v1759_v9 }
0x18ca   :  { %v2123_v49 = vpop.permute.xlu0 %2122 }
0x18cb   :  { %2128 = vst.msk [vmem:[#allocation2 + $0x7] sm:$0x1] %vm853_vm2, %v2123_v49 }
0x18ce   :  { %v1033_v57 = vpop.permute.xlu0 %1032 }
0x18cf   :  { %1037 = vst.msk [vmem:[#allocation2 + $0x11] sm:$0x1] %vm853_vm2, %v1033_v57 }
0x18d2   :  { %v2321_v22 = vld [vmem:[#allocation2] sm:$0xff]  ;;  %v1397_v50 = vpop.permute.xlu0 %1396 }
0x18d3   :  { %1401 = vst.msk [vmem:[#allocation2 + $0x13] sm:$0x1] %vm853_vm2, %v1397_v50  ;;  %v2334_v19 = vcombine.high %v2321_v22, %v2321_v22  ;;  %v2341_v0 = vrot.slane %v2321_v22, %v7470_v23 }
0x18d5   :  { %v2348_v32 = vrot.slane %v2334_v19, %v7470_v23  ;;  %v2349_v52 = vcombine.high %v2341_v0, %v2341_v0  ;;  %v2357_v51 = vrot.slane %v2341_v0, %v7470_v23  ;;  %v6464_v0 = vld [vmem:[%s8981_s6] ss:$0 sm:$0xff] }
0x18d6   :  { %v1761_v39 = vpop.permute.xlu0 %1760 }
0x18d7   :  { %1765 = vst.msk [vmem:[#allocation2 + $0x15] sm:$0x1] %vm853_vm2, %v1761_v39  ;;  %v2350_v46 = vcombine.high %v2348_v32, %v2348_v32  ;;  %v2371_v34 = vrot.slane %v2349_v52, %v7470_v23  ;;  %v2364_v53 = vrot.slane %v2348_v32, %v7470_v23  ;;  %v2460_v32 = vcombine.high %v6464_v0, %v6464_v0 }
0x18d8   :  { %v2467_v52 = vrot.slane %v6464_v0, %v7470_v23 }
0x18d9   :  { %v2378_v55 = vrot.slane %v2350_v46, %v7470_v23  ;;  %v2509_v43 = vcombine.low %v2357_v51, %v2371_v34  ;;  %v6467_v27 = vcombine.high %v2357_v51, %v2371_v34  ;;  %v2474_v39 = vrot.slane %v2460_v32, %v7470_v23 }
0x18da   :  { %v2125_v29 = vpop.permute.xlu0 %2124  ;;  %v2475_v46 = vcombine.high %v2467_v52, %v2467_v52  ;;  %v8032_v34 = vrot.slane %v2467_v52, %v7470_v23 }
0x18db   :  { %2129 = vst.msk [vmem:[#allocation2 + $0x17] sm:$0x1] %vm853_vm2, %v2125_v29  ;;  %v2511_v24 = vcombine.low %v2364_v53, %v2378_v55  ;;  %v6468_v54 = vcombine.high %v2364_v53, %v2378_v55  ;;  %v2519_v44 = vrot.slane %v2509_v43, %v7470_v23  ;;  %v2526_v56 = vrot.slane %v6467_v27, %v7470_v23 }
0x18dc   :  { %v2476_v51 = vcombine.high %v2474_v39, %v2474_v39  ;;  %v2490_v53 = vrot.slane %v2474_v39, %v7470_v23  ;;  %v2497_v55 = vrot.slane %v2475_v46, %v7470_v23 }
0x18dd   :  { %v2533_v58 = vrot.slane %v2511_v24, %v7470_v23  ;;  %v2540_v28 = vrot.slane %v6468_v54, %v7470_v23  ;;  %v2541_v30 = vcombine.low %v2519_v44, %v2526_v56 }
0x18de   :  { %v8037_v43 = vrot.slane %v2476_v51, %v7470_v23  ;;  %v2622_v27 = vcombine.low %v8032_v34, %v2497_v55  ;;  %v6469_v29 = vcombine.high %v8032_v34, %v2497_v55 }
0x18df   :  { %v2542_v45 = vcombine.low %v2533_v58, %v2540_v28  ;;  %v2549_v41 = vrot.slane %v2541_v30, %v7470_v23 }
0x18e0   :  { %v2624_v24 = vcombine.low %v2490_v53, %v8037_v43  ;;  %v6470_v54 = vcombine.high %v2490_v53, %v8037_v43  ;;  %v2632_v44 = vrot.slane %v2622_v27, %v7470_v23  ;;  %v2639_v56 = vrot.slane %v6469_v29, %v7470_v23 }
0x18e1   :  { %v2556_v63 = vrot.slane %v2542_v45, %v7470_v23 }
0x18e2   :  { %v2323_v60 = vld [vmem:[#allocation2 + $0x10] sm:$0xff]  ;;  %v2646_v58 = vrot.slane %v2624_v24, %v7470_v23  ;;  %v2653_v28 = vrot.slane %v6470_v54, %v7470_v23  ;;  %v2654_v30 = vcombine.low %v2632_v44, %v2639_v56 }
0x18e3   :  { %v2557_v59 = vcombine.low %v2549_v41, %v2556_v63  ;;  %v2397_v61 = vcombine.high %v2323_v60, %v2323_v60  ;;  %v2404_v11 = vrot.slane %v2323_v60, %v7470_v23  ;;  %v3042_v60 = vrot.slane %v3031_v62, %v7470_v23 }
0x18e4   :  { %v2655_v45 = vcombine.low %v2646_v58, %v2653_v28  ;;  %v2662_v41 = vrot.slane %v2654_v30, %v7470_v23 }
0x18e5   :  { %6748 = vmatmul.mubr.msk.f32.vlgmr.msra.gmra.mrb[12].mxu1 %vm461_vm1, %v2557_v59  ;;  %v2411_v35 = vrot.slane %v2397_v61, %v7470_v23  ;;  %v2412_v1 = vcombine.high %v2404_v11, %v2404_v11  ;;  %v2420_v20 = vrot.slane %v2404_v11, %v7470_v23 }
0x18e6   :  { %6750 = vmatprep.mubr.msk.f32.mxu1 %vm7362_vm0, %v7363_v10  ;;  %6952 = vmatpush3.bf16.msra.mxu1 %v7940_v15  ;;  %v2669_v63 = vrot.slane %v2655_v45, %v7470_v23 }
0x18e7   :  { %6953 = vmatprep.subr.bf16.mxu1 %v7361_v4  ;;  %v2413_v25 = vcombine.high %v2411_v35, %v2411_v35  ;;  %v2427_v5 = vrot.slane %v2411_v35, %v7470_v23  ;;  %v2434_v2 = vrot.slane %v2412_v1, %v7470_v23  ;;  %v2442_v14 = vcombine.high %v2420_v20, %v2420_v20 }
0x18e8   :  { %v2670_v59 = vcombine.low %v2662_v41, %v2669_v63 }
0x18e9   :  { %v8013_v21 = vrot.slane %v2413_v25, %v7470_v23  ;;  %v2443_v36 = vcombine.high %v2427_v5, %v2427_v5  ;;  %v2444_v8 = vcombine.high %v2434_v2, %v2434_v2  ;;  %v2559_v33 = vcombine.low %v2434_v2, %v2442_v14 }
0x18ea   :  { %6955 = vmatpush3.bf16.msra.mxu1 %v7960_v37  ;;  %v3050_v25 = vrot.slane %v3042_v60, %v7470_v23  ;;  %v2671_v14 = vcombine.low %v8032_v34, %v8032_v34 }
0x18eb   :  { %6962 = vmatprep.subr.bf16.mxu1 %v7361_v4  ;;  %v2560_v26 = vcombine.low %v2444_v8, %v2427_v5  ;;  %v2561_v6 = vcombine.low %v8013_v21, %v2443_v36  ;;  %v2575_v9 = vrot.slane %v2559_v33, %v7470_v23  ;;  %v2506_v36 = vcombine.high %v2490_v53, %v2490_v53 }
0x18ec   :  { %v2507_v8 = vcombine.high %v2497_v55, %v2497_v55 }
0x18ed   :  { %v2582_v7 = vrot.slane %v2560_v26, %v7470_v23  ;;  %v2589_v38 = vrot.slane %v2561_v6, %v7470_v23 }
0x18ee   :  { %v2673_v6 = vcombine.low %v2507_v8, %v2490_v53 }
0x18ef   :  { %v2591_v49 = vcombine.low %v2582_v7, %v2589_v38 }
0x18f0   :  { %v2695_v7 = vrot.slane %v2673_v6, %v7470_v23 }
0x18f1   :  { %v2605_v50 = vrot.slane %v2591_v49, %v7470_v23 }
0x1931   :  { %v2305_v12 = vpop.permute.xlu1 %2304 }
0x1932   :  { %2310 = vst.msk [vmem:[#allocation2 + $0x8] sm:$0x1] %vm853_vm2, %v2305_v12 }
0x1939   :  { %v6465_v17 = vld.sshfl [vmem:[#allocation2 + $0x8] sm:$0x1 pattern:$0x75316420] }
0x193a   :  { %v2396_v31 = vrot.slane %v6465_v17, %v7470_v23  ;;  %v2674_v17 = vcombine.low %v8037_v43, %v2506_v36 }
0x193c   :  { %v2558_v40 = vcombine.low %v2396_v31, %v2420_v20  ;;  %v2505_v20 = vcombine.high %v8032_v34, %v8032_v34  ;;  %v2681_v31 = vrot.slane %v2671_v14, %v7470_v23  ;;  %v2702_v38 = vrot.slane %v2674_v17, %v7470_v23 }
0x193e   :  { %v2568_v48 = vrot.slane %v2558_v40, %v7470_v23  ;;  %v2672_v26 = vcombine.low %v2497_v55, %v2505_v20  ;;  %v2704_v40 = vcombine.low %v2695_v7, %v2702_v38 }
0x1940   :  { %v2590_v57 = vcombine.low %v2568_v48, %v2575_v9  ;;  %v2688_v33 = vrot.slane %v2672_v26, %v7470_v23  ;;  %v2718_v48 = vrot.slane %v2704_v40, %v7470_v23 }
0x1942   :  { %v2598_v22 = vrot.slane %v2590_v57, %v7470_v23  ;;  %v2703_v62 = vcombine.low %v2681_v31, %v2688_v33  ;;  %v3043_v57 = vcombine.high %v3042_v60, %v3042_v60  ;;  %v6463_v31 = vmul.f32 -1.442695, %v7867_v18 }
0x1944   :  { %v2606_v19 = vcombine.low %v2598_v22, %v2605_v50  ;;  %v2711_v42 = vrot.slane %v2703_v62, %v7470_v23  ;;  %v3057_v0 = vrot.slane %v3043_v57, %v7470_v23 }
0x1946   :  { %6751 = vmatmul.mubr.msk.f32.gmra.mrb[14].mxu1 %vm461_vm1, %v2606_v19  ;;  %v2719_v9 = vcombine.low %v2711_v42, %v2718_v48 }
0x1947   :  { %6753 = vmatprep.mubr.msk.f32.mxu1 %vm7362_vm0, %v7363_v10 }
0x19b8   :  { %v2810_v61 = vpop.f32.mrb[12].mxu1 }
0x19b9   :  { %v8050_v11 = vadd.f32 %v2810_v61, %v2670_v59  ;;  %v6749_v35 = vpop.f32.mrb[13].mxu1 }
0x19bb   :  { %v8054_v1 = vrot.slane %v8050_v11, %v7470_v23 }
0x19bd   :  { %v8059_v5 = vrot.slane %v8054_v1, %v7470_v23  ;;  %v2842_v33 = vcombine.high %v8054_v1, %v8054_v1 }
0x19bf   :  { %v3060_v2 = vadd.f32 %v3050_v25, %v8059_v5  ;;  %v8120_v48 = vrot.slane %v2842_v33, %v7470_v23 }
0x19c1   :  { %7145 = vtanh.f32 %v3060_v2  ;;  %v6474_v52 = vmul.f32 -1.442695, %v3060_v2 }
0x19c3   :  { %7147 = vpow2.f32 %v6474_v52 }
0x19cb   :  { %v7146_v12 = vpop.eup %7145 }
0x19cc   :  { %3080 = vrot.lane.b32.xlu0 %v7146_v12, %s7365_s3 }
0x19cd   :  { %v7148_v51 = vpop.eup %7147 }
0x19ce   :  { %v3068_v55 = vadd.f32 1.0, %v7148_v51 }
0x1a19   :  { %v2815_v49 = vpop.f32.mrb[14].mxu1 }
0x1a1a   :  { %v8074_v22 = vadd.f32 %v2815_v49, %v2719_v9  ;;  %v6752_v50 = vpop.f32.mrb[15].mxu1 }
0x1a1c   :  { %v2883_v19 = vrot.slane %v8074_v22, %v7470_v23 }
0x1a1e   :  { %v2891_v32 = vcombine.high %v2883_v19, %v2883_v19  ;;  %v8116_v38 = vrot.slane %v2883_v19, %v7470_v23 }
0x1a20   :  { %v8080_v39 = vrot.slane %v2891_v32, %v7470_v23 }
0x1a22   :  { %v3061_v46 = vadd.f32 %v3057_v0, %v8080_v39 }
0x1a24   :  { %7149 = vtanh.f32 %v3061_v46  ;;  %v6475_v54 = vmul.f32 -1.442695, %v3061_v46 }
0x1a25   :  { %7151 = vrcp.f32 %v3068_v55 }
0x1a26   :  { %7153 = vpow2.f32 %v6475_v54 }
0x1a2e   :  { %v7150_v53 = vpop.eup %7149 }
0x1a2f   :  { %3082 = vrot.lane.b32.xlu1 %v7150_v53, %s7365_s3  ;;  %v7152_v27 = vpop.eup %7151 }
0x1a30   :  { %v7154_v44 = vpop.eup %7153  ;;  %v3076_v45 = vmul.f32 0.0, %v7152_v27 }
0x1a31   :  { %v3069_v56 = vadd.f32 1.0, %v7154_v44 }
0x1a33   :  { %7155 = vrcp.f32 %v3069_v56 }
0x1a3d   :  { %v7156_v58 = vpop.eup %7155 }
0x1a3e   :  { %v3081_v29 = vpop.permute.xlu0 %3080  ;;  %v3077_v60 = vmul.f32 0.0, %v7156_v58 }
0x1a3f   :  { %v3086_v24 = vmul.f32 %v7152_v27, %v3081_v29 }
0x1a41   :  { %3090 = vrot.lane.b32.xlu0 %v3086_v24, %s7366_s15 }
0x1aa1   :  { %v3083_v28 = vpop.permute.xlu1 %3082 }
0x1aa2   :  { %v3087_v30 = vmul.f32 %v7156_v58, %v3083_v28 }
0x1aa4   :  { %3092 = vrot.lane.b32.xlu1 %v3087_v30, %s7366_s15 }
0x1ab3   :  { %v3091_v41 = vpop.permute.xlu0 %3090 }
0x1ab4   :  { %v8086_v63 = vadd.f32 %v3091_v41, %v3076_v45 }
0x1ab6   :  { %7157 = vtanh.f32 %v8086_v63 }
0x1ac0   :  { %v7158_v59 = vpop.eup %7157 }
0x1ac1   :  { %3102 = vrot.lane.b32.xlu0 %v7158_v59, %s7365_s3 }
0x1b16   :  { %v3093_v61 = vpop.permute.xlu1 %3092 }
0x1b17   :  { %v8090_v35 = vadd.f32 %v3093_v61, %v3077_v60 }
0x1b19   :  { %7159 = vtanh.f32 %v8090_v35 }
0x1b1a   :  { %7161 = vtanh.f32 %v7867_v18  ;;  %v2921_v18 = vcombine.high %v8116_v38, %v8116_v38 }
0x1b1b   :  { %7163 = vpow2.f32 %v6463_v31 }
0x1b23   :  { %v7160_v25 = vpop.eup %7159 }
0x1b24   :  { %3104 = vrot.lane.b32.xlu1 %v7160_v25, %s7365_s3  ;;  %v7162_v2 = vpop.eup %7161 }
0x1b25   :  { %v7164_v42 = vpop.eup %7163 }
0x1b26   :  { %v2253_v57 = vadd.f32 1.0, %v7164_v42 }
0x1b28   :  { %2266 = vrot.lane.b32.xlu1 %v7162_v2, %s7365_s3 }
0x1b33   :  { %v3103_v12 = vpop.permute.xlu0 %3102 }
0x1b34   :  { %v8096_v36 = vmul.f32 %v7152_v27, %v3103_v12 }
0x1b96   :  { %v3105_v20 = vpop.permute.xlu1 %3104 }
0x1b97   :  { %v8098_v8 = vmul.f32 %v7156_v58, %v3105_v20 }
0x1b99   :  { %v3128_v14 = vcombine.low %v8096_v36, %v8098_v8 }
0x1b9a   :  { %v2267_v32 = vpop.permute.xlu1 %2266 }
0x1b9b   :  { %v3135_v26 = vrot.slane %v3128_v14, %v7470_v23 }
0x1b9d   :  { %v3142_v6 = vrot.slane %v3135_v26, %v7470_v23 }
0x1b9f   :  { %3143 = vrot.lane.b32.xlu0 %v3142_v6, %s7366_s15 }
0x1c11   :  { %v3144_v17 = vpop.permute.xlu0 %3143 }
0x1c12   :  { %6776 = vmatmul.mubr.msk.f32.vlgmr.msra.gmra.mrb[14].mxu0 %vm461_vm1, %v3144_v17 }
0x1c13   :  { %6958 = vmatpush3.bf16.msra.mxu0 %v7940_v15  ;;  %6797 = vmatprep.mubr.msk.f32.mxu0 %vm7362_vm0, %v7363_v10 }
0x1c14   :  { %6959 = vmatprep.subr.bf16.mxu0 %v7361_v4 }
0x1c17   :  { %6961 = vmatpush3.bf16.msra.mxu0 %v7960_v37 }
0x1c18   :  { %6968 = vmatprep.subr.bf16.mxu0 %v7361_v4 }
0x1ce5   :  { %v3213_v7 = vpop.f32.mrb[14].mxu0 }
0x1ce6   :  { %v3224_v62 = vrot.slane %v3213_v7, %v7470_v23  ;;  %v6777_v40 = vpop.f32.mrb[15].mxu0 }
0x1ce8   :  { %v3225_v9 = vcombine.high %v3224_v62, %v3224_v62  ;;  %v3232_v49 = vrot.slane %v3224_v62, %v7470_v23 }
0x1cea   :  { %v3239_v1 = vrot.slane %v3225_v9, %v7470_v23  ;;  %v3242_v50 = vadd.f32 %v3232_v49, %v8120_v48 }
0x1cec   :  { %v3243_v19 = vadd.f32 %v3239_v1, %v2921_v18  ;;  %7165 = vtanh.f32 %v3242_v50  ;;  %v6477_v53 = vmul.f32 -1.442695, %v3242_v50  ;;  %v2445_v18 = vcombine.high %v8013_v21, %v8013_v21 }
0x1ced   :  { %7167 = vrcp.f32 %v2253_v57 }
0x1cee   :  { %7169 = vtanh.f32 %v3243_v19  ;;  %v6478_v55 = vmul.f32 -1.442695, %v3243_v19 }
0x1cef   :  { %7171 = vpow2.f32 %v6477_v53 }
0x1cf0   :  { %7173 = vpow2.f32 %v6478_v55  ;;  %v2872_v55 = vcombine.high %v8059_v5, %v8059_v5 }
0x1cf6   :  { %v7166_v0 = vpop.eup %7165 }
0x1cf7   :  { %3262 = vrot.lane.b32.xlu0 %v7166_v0, %s7365_s3  ;;  %v7168_v52 = vpop.eup %7167 }
0x1cf8   :  { %v7170_v46 = vpop.eup %7169  ;;  %v2271_v51 = vmul.f32 %v7168_v52, %v2267_v32  ;;  %v2261_v45 = vmul.f32 %v7168_v52, %v7843_v13 }
0x1cf9   :  { %3264 = vrot.lane.b32.xlu1 %v7170_v46, %s7365_s3  ;;  %v7172_v27 = vpop.eup %7171 }
0x1cfa   :  { %v7174_v29 = vpop.eup %7173  ;;  %v3250_v24 = vadd.f32 1.0, %v7172_v27 }
0x1cfb   :  { %2276 = vrot.lane.b32.xlu0 %v2271_v51, %s7366_s15  ;;  %v3251_v54 = vadd.f32 1.0, %v7174_v29 }
0x1cfc   :  { %7175 = vrcp.f32 %v3250_v24  ;;  %v2923_v24 = vcombine.high %v8080_v39, %v8080_v39 }
0x1cfd   :  { %7177 = vrcp.f32 %v3251_v54 }
0x1d06   :  { %v7176_v44 = vpop.eup %7175 }
0x1d07   :  { %v7178_v28 = vpop.eup %7177  ;;  %v3258_v25 = vmul.f32 %v7176_v44, %v8086_v63 }
0x1d08   :  { %v3259_v20 = vmul.f32 %v7178_v28, %v8090_v35 }
0x1d69   :  { %v3263_v56 = vpop.permute.xlu0 %3262 }
0x1d6a   :  { %v3268_v58 = vmul.f32 %v7176_v44, %v3263_v56 }
0x1d6b   :  { %v3265_v30 = vpop.permute.xlu1 %3264 }
0x1d6c   :  { %3272 = vrot.lane.b32.xlu1 %v3268_v58, %s7366_s15  ;;  %v3269_v41 = vmul.f32 %v7178_v28, %v3265_v30 }
0x1d6d   :  { %v2277_v59 = vpop.permute.xlu0 %2276 }
0x1d6e   :  { %v2281_v60 = vadd.f32 %v2277_v59, %v2261_v45  ;;  %3274 = vrot.lane.b32.xlu0 %v3269_v41, %s7366_s15 }
0x1d70   :  { %7179 = vtanh.f32 %v2281_v60 }
0x1d7a   :  { %v7180_v61 = vpop.eup %7179 }
0x1d7b   :  { %2288 = vrot.lane.b32.xlu1 %v7180_v61, %s7365_s3 }
0x1dde   :  { %v3273_v2 = vpop.permute.xlu1 %3272 }
0x1ddf   :  { %v8135_v12 = vadd.f32 %v3273_v2, %v3258_v25 }
0x1de0   :  { %v3275_v14 = vpop.permute.xlu0 %3274 }
0x1de1   :  { %7181 = vtanh.f32 %v8135_v12  ;;  %v8139_v13 = vadd.f32 %v3275_v14, %v3259_v20 }
0x1de3   :  { %7183 = vtanh.f32 %v8139_v13 }
0x1deb   :  { %v7182_v26 = vpop.eup %7181 }
0x1dec   :  { %3284 = vrot.lane.b32.xlu0 %v7182_v26, %s7365_s3 }
0x1ded   :  { %v2289_v6 = vpop.permute.xlu1 %2288  ;;  %v7184_v17 = vpop.eup %7183 }
0x1dee   :  { %v2293_v31 = vmul.f32 %v7168_v52, %v2289_v6  ;;  %3286 = vrot.lane.b32.xlu1 %v7184_v17, %s7365_s3 }
0x1df0   :  { %v2303_v63 = vrot.slane %v2293_v31, %v7873_v47 }
0x1df2   :  { %2306 = vrot.lane.b32.xlu0 %v2303_v63, %s7366_s15 }
0x1e5e   :  { %v3285_v35 = vpop.permute.xlu0 %3284 }
0x1e5f   :  { %v8146_v7 = vmul.f32 %v7176_v44, %v3285_v35 }
0x1e60   :  { %v3287_v33 = vpop.permute.xlu1 %3286 }
0x1e61   :  { %v8148_v62 = vmul.f32 %v7178_v28, %v3287_v33 }
0x1e63   :  { %v3310_v40 = vcombine.low %v8146_v7, %v8148_v62 }
0x1e64   :  { %v2307_v42 = vpop.permute.xlu0 %2306 }
0x1e65   :  { %2311 = vst.msk [vmem:[#allocation2 + $0x18] sm:$0x1] %vm853_vm2, %v2307_v42  ;;  %v3317_v9 = vrot.slane %v3310_v40, %v7470_v23 }
0x1e67   :  { %v3324_v49 = vrot.slane %v3317_v9, %v7470_v23 }
0x1e69   :  { %3325 = vrot.lane.b32.xlu1 %v3324_v49, %s7366_s15 }
0x1e6c   :  { %v6466_v57 = vld.sshfl [vmem:[#allocation2 + $0x18] sm:$0x1 pattern:$0x75316420] }
0x1e6d   :  { %v2459_v1 = vrot.slane %v6466_v57, %v7470_v23 }
0x1e6f   :  { %v2607_v50 = vcombine.low %v2445_v18, %v2459_v1 }
0x1e71   :  { %v2614_v19 = vrot.slane %v2607_v50, %v7470_v23  ;;  %v2876_v50 = vcombine.high %v8074_v22, %v8074_v22 }
0x1e73   :  { %v2621_v0 = vrot.slane %v2614_v19, %v7470_v23 }
0x1e75   :  { %6754 = vmatmul.mubr.msk.f32.gmra.mrb[16].mxu1 %vm461_vm1, %v2621_v0  ;;  %v8207_v0 = vrot.slane %v2876_v50, %v7470_v23 }
0x1e76   :  { %6786 = vmatprep.mubr.msk.f32.mxu1 %vm7362_vm0, %v7363_v10 }
0x1e77   :  { %v2892_v50 = vcombine.high %v8207_v0, %v8207_v0 }
0x1edb   :  { %v3326_v32 = vpop.permute.xlu1 %3325 }
0x1edc   :  { %6787 = vmatmul.mubr.msk.f32.vlgmr.msra.gmra.mrb[18].mxu1 %vm461_vm1, %v3326_v32 }
0x1edd   :  { %6964 = vmatpush3.bf16.msra.mxu1 %v7940_v15  ;;  %6808 = vmatprep.mubr.msk.f32.mxu1 %vm7362_vm0, %v7363_v10 }
0x1ede   :  { %6965 = vmatprep.subr.bf16.mxu1 %v7361_v4 }
0x1ee1   :  { %6967 = vmatpush3.bf16.msra.mxu1 %v7960_v37 }
0x1ee2   :  { %6974 = vmatprep.subr.bf16.mxu1 %v7361_v4 }
0x1f48   :  { %v8171_v21 = vpop.f32.mrb[16].mxu1 }
0x1f49   :  { %v6755_v52 = vpop.f32.mrb[17].mxu1 }
0x1faf   :  { %v3395_v46 = vpop.f32.mrb[18].mxu1 }
0x1fb0   :  { %v3406_v51 = vrot.slane %v3395_v46, %v7470_v23  ;;  %v6788_v53 = vpop.f32.mrb[19].mxu1  ;;  %v2874_v46 = vcombine.high %v8120_v48, %v8120_v48 }
0x1fb2   :  { %v3407_v27 = vcombine.high %v3406_v51, %v3406_v51  ;;  %v3414_v29 = vrot.slane %v3406_v51, %v7470_v23 }
0x1fb4   :  { %v3421_v54 = vrot.slane %v3407_v27, %v7470_v23  ;;  %v3424_v44 = vadd.f32 %v3414_v29, %v2872_v55  ;;  %v8215_v55 = vrot.slane %v8207_v0, %v7470_v23 }
0x1fb6   :  { %v3425_v56 = vadd.f32 %v3421_v54, %v2923_v24  ;;  %7185 = vtanh.f32 %v3424_v44  ;;  %v6480_v30 = vmul.f32 -1.442695, %v3424_v44 }
0x1fb8   :  { %7187 = vtanh.f32 %v3425_v56  ;;  %v6481_v5 = vmul.f32 -1.442695, %v3425_v56 }
0x1fb9   :  { %7189 = vpow2.f32 %v6480_v30 }
0x1fba   :  { %7191 = vpow2.f32 %v6481_v5 }
0x1fc0   :  { %v7186_v58 = vpop.eup %7185 }
0x1fc1   :  { %3444 = vrot.lane.b32.xlu0 %v7186_v58, %s7365_s3 }
0x1fc2   :  { %v7188_v28 = vpop.eup %7187 }
0x1fc3   :  { %3446 = vrot.lane.b32.xlu1 %v7188_v28, %s7365_s3  ;;  %v7190_v45 = vpop.eup %7189 }
0x1fc4   :  { %v7192_v41 = vpop.eup %7191  ;;  %v3432_v59 = vadd.f32 1.0, %v7190_v45 }
0x1fc5   :  { %v3433_v39 = vadd.f32 1.0, %v7192_v41 }
0x1fc6   :  { %7193 = vrcp.f32 %v3432_v59 }
0x1fc7   :  { %7195 = vrcp.f32 %v3433_v39 }
0x1fd0   :  { %v7194_v60 = vpop.eup %7193 }
0x1fd1   :  { %v7196_v2 = vpop.eup %7195  ;;  %v3440_v26 = vmul.f32 %v7194_v60, %v8135_v12 }
0x1fd2   :  { %v3441_v31 = vmul.f32 %v7196_v2, %v8139_v13 }
0x2033   :  { %v3445_v61 = vpop.permute.xlu0 %3444 }
0x2034   :  { %v3450_v25 = vmul.f32 %v7194_v60, %v3445_v61 }
0x2035   :  { %v3447_v20 = vpop.permute.xlu1 %3446 }
0x2036   :  { %3454 = vrot.lane.b32.xlu0 %v3450_v25, %s7366_s15  ;;  %v3451_v14 = vmul.f32 %v7196_v2, %v3447_v20 }
0x2038   :  { %3456 = vrot.lane.b32.xlu1 %v3451_v14, %s7366_s15 }
0x20a8   :  { %v3455_v6 = vpop.permute.xlu0 %3454 }
0x20a9   :  { %v3460_v17 = vadd.f32 %v3455_v6, %v3440_v26 }
0x20aa   :  { %v3457_v63 = vpop.permute.xlu1 %3456 }
0x20ab   :  { %7197 = vtanh.f32 %v3460_v17  ;;  %v3461_v35 = vadd.f32 %v3457_v63, %v3441_v31 }
0x20ad   :  { %7199 = vtanh.f32 %v3461_v35 }
0x20b5   :  { %v7198_v33 = vpop.eup %7197 }
0x20b6   :  { %3466 = vrot.lane.b32.xlu0 %v7198_v33, %s7365_s3 }
0x20b7   :  { %v7200_v40 = vpop.eup %7199 }
0x20b8   :  { %3468 = vrot.lane.b32.xlu1 %v7200_v40, %s7365_s3 }
0x2128   :  { %v3467_v42 = vpop.permute.xlu0 %3466 }
0x2129   :  { %v8188_v49 = vmul.f32 %v7194_v60, %v3467_v42 }
0x212a   :  { %v3469_v9 = vpop.permute.xlu1 %3468 }
0x212b   :  { %v8190_v57 = vmul.f32 %v7196_v2, %v3469_v9 }
0x212d   :  { %v3492_v12 = vcombine.low %v8188_v49, %v8190_v57 }
0x212f   :  { %v3499_v13 = vrot.slane %v3492_v12, %v7470_v23 }
0x2131   :  { %v3506_v18 = vrot.slane %v3499_v13, %v7470_v23  ;;  %v2827_v13 = vcombine.high %v8050_v11, %v8050_v11 }
0x2133   :  { %3507 = vrot.lane.b32.xlu0 %v3506_v18, %s7366_s15  ;;  %v8244_v18 = vrot.slane %v2827_v13, %v7470_v23 }
0x2135   :  { %v2843_v13 = vcombine.high %v8244_v18, %v8244_v18 }
0x21a5   :  { %v3508_v1 = vpop.permute.xlu0 %3507 }
0x21a6   :  { %6798 = vmatmul.mubr.msk.f32.vlgmr.msra.gmra.mrb[16].mxu0 %vm461_vm1, %v3508_v1 }
0x21a7   :  { %6970 = vmatpush3.bf16.msra.mxu0 %v7940_v15  ;;  %6819 = vmatprep.mubr.msk.f32.mxu0 %vm7362_vm0, %v7363_v10 }
0x21a8   :  { %6971 = vmatprep.subr.bf16.mxu0 %v7361_v4 }
0x21ab   :  { %6973 = vmatpush3.bf16.msra.mxu0 %v7960_v37 }
0x21ac   :  { %6980 = vmatprep.subr.bf16.mxu0 %v7361_v4 }
0x2279   :  { %v3577_v19 = vpop.f32.mrb[16].mxu0 }
0x227a   :  { %v3588_v32 = vrot.slane %v3577_v19, %v7470_v23  ;;  %v6799_v52 = vpop.f32.mrb[17].mxu0 }
0x227b   :  { %v8251_v52 = vrot.slane %v8244_v18, %v7470_v23 }
0x227c   :  { %v3589_v51 = vcombine.high %v3588_v32, %v3588_v32  ;;  %v3596_v53 = vrot.slane %v3588_v32, %v7470_v23 }
0x227e   :  { %v3603_v27 = vrot.slane %v3589_v51, %v7470_v23  ;;  %v3606_v22 = vadd.f32 %v3596_v53, %v2874_v46  ;;  %v8255_v53 = vrot.slane %v2892_v50, %v7470_v23 }
0x2280   :  { %v3607_v29 = vadd.f32 %v3603_v27, %v8215_v55  ;;  %7201 = vtanh.f32 %v3606_v22  ;;  %v6483_v48 = vmul.f32 -1.442695, %v3606_v22 }
0x2282   :  { %7203 = vtanh.f32 %v3607_v29  ;;  %v6484_v44 = vmul.f32 -1.442695, %v3607_v29 }
0x2283   :  { %7205 = vpow2.f32 %v6483_v48 }
0x2284   :  { %7207 = vpow2.f32 %v6484_v44 }
0x228a   :  { %v7202_v24 = vpop.eup %7201 }
0x228b   :  { %3626 = vrot.lane.b32.xlu1 %v7202_v24, %s7365_s3 }
0x228c   :  { %v7204_v54 = vpop.eup %7203 }
0x228d   :  { %3628 = vrot.lane.b32.xlu0 %v7204_v54, %s7365_s3  ;;  %v7206_v56 = vpop.eup %7205 }
0x228e   :  { %v7208_v58 = vpop.eup %7207  ;;  %v3614_v28 = vadd.f32 1.0, %v7206_v56 }
0x228f   :  { %v3615_v30 = vadd.f32 1.0, %v7208_v58 }
0x2290   :  { %7209 = vrcp.f32 %v3614_v28 }
0x2291   :  { %7211 = vrcp.f32 %v3615_v30 }
0x229a   :  { %v7210_v5 = vpop.eup %7209 }
0x229b   :  { %v7212_v59 = vpop.eup %7211  ;;  %v3622_v61 = vmul.f32 %v7210_v5, %v3460_v17 }
0x229c   :  { %v3623_v20 = vmul.f32 %v7212_v59, %v3461_v35 }
0x22fd   :  { %v3627_v45 = vpop.permute.xlu1 %3626 }
0x22fe   :  { %v3632_v41 = vmul.f32 %v7210_v5, %v3627_v45 }
0x22ff   :  { %v3629_v39 = vpop.permute.xlu0 %3628 }
0x2300   :  { %3636 = vrot.lane.b32.xlu1 %v3632_v41, %s7366_s15  ;;  %v3633_v60 = vmul.f32 %v7212_v59, %v3629_v39 }
0x2302   :  { %3638 = vrot.lane.b32.xlu0 %v3633_v60, %s7366_s15 }
0x2372   :  { %v3637_v25 = vpop.permute.xlu1 %3636 }
0x2373   :  { %v3642_v2 = vadd.f32 %v3637_v25, %v3622_v61 }
0x2374   :  { %v3639_v14 = vpop.permute.xlu0 %3638 }
0x2375   :  { %7213 = vtanh.f32 %v3642_v2  ;;  %v3643_v26 = vadd.f32 %v3639_v14, %v3623_v20 }
0x2377   :  { %7215 = vtanh.f32 %v3643_v26 }
0x237f   :  { %v7214_v6 = vpop.eup %7213 }
0x2380   :  { %3648 = vrot.lane.b32.xlu1 %v7214_v6, %s7365_s3 }
0x2381   :  { %v7216_v31 = vpop.eup %7215 }
0x2382   :  { %3650 = vrot.lane.b32.xlu0 %v7216_v31, %s7365_s3 }
0x23f2   :  { %v3649_v63 = vpop.permute.xlu1 %3648 }
0x23f3   :  { %v8225_v40 = vmul.f32 %v7210_v5, %v3649_v63 }
0x23f4   :  { %v3651_v33 = vpop.permute.xlu0 %3650 }
0x23f5   :  { %v8227_v42 = vmul.f32 %v7212_v59, %v3651_v33 }
0x23f7   :  { %v3674_v17 = vcombine.low %v8225_v40, %v8227_v42 }
0x23f9   :  { %v3681_v35 = vrot.slane %v3674_v17, %v7470_v23 }
0x23fb   :  { %v3688_v9 = vrot.slane %v3681_v35, %v7470_v23 }
0x23fd   :  { %3689 = vrot.lane.b32.xlu1 %v3688_v9, %s7366_s15 }
0x246f   :  { %v3690_v12 = vpop.permute.xlu1 %3689 }
0x2470   :  { %6809 = vmatmul.mubr.msk.f32.vlgmr.msra.gmra.mrb[20].mxu1 %vm461_vm1, %v3690_v12 }
0x2471   :  { %6976 = vmatpush3.bf16.msra.mxu1 %v7940_v15  ;;  %6830 = vmatprep.mubr.msk.f32.mxu1 %vm7362_vm0, %v7363_v10 }
0x2472   :  { %6977 = vmatprep.subr.bf16.mxu1 %v7361_v4 }
0x2475   :  { %6979 = vmatpush3.bf16.msra.mxu1 %v7960_v37 }
0x2476   :  { %6986 = vmatprep.subr.bf16.mxu1 %v7361_v4 }
0x2543   :  { %v3759_v1 = vpop.f32.mrb[20].mxu1 }
0x2544   :  { %v3770_v19 = vrot.slane %v3759_v1, %v7470_v23  ;;  %v6810_v32 = vpop.f32.mrb[21].mxu1 }
0x2545   :  { %v8286_v32 = vrot.slane %v2843_v13, %v7470_v23 }
0x2546   :  { %v3771_v46 = vcombine.high %v3770_v19, %v3770_v19  ;;  %v3778_v51 = vrot.slane %v3770_v19, %v7470_v23 }
0x2548   :  { %v3785_v11 = vrot.slane %v3771_v46, %v7470_v23  ;;  %v3788_v27 = vadd.f32 %v3778_v51, %v8251_v52 }
0x254a   :  { %v3789_v22 = vadd.f32 %v3785_v11, %v8255_v53  ;;  %7217 = vtanh.f32 %v3788_v27  ;;  %v6486_v24 = vmul.f32 -1.442695, %v3788_v27  ;;  %v2922_v11 = vcombine.high %v8215_v55, %v8215_v55 }
0x254c   :  { %7219 = vtanh.f32 %v3789_v22  ;;  %v6487_v54 = vmul.f32 -1.442695, %v3789_v22 }
0x254d   :  { %7221 = vpow2.f32 %v6486_v24 }
0x254e   :  { %7223 = vpow2.f32 %v6487_v54 }
0x2554   :  { %v7218_v0 = vpop.eup %7217 }
0x2555   :  { %3808 = vrot.lane.b32.xlu0 %v7218_v0, %s7365_s3 }
0x2556   :  { %v7220_v29 = vpop.eup %7219 }
0x2557   :  { %3810 = vrot.lane.b32.xlu1 %v7220_v29, %s7365_s3  ;;  %v7222_v48 = vpop.eup %7221 }
0x2558   :  { %v7224_v44 = vpop.eup %7223  ;;  %v3796_v56 = vadd.f32 1.0, %v7222_v48 }
0x2559   :  { %v3797_v58 = vadd.f32 1.0, %v7224_v44 }
0x255a   :  { %7225 = vrcp.f32 %v3796_v56 }
0x255b   :  { %7227 = vrcp.f32 %v3797_v58 }
0x2564   :  { %v7226_v28 = vpop.eup %7225 }
0x2565   :  { %v7228_v45 = vpop.eup %7227  ;;  %v3804_v39 = vmul.f32 %v7226_v28, %v3642_v2 }
0x2566   :  { %v3805_v25 = vmul.f32 %v7228_v45, %v3643_v26 }
0x25c7   :  { %v3809_v30 = vpop.permute.xlu0 %3808 }
0x25c8   :  { %v3814_v5 = vmul.f32 %v7226_v28, %v3809_v30 }
0x25c9   :  { %v3811_v41 = vpop.permute.xlu1 %3810 }
0x25ca   :  { %3818 = vrot.lane.b32.xlu0 %v3814_v5, %s7366_s15  ;;  %v3815_v59 = vmul.f32 %v7228_v45, %v3811_v41 }
0x25cc   :  { %3820 = vrot.lane.b32.xlu1 %v3815_v59, %s7366_s15 }
0x263c   :  { %v3819_v60 = vpop.permute.xlu0 %3818 }
0x263d   :  { %v3824_v61 = vadd.f32 %v3819_v60, %v3804_v39 }
0x263e   :  { %v3821_v20 = vpop.permute.xlu1 %3820 }
0x263f   :  { %7229 = vtanh.f32 %v3824_v61  ;;  %v3825_v14 = vadd.f32 %v3821_v20, %v3805_v25 }
0x2641   :  { %7231 = vtanh.f32 %v3825_v14 }
0x2649   :  { %v7230_v6 = vpop.eup %7229 }
0x264a   :  { %3830 = vrot.lane.b32.xlu0 %v7230_v6, %s7365_s3 }
0x264b   :  { %v7232_v31 = vpop.eup %7231 }
0x264c   :  { %3832 = vrot.lane.b32.xlu1 %v7232_v31, %s7365_s3 }
0x26bc   :  { %v3831_v63 = vpop.permute.xlu0 %3830 }
0x26bd   :  { %v8266_v17 = vmul.f32 %v7226_v28, %v3831_v63 }
0x26be   :  { %v3833_v33 = vpop.permute.xlu1 %3832 }
0x26bf   :  { %v8268_v35 = vmul.f32 %v7228_v45, %v3833_v33 }
0x26c1   :  { %v3856_v2 = vcombine.low %v8266_v17, %v8268_v35 }
0x26c3   :  { %v3863_v26 = vrot.slane %v3856_v2, %v7470_v23 }
0x26c5   :  { %v3870_v9 = vrot.slane %v3863_v26, %v7470_v23 }
0x26c7   :  { %3871 = vrot.lane.b32.xlu0 %v3870_v9, %s7366_s15 }
0x2739   :  { %v3872_v12 = vpop.permute.xlu0 %3871 }
0x273a   :  { %6820 = vmatmul.mubr.msk.f32.vlgmr.msra.gmra.mrb[18].mxu0 %vm461_vm1, %v3872_v12 }
0x273b   :  { %6982 = vmatpush3.bf16.msra.mxu0 %v7940_v15  ;;  %6841 = vmatprep.mubr.msk.f32.mxu0 %vm7362_vm0, %v7363_v10 }
0x273c   :  { %6983 = vmatprep.subr.bf16.mxu0 %v7361_v4 }
0x273f   :  { %6985 = vmatpush3.bf16.msra.mxu0 %v7960_v37 }
0x2740   :  { %6992 = vmatprep.subr.bf16.mxu0 %v7361_v4 }
0x280d   :  { %v3941_v1 = vpop.f32.mrb[18].mxu0 }
0x280e   :  { %v3952_v50 = vrot.slane %v3941_v1, %v7470_v23  ;;  %v6821_v19 = vpop.f32.mrb[19].mxu0 }
0x2810   :  { %v3953_v46 = vcombine.high %v3952_v50, %v3952_v50  ;;  %v3960_v51 = vrot.slane %v3952_v50, %v7470_v23 }
0x2812   :  { %v3967_v27 = vrot.slane %v3953_v46, %v7470_v23  ;;  %v3970_v22 = vadd.f32 %v3960_v51, %v8286_v32  ;;  %v2873_v46 = vcombine.high %v8251_v52, %v8251_v52 }
0x2814   :  { %v3971_v0 = vadd.f32 %v3967_v27, %v2922_v11  ;;  %7233 = vtanh.f32 %v3970_v22  ;;  %v6489_v24 = vmul.f32 -1.442695, %v3970_v22 }
0x2816   :  { %7235 = vtanh.f32 %v3971_v0  ;;  %v6490_v54 = vmul.f32 -1.442695, %v3971_v0 }
0x2817   :  { %7237 = vpow2.f32 %v6489_v24 }
0x2818   :  { %7239 = vpow2.f32 %v6490_v54 }
0x281e   :  { %v7234_v18 = vpop.eup %7233 }
0x281f   :  { %3990 = vrot.lane.b32.xlu1 %v7234_v18, %s7365_s3 }
0x2820   :  { %v7236_v29 = vpop.eup %7235 }
0x2821   :  { %3992 = vrot.lane.b32.xlu0 %v7236_v29, %s7365_s3  ;;  %v7238_v48 = vpop.eup %7237 }
0x2822   :  { %v7240_v44 = vpop.eup %7239  ;;  %v3978_v55 = vadd.f32 1.0, %v7238_v48 }
0x2823   :  { %v3979_v56 = vadd.f32 1.0, %v7240_v44 }
0x2824   :  { %7241 = vrcp.f32 %v3978_v55 }
0x2825   :  { %7243 = vrcp.f32 %v3979_v56 }
0x282e   :  { %v7242_v58 = vpop.eup %7241 }
0x282f   :  { %v7244_v5 = vpop.eup %7243  ;;  %v3986_v59 = vmul.f32 %v7242_v58, %v3824_v61 }
0x2830   :  { %v3987_v25 = vmul.f32 %v7244_v5, %v3825_v14 }
0x2891   :  { %v3991_v28 = vpop.permute.xlu1 %3990 }
0x2892   :  { %v3996_v30 = vmul.f32 %v7242_v58, %v3991_v28 }
0x2893   :  { %v3993_v45 = vpop.permute.xlu0 %3992 }
0x2894   :  { %4000 = vrot.lane.b32.xlu1 %v3996_v30, %s7366_s15  ;;  %v3997_v41 = vmul.f32 %v7244_v5, %v3993_v45 }
0x2896   :  { %4002 = vrot.lane.b32.xlu0 %v3997_v41, %s7366_s15 }
0x2906   :  { %v4001_v39 = vpop.permute.xlu1 %4000 }
0x2907   :  { %v4006_v60 = vadd.f32 %v4001_v39, %v3986_v59 }
0x2908   :  { %v4003_v20 = vpop.permute.xlu0 %4002 }
0x2909   :  { %7245 = vtanh.f32 %v4006_v60  ;;  %v4007_v6 = vadd.f32 %v4003_v20, %v3987_v25 }
0x290b   :  { %7247 = vtanh.f32 %v4007_v6 }
0x2913   :  { %v7246_v31 = vpop.eup %7245 }
0x2914   :  { %4012 = vrot.lane.b32.xlu1 %v7246_v31, %s7365_s3 }
0x2915   :  { %v7248_v63 = vpop.eup %7247 }
0x2916   :  { %4014 = vrot.lane.b32.xlu0 %v7248_v63, %s7365_s3 }
0x2986   :  { %v4013_v33 = vpop.permute.xlu1 %4012 }
0x2987   :  { %v8299_v26 = vmul.f32 %v7242_v58, %v4013_v33 }
0x2988   :  { %v4015_v2 = vpop.permute.xlu0 %4014 }
0x2989   :  { %v8301_v9 = vmul.f32 %v7244_v5, %v4015_v2 }
0x298b   :  { %v4038_v61 = vcombine.low %v8299_v26, %v8301_v9 }
0x298d   :  { %v4045_v14 = vrot.slane %v4038_v61, %v7470_v23 }
0x298f   :  { %v4052_v12 = vrot.slane %v4045_v14, %v7470_v23 }
0x2991   :  { %4053 = vrot.lane.b32.xlu1 %v4052_v12, %s7366_s15 }
0x2a03   :  { %v4054_v13 = vpop.permute.xlu1 %4053 }
0x2a04   :  { %6831 = vmatmul.mubr.msk.f32.vlgmr.msra.gmra.mrb[22].mxu1 %vm461_vm1, %v4054_v13  ;;  %v2508_v13 = vcombine.high %v8037_v43, %v8037_v43 }
0x2a05   :  { %6988 = vmatpush3.bf16.msra.mxu1 %v7940_v15  ;;  %6852 = vmatprep.mubr.msk.f32.mxu1 %vm7362_vm0, %v7363_v10  ;;  %v2924_v15 = vcombine.high %v8255_v53, %v8255_v53 }
0x2a06   :  { %6989 = vmatprep.subr.bf16.mxu1 %v7361_v4 }
0x2a09   :  { %6991 = vmatpush3.bf16.msra.mxu1 %v7960_v37 }
0x2ad7   :  { %v4123_v1 = vpop.f32.mrb[22].mxu1 }
0x2ad8   :  { %v4134_v50 = vrot.slane %v4123_v1, %v7470_v23  ;;  %v6832_v19 = vpop.f32.mrb[23].mxu1  ;;  %v2720_v1 = vcombine.low %v2508_v13, %v8032_v34 }
0x2ada   :  { %v4135_v51 = vcombine.high %v4134_v50, %v4134_v50  ;;  %v4142_v11 = vrot.slane %v4134_v50, %v7470_v23  ;;  %v2727_v50 = vrot.slane %v2720_v1, %v7470_v23 }
0x2adc   :  { %v4149_v27 = vrot.slane %v4135_v51, %v7470_v23  ;;  %v4152_v22 = vadd.f32 %v4142_v11, %v2873_v46  ;;  %v2734_v19 = vrot.slane %v2727_v50, %v7470_v23 }
0x2ade   :  { %v4153_v0 = vadd.f32 %v4149_v27, %v2924_v15  ;;  %7249 = vtanh.f32 %v4152_v22  ;;  %v6492_v29 = vmul.f32 -1.442695, %v4152_v22  ;;  %v2821_v46 = vadd.f32 %v8171_v21, %v2734_v19 }
0x2adf   :  { %v2875_v22 = vcombine.high %v8286_v32, %v8286_v32 }
0x2ae0   :  { %7251 = vtanh.f32 %v4153_v0  ;;  %v6493_v52 = vmul.f32 -1.442695, %v4153_v0  ;;  %v8346_v11 = vrot.slane %v2821_v46, %v7470_v23 }
0x2ae1   :  { %7253 = vpow2.f32 %v6492_v29 }
0x2ae2   :  { %7255 = vpow2.f32 %v6493_v52  ;;  %v2939_v34 = vrot.slane %v8346_v11, %v7470_v23  ;;  %v2932_v46 = vcombine.high %v8346_v11, %v8346_v11 }
0x2ae8   :  { %v7250_v37 = vpop.eup %7249 }
0x2ae9   :  { %4172 = vrot.lane.b32.xlu0 %v7250_v37, %s7365_s3 }
0x2aea   :  { %v7252_v18 = vpop.eup %7251 }
0x2aeb   :  { %4174 = vrot.lane.b32.xlu1 %v7252_v18, %s7365_s3  ;;  %v7254_v24 = vpop.eup %7253 }
0x2aec   :  { %v7256_v54 = vpop.eup %7255  ;;  %v4160_v48 = vadd.f32 1.0, %v7254_v24 }
0x2aed   :  { %v4161_v53 = vadd.f32 1.0, %v7256_v54 }
0x2aee   :  { %7257 = vrcp.f32 %v4160_v48 }
0x2aef   :  { %7259 = vrcp.f32 %v4161_v53 }
0x2af8   :  { %v7258_v44 = vpop.eup %7257 }
0x2af9   :  { %v7260_v58 = vpop.eup %7259  ;;  %v4168_v5 = vmul.f32 %v7258_v44, %v4006_v60 }
0x2afa   :  { %v4169_v59 = vmul.f32 %v7260_v58, %v4007_v6 }
0x2b5b   :  { %v4173_v55 = vpop.permute.xlu0 %4172 }
0x2b5c   :  { %v4178_v56 = vmul.f32 %v7258_v44, %v4173_v55 }
0x2b5d   :  { %v4175_v28 = vpop.permute.xlu1 %4174 }
0x2b5e   :  { %4182 = vrot.lane.b32.xlu0 %v4178_v56, %s7366_s15  ;;  %v4179_v30 = vmul.f32 %v7260_v58, %v4175_v28 }
0x2b60   :  { %4184 = vrot.lane.b32.xlu1 %v4179_v30, %s7366_s15 }
0x2bd0   :  { %v4183_v45 = vpop.permute.xlu0 %4182 }
0x2bd1   :  { %v4188_v41 = vadd.f32 %v4183_v45, %v4168_v5 }
0x2bd2   :  { %v4185_v39 = vpop.permute.xlu1 %4184 }
0x2bd3   :  { %7261 = vtanh.f32 %v4188_v41  ;;  %v4189_v25 = vadd.f32 %v4185_v39, %v4169_v59 }
0x2bd5   :  { %7263 = vtanh.f32 %v4189_v25 }
0x2bdd   :  { %v7262_v20 = vpop.eup %7261 }
0x2bde   :  { %4194 = vrot.lane.b32.xlu0 %v7262_v20, %s7365_s3 }
0x2bdf   :  { %v7264_v31 = vpop.eup %7263 }
0x2be0   :  { %4196 = vrot.lane.b32.xlu1 %v7264_v31, %s7365_s3 }
0x2c50   :  { %v4195_v63 = vpop.permute.xlu0 %4194 }
0x2c51   :  { %v8327_v2 = vmul.f32 %v7258_v44, %v4195_v63 }
0x2c52   :  { %v4197_v33 = vpop.permute.xlu1 %4196 }
0x2c53   :  { %v8329_v61 = vmul.f32 %v7260_v58, %v4197_v33 }
0x2c55   :  { %v4220_v60 = vcombine.low %v8327_v2, %v8329_v61 }
0x2c57   :  { %v4227_v6 = vrot.slane %v4220_v60, %v7470_v23 }
0x2c59   :  { %v4234_v14 = vrot.slane %v4227_v6, %v7470_v23 }
0x2c5b   :  { %4235 = vrot.lane.b32.xlu0 %v4234_v14, %s7366_s15 }
0x2ccd   :  { %v4236_v12 = vpop.permute.xlu0 %4235 }
0x2cce   :  { %6842 = vmatmul.mubr.msk.f32.vlgmr.msra.gmra.mrb[20].mxu0 %vm461_vm1, %v4236_v12 }
0x2ccf   :  { %6863 = vmatprep.mubr.msk.f32.mxu0 %vm7362_vm0, %v7363_v10 }
0x2da1   :  { %v4305_v51 = vpop.f32.mrb[20].mxu0 }
0x2da2   :  { %v4316_v15 = vrot.slane %v4305_v51, %v7470_v23  ;;  %v6843_v27 = vpop.f32.mrb[21].mxu0 }
0x2da4   :  { %v4317_v0 = vcombine.high %v4316_v15, %v4316_v15  ;;  %v4324_v43 = vrot.slane %v4316_v15, %v7470_v23 }
0x2da6   :  { %v4331_v37 = vrot.slane %v4317_v0, %v7470_v23  ;;  %v4334_v18 = vadd.f32 %v4324_v43, %v2875_v22  ;;  %v2946_v0 = vrot.slane %v2932_v46, %v7470_v23 }
0x2da8   :  { %v4335_v21 = vadd.f32 %v4331_v37, %v2939_v34  ;;  %7265 = vtanh.f32 %v4334_v18  ;;  %v6495_v24 = vmul.f32 -1.442695, %v4334_v18 }
0x2daa   :  { %7267 = vtanh.f32 %v4335_v21  ;;  %v6496_v32 = vmul.f32 -1.442695, %v4335_v21 }
0x2dab   :  { %7269 = vpow2.f32 %v6495_v24 }
0x2dac   :  { %7271 = vpow2.f32 %v6496_v32 }
0x2db2   :  { %v7266_v29 = vpop.eup %7265 }
0x2db3   :  { %4354 = vrot.lane.b32.xlu1 %v7266_v29, %s7365_s3 }
0x2db4   :  { %v7268_v52 = vpop.eup %7267 }
0x2db5   :  { %4356 = vrot.lane.b32.xlu0 %v7268_v52, %s7365_s3  ;;  %v7270_v54 = vpop.eup %7269 }
0x2db6   :  { %v7272_v48 = vpop.eup %7271  ;;  %v4342_v53 = vadd.f32 1.0, %v7270_v54 }
0x2db7   :  { %v4343_v44 = vadd.f32 1.0, %v7272_v48 }
0x2db8   :  { %7273 = vrcp.f32 %v4342_v53 }
0x2db9   :  { %7275 = vrcp.f32 %v4343_v44 }
0x2dc2   :  { %v7274_v55 = vpop.eup %7273 }
0x2dc3   :  { %v7276_v28 = vpop.eup %7275  ;;  %v4350_v45 = vmul.f32 %v7274_v55, %v4188_v41 }
0x2dc4   :  { %v4351_v20 = vmul.f32 %v7276_v28, %v4189_v25 }
0x2e25   :  { %v4355_v56 = vpop.permute.xlu1 %4354 }
0x2e26   :  { %v4360_v58 = vmul.f32 %v7274_v55, %v4355_v56 }
0x2e27   :  { %v4357_v30 = vpop.permute.xlu0 %4356 }
0x2e28   :  { %4364 = vrot.lane.b32.xlu1 %v4360_v58, %s7366_s15  ;;  %v4361_v5 = vmul.f32 %v7276_v28, %v4357_v30 }
0x2e2a   :  { %4366 = vrot.lane.b32.xlu0 %v4361_v5, %s7366_s15 }
0x2e9a   :  { %v4365_v59 = vpop.permute.xlu1 %4364 }
0x2e9b   :  { %v4370_v39 = vadd.f32 %v4365_v59, %v4350_v45 }
0x2e9c   :  { %v4367_v31 = vpop.permute.xlu0 %4366 }
0x2e9d   :  { %7277 = vtanh.f32 %v4370_v39  ;;  %v4371_v63 = vadd.f32 %v4367_v31, %v4351_v20 }
0x2e9f   :  { %7279 = vtanh.f32 %v4371_v63 }
0x2ea7   :  { %v7278_v33 = vpop.eup %7277 }
0x2ea8   :  { %4376 = vrot.lane.b32.xlu1 %v7278_v33, %s7365_s3  ;;  %v3115_v33 = vrot.slane %v8096_v36, %v7873_v47  ;;  %v3843_v36 = vrot.slane %v8266_v17, %v7873_v47  ;;  %v3119_v17 = vrot.slane %v8098_v8, %v7873_v47  ;;  %v4590_v8 = vld [vmem:[%s8982_s7 + $0x10] sm:$0xff] }
0x2ea9   :  { %v7280_v60 = vpop.eup %7279 }
0x2eaa   :  { %4378 = vrot.lane.b32.xlu0 %v7280_v60, %s7365_s3  ;;  %v3661_v60 = vrot.slane %v8225_v40, %v7873_v47 }
0x2f1a   :  { %v4377_v6 = vpop.permute.xlu1 %4376 }
0x2f1b   :  { %v8361_v12 = vmul.f32 %v7274_v55, %v4377_v6  ;;  %v4588_v6 = vld [vmem:[%s8982_s7] sm:$0xff] }
0x2f1c   :  { %v4379_v14 = vpop.permute.xlu0 %4378 }
0x2f1d   :  { %v8363_v13 = vmul.f32 %v7276_v28, %v4379_v14  ;;  %v4389_v40 = vrot.slane %v8361_v12, %v7873_v47  ;;  %v4589_v14 = vld [vmem:[%s8982_s7 + $0x8] sm:$0xff] }
0x2f1f   :  { %v4402_v41 = vcombine.low %v8361_v12, %v8363_v13  ;;  %v6993_v12 = vpack.c.bf16 %v4589_v14, %v4588_v6 }
0x2f21   :  { %v4409_v25 = vrot.slane %v4402_v41, %v7470_v23  ;;  %6994 = vmatpush3.bf16.msra.mxu0 %v6993_v12 }
0x2f22   :  { %6995 = vmatprep.subr.bf16.mxu0 %v7361_v4 }
0x2f23   :  { %v4416_v1 = vrot.slane %v4409_v25, %v7470_v23  ;;  %v3847_v25 = vrot.slane %v8268_v35, %v7873_v47 }
0x2f25   :  { %4417 = vrot.lane.b32.xlu1 %v4416_v1, %s7366_s15  ;;  %v4029_v1 = vrot.slane %v8301_v9, %v7873_v47 }
0x2f97   :  { %v4418_v50 = vpop.permute.xlu1 %4417 }
0x2f98   :  { %6853 = vmatmul.mubr.msk.f32.vlgmr.msra.gmra.mrb[24].mxu1 %vm461_vm1, %v4418_v50  ;;  %v4211_v50 = vrot.slane %v8329_v61, %v7873_v47 }
0x306b   :  { %v4487_v19 = vpop.f32.mrb[24].mxu1 }
0x306c   :  { %v4498_v51 = vrot.slane %v4487_v19, %v7470_v23  ;;  %v6854_v15 = vpop.f32.mrb[25].mxu1 }
0x306e   :  { %v4499_v27 = vcombine.high %v4498_v51, %v4498_v51  ;;  %v4506_v22 = vrot.slane %v4498_v51, %v7470_v23 }
0x3070   :  { %v4513_v43 = vrot.slane %v4499_v27, %v7470_v23  ;;  %v4516_v34 = vadd.f32 %v4506_v22, %v8116_v38 }
0x3072   :  { %v4517_v37 = vadd.f32 %v4513_v43, %v2946_v0  ;;  %7281 = vtanh.f32 %v4516_v34  ;;  %v6498_v11 = vmul.f32 -1.442695, %v4516_v34 }
0x3074   :  { %7283 = vtanh.f32 %v4517_v37  ;;  %v6499_v29 = vmul.f32 -1.442695, %v4517_v37 }
0x3075   :  { %7285 = vpow2.f32 %v6498_v11 }
0x3076   :  { %7287 = vpow2.f32 %v6499_v29 }
0x307c   :  { %v7282_v18 = vpop.eup %7281 }
0x307d   :  { %4536 = vrot.lane.b32.xlu0 %v7282_v18, %s7365_s3 }
0x307e   :  { %v7284_v21 = vpop.eup %7283 }
0x307f   :  { %4538 = vrot.lane.b32.xlu1 %v7284_v21, %s7365_s3  ;;  %v7286_v52 = vpop.eup %7285 }
0x3080   :  { %v7288_v24 = vpop.eup %7287  ;;  %v4524_v32 = vadd.f32 1.0, %v7286_v52 }
0x3081   :  { %v4525_v54 = vadd.f32 1.0, %v7288_v24 }
0x3082   :  { %7289 = vrcp.f32 %v4524_v32 }
0x3083   :  { %7291 = vrcp.f32 %v4525_v54 }
0x308c   :  { %v7290_v38 = vpop.eup %7289 }
0x308d   :  { %v7292_v44 = vpop.eup %7291  ;;  %v4532_v58 = vmul.f32 %v7290_v38, %v4370_v39  ;;  %v3297_v39 = vrot.slane %v8146_v7, %v7873_v47  ;;  %v4025_v7 = vrot.slane %v8299_v26, %v7873_v47  ;;  %v3301_v26 = vrot.slane %v8148_v62, %v7873_v47  ;;  %v4591_v62 = vld [vmem:[%s8982_s7 + $0x18] sm:$0xff] }
0x308e   :  { %v4533_v5 = vmul.f32 %v7292_v44, %v4371_v63  ;;  %v3479_v63 = vrot.slane %v8188_v49, %v7873_v47  ;;  %v4207_v49 = vrot.slane %v8327_v2, %v7873_v47  ;;  %v3483_v2 = vrot.slane %v8190_v57, %v7873_v47 }
0x308f   :  { %v3665_v57 = vrot.slane %v8227_v42, %v7873_v47  ;;  %v6996_v41 = vpack.c.bf16 %v4591_v62, %v4590_v8  ;;  %v4393_v42 = vrot.slane %v8363_v13, %v7873_v47 }
0x3091   :  { %6997 = vmatpush3.bf16.msra.mxu0 %v6996_v41 }
0x30ef   :  { %v4537_v48 = vpop.permute.xlu0 %4536 }
0x30f0   :  { %v4542_v53 = vmul.f32 %v7290_v38, %v4537_v48 }
0x30f1   :  { %v4539_v55 = vpop.permute.xlu1 %4538 }
0x30f2   :  { %4546 = vrot.lane.b32.xlu0 %v4542_v53, %s7366_s15  ;;  %v4543_v56 = vmul.f32 %v7292_v44, %v4539_v55 }
0x30f4   :  { %4548 = vrot.lane.b32.xlu1 %v4543_v56, %s7366_s15 }
0x3164   :  { %v4547_v28 = vpop.permute.xlu0 %4546 }
0x3165   :  { %v4552_v30 = vadd.f32 %v4547_v28, %v4532_v58 }
0x3166   :  { %v4549_v45 = vpop.permute.xlu1 %4548 }
0x3167   :  { %7293 = vtanh.f32 %v4552_v30  ;;  %v4553_v59 = vadd.f32 %v4549_v45, %v4533_v5 }
0x3169   :  { %7295 = vtanh.f32 %v4553_v59 }
0x3171   :  { %v7294_v20 = vpop.eup %7293 }
0x3172   :  { %4558 = vrot.lane.b32.xlu0 %v7294_v20, %s7365_s3 }
0x3173   :  { %v7296_v31 = vpop.eup %7295 }
0x3174   :  { %4560 = vrot.lane.b32.xlu1 %v7296_v31, %s7365_s3 }
0x3176   :  { %3120 = vrot.lane.b32.xlu0 %v3115_v33, %s7366_s15 }
0x3178   :  { %3302 = vrot.lane.b32.xlu1 %v3297_v39, %s7366_s15 }
0x317a   :  { %3484 = vrot.lane.b32.xlu0 %v3479_v63, %s7366_s15 }
0x317c   :  { %3666 = vrot.lane.b32.xlu1 %v3661_v60, %s7366_s15 }
0x317e   :  { %3848 = vrot.lane.b32.xlu0 %v3843_v36, %s7366_s15 }
0x3180   :  { %4030 = vrot.lane.b32.xlu1 %v4025_v7, %s7366_s15 }
0x3182   :  { %4212 = vrot.lane.b32.xlu0 %v4207_v49, %s7366_s15 }
0x3184   :  { %4394 = vrot.lane.b32.xlu1 %v4389_v40, %s7366_s15 }
0x3186   :  { %3122 = vrot.lane.b32.xlu0 %v3119_v17, %s7366_s15 }
0x3188   :  { %3304 = vrot.lane.b32.xlu1 %v3301_v26, %s7366_s15 }
0x318a   :  { %3486 = vrot.lane.b32.xlu0 %v3483_v2, %s7366_s15 }
0x318c   :  { %3668 = vrot.lane.b32.xlu1 %v3665_v57, %s7366_s15 }
0x318e   :  { %3850 = vrot.lane.b32.xlu0 %v3847_v25, %s7366_s15 }
0x3190   :  { %4032 = vrot.lane.b32.xlu1 %v4029_v1, %s7366_s15 }
0x3192   :  { %4214 = vrot.lane.b32.xlu0 %v4211_v50, %s7366_s15 }
0x3194   :  { %4396 = vrot.lane.b32.xlu1 %v4393_v42, %s7366_s15 }
0x31e4   :  { %v4559_v4 = vpop.permute.xlu0 %4558 }
0x31e5   :  { %v4564_v35 = vmul.f32 %v7290_v38, %v4559_v4 }
0x31e6   :  { %v4561_v46 = vpop.permute.xlu1 %4560 }
0x31e7   :  { %v4571_v19 = vrot.slane %v4564_v35, %v7873_v47  ;;  %v4565_v51 = vmul.f32 %v7292_v44, %v4561_v46 }
0x31e8   :  { %v3121_v9 = vpop.permute.xlu0 %3120 }
0x31e9   :  { %3126 = vst.msk [vmem:[#allocation2] sm:$0x1] %vm853_vm2, %v3121_v9  ;;  %4576 = vrot.lane.b32.xlu0 %v4571_v19, %s7366_s15  ;;  %v4575_v61 = vrot.slane %v4565_v51, %v7873_v47 }
0x31ea   :  { %v3303_v15 = vpop.permute.xlu1 %3302 }
0x31eb   :  { %3308 = vst.msk [vmem:[#allocation2 + $0x1] sm:$0x1] %vm853_vm2, %v3303_v15  ;;  %4578 = vrot.lane.b32.xlu1 %v4575_v61, %s7366_s15 }
0x31ec   :  { %v3485_v13 = vpop.permute.xlu0 %3484 }
0x31ed   :  { %3490 = vst.msk [vmem:[#allocation2 + $0x2] sm:$0x1] %vm853_vm2, %v3485_v13 }
0x31ee   :  { %v3667_v27 = vpop.permute.xlu1 %3666 }
0x31ef   :  { %3672 = vst.msk [vmem:[#allocation2 + $0x3] sm:$0x1] %vm853_vm2, %v3667_v27 }
0x31f0   :  { %v3849_v22 = vpop.permute.xlu0 %3848 }
0x31f1   :  { %3854 = vst.msk [vmem:[#allocation2 + $0x4] sm:$0x1] %vm853_vm2, %v3849_v22 }
0x31f2   :  { %v4031_v0 = vpop.permute.xlu1 %4030 }
0x31f3   :  { %4036 = vst.msk [vmem:[#allocation2 + $0x5] sm:$0x1] %vm853_vm2, %v4031_v0 }
0x31f4   :  { %v4213_v43 = vpop.permute.xlu0 %4212 }
0x31f5   :  { %4218 = vst.msk [vmem:[#allocation2 + $0x6] sm:$0x1] %vm853_vm2, %v4213_v43 }
0x31f6   :  { %v4395_v34 = vpop.permute.xlu1 %4394 }
0x31f7   :  { %4400 = vst.msk [vmem:[#allocation2 + $0x7] sm:$0x1] %vm853_vm2, %v4395_v34 }
0x31f8   :  { %v3123_v37 = vpop.permute.xlu0 %3122 }
0x31f9   :  { %3127 = vst.msk [vmem:[#allocation2 + $0x10] sm:$0x1] %vm853_vm2, %v3123_v37 }
0x31fa   :  { %v3305_v18 = vpop.permute.xlu1 %3304 }
0x31fb   :  { %3309 = vst.msk [vmem:[#allocation2 + $0x11] sm:$0x1] %vm853_vm2, %v3305_v18 }
0x31fc   :  { %v3487_v21 = vpop.permute.xlu0 %3486 }
0x31fd   :  { %3491 = vst.msk [vmem:[#allocation2 + $0x12] sm:$0x1] %vm853_vm2, %v3487_v21 }
0x31fe   :  { %v3669_v11 = vpop.permute.xlu1 %3668  ;;  %v4584_v29 = vld [vmem:[#allocation2] sm:$0xff] }
0x31ff   :  { %3673 = vst.msk [vmem:[#allocation2 + $0x13] sm:$0x1] %vm853_vm2, %v3669_v11  ;;  %v4602_v24 = vcombine.high %v4584_v29, %v4584_v29  ;;  %v4609_v32 = vrot.slane %v4584_v29, %v7470_v23 }
0x3200   :  { %v3851_v52 = vpop.permute.xlu0 %3850 }
0x3201   :  { %3855 = vst.msk [vmem:[#allocation2 + $0x14] sm:$0x1] %vm853_vm2, %v3851_v52  ;;  %v4616_v54 = vrot.slane %v4602_v24, %v7470_v23  ;;  %v4617_v38 = vcombine.high %v4609_v32, %v4609_v32  ;;  %v4625_v55 = vrot.slane %v4609_v32, %v7470_v23 }
0x3202   :  { %v4033_v48 = vpop.permute.xlu1 %4032 }
0x3203   :  { %4037 = vst.msk [vmem:[#allocation2 + $0x15] sm:$0x1] %vm853_vm2, %v4033_v48  ;;  %v4618_v44 = vcombine.high %v4616_v54, %v4616_v54  ;;  %v4639_v56 = vrot.slane %v4617_v38, %v7470_v23  ;;  %v4632_v58 = vrot.slane %v4616_v54, %v7470_v23  ;;  %v6500_v54 = vld [vmem:[%s8983_s8] ss:$0 sm:$0xff] }
0x3204   :  { %v4215_v53 = vpop.permute.xlu0 %4214  ;;  %v4728_v38 = vcombine.high %v6500_v54, %v6500_v54  ;;  %v4735_v48 = vrot.slane %v6500_v54, %v7470_v23 }
0x3205   :  { %4219 = vst.msk [vmem:[#allocation2 + $0x16] sm:$0x1] %vm853_vm2, %v4215_v53  ;;  %v4646_v28 = vrot.slane %v4618_v44, %v7470_v23  ;;  %v4777_v30 = vcombine.low %v4625_v55, %v4639_v56  ;;  %v6503_v5 = vcombine.high %v4625_v55, %v4639_v56 }
0x3206   :  { %v4397_v45 = vpop.permute.xlu1 %4396  ;;  %v4742_v53 = vrot.slane %v4728_v38, %v7470_v23  ;;  %v4743_v44 = vcombine.high %v4735_v48, %v4735_v48  ;;  %v4751_v56 = vrot.slane %v4735_v48, %v7470_v23 }
0x3207   :  { %4401 = vst.msk [vmem:[#allocation2 + $0x17] sm:$0x1] %vm853_vm2, %v4397_v45  ;;  %v4779_v59 = vcombine.low %v4632_v58, %v4646_v28  ;;  %v6504_v20 = vcombine.high %v4632_v58, %v4646_v28  ;;  %v4787_v31 = vrot.slane %v4777_v30, %v7470_v23  ;;  %v4794_v33 = vrot.slane %v6503_v5, %v7470_v23 }
0x3208   :  { %v4744_v55 = vcombine.high %v4742_v53, %v4742_v53  ;;  %v4758_v58 = vrot.slane %v4742_v53, %v7470_v23 }
0x3209   :  { %v4801_v39 = vrot.slane %v4779_v59, %v7470_v23  ;;  %v4808_v63 = vrot.slane %v6504_v20, %v7470_v23  ;;  %v4809_v60 = vcombine.low %v4787_v31, %v4794_v33 }
0x320a   :  { %v4772_v28 = vrot.slane %v4744_v55, %v7470_v23 }
0x320b   :  { %v4810_v36 = vcombine.low %v4801_v39, %v4808_v63  ;;  %v4817_v7 = vrot.slane %v4809_v60, %v7470_v23 }
0x320c   :  { %v4892_v45 = vcombine.low %v4758_v58, %v4772_v28  ;;  %v6506_v59 = vcombine.high %v4758_v58, %v4772_v28  ;;  %v4776_v38 = vcombine.high %v4772_v28, %v4772_v28 }
0x320d   :  { %v4824_v49 = vrot.slane %v4810_v36, %v7470_v23 }
0x320e   :  { %v4586_v17 = vld [vmem:[#allocation2 + $0x10] sm:$0xff]  ;;  %v4914_v33 = vrot.slane %v4892_v45, %v7470_v23  ;;  %v4921_v39 = vrot.slane %v6506_v59, %v7470_v23 }
0x320f   :  { %v4825_v40 = vcombine.low %v4817_v7, %v4824_v49  ;;  %v4665_v26 = vcombine.high %v4586_v17, %v4586_v17  ;;  %v4672_v2 = vrot.slane %v4586_v17, %v7470_v23 }
0x3210   :  { %v4923_v60 = vcombine.low %v4914_v33, %v4921_v39 }
0x3211   :  { %6864 = vmatmul.mubr.msk.f32.vlgmr.msra.gmra.mrb[22].mxu0 %vm461_vm1, %v4825_v40  ;;  %v4679_v6 = vrot.slane %v4665_v26, %v7470_v23  ;;  %v4680_v14 = vcombine.high %v4672_v2, %v4672_v2  ;;  %v4688_v41 = vrot.slane %v4672_v2, %v7470_v23 }
0x3212   :  { %6866 = vmatprep.mubr.msk.f32.mxu0 %vm7362_vm0, %v7363_v10  ;;  %v4937_v7 = vrot.slane %v4923_v60, %v7470_v23 }
0x3213   :  { %v4681_v8 = vcombine.high %v4679_v6, %v4679_v6  ;;  %v4695_v12 = vrot.slane %v4679_v6, %v7470_v23  ;;  %v4702_v62 = vrot.slane %v4680_v14, %v7470_v23  ;;  %v4710_v4 = vcombine.high %v4688_v41, %v4688_v41 }
0x3215   :  { %v4709_v25 = vrot.slane %v4681_v8, %v7470_v23  ;;  %v4711_v1 = vcombine.high %v4695_v12, %v4695_v12  ;;  %v4712_v50 = vcombine.high %v4702_v62, %v4702_v62  ;;  %v4827_v9 = vcombine.low %v4702_v62, %v4710_v4 }
0x3217   :  { %v4828_v35 = vcombine.low %v4712_v50, %v4695_v12  ;;  %v4829_v19 = vcombine.low %v4709_v25, %v4711_v1  ;;  %v4843_v43 = vrot.slane %v4827_v9, %v7470_v23  ;;  %v4713_v37 = vcombine.high %v4709_v25, %v4709_v25 }
0x3219   :  { %v4850_v61 = vrot.slane %v4828_v35, %v7470_v23  ;;  %v4857_v15 = vrot.slane %v4829_v19, %v7470_v23 }
0x321b   :  { %v4859_v34 = vcombine.low %v4850_v61, %v4857_v15 }
0x321d   :  { %v4873_v29 = vrot.slane %v4859_v34, %v7470_v23  ;;  %v4939_v34 = vcombine.low %v4751_v56, %v4751_v56 }
0x325b   :  { %v4577_v57 = vpop.permute.xlu0 %4576 }
0x325c   :  { %4582 = vst.msk [vmem:[#allocation2 + $0x8] sm:$0x1] %vm853_vm2, %v4577_v57 }
0x325d   :  { %v4579_v42 = vpop.permute.xlu1 %4578 }
0x325e   :  { %4583 = vst.msk [vmem:[#allocation2 + $0x18] sm:$0x1] %vm853_vm2, %v4579_v42 }
0x3263   :  { %v6501_v46 = vld.sshfl [vmem:[#allocation2 + $0x8] sm:$0x1 pattern:$0x75316420] }
0x3264   :  { %v4664_v51 = vrot.slane %v6501_v46, %v7470_v23 }
0x3265   :  { %v6502_v27 = vld.sshfl [vmem:[#allocation2 + $0x18] sm:$0x1 pattern:$0x75316420] }
0x3266   :  { %v4826_v13 = vcombine.low %v4664_v51, %v4688_v41  ;;  %v4727_v22 = vrot.slane %v6502_v27, %v7470_v23 }
0x3268   :  { %v4836_v0 = vrot.slane %v4826_v13, %v7470_v23  ;;  %v4875_v21 = vcombine.low %v4713_v37, %v4727_v22  ;;  %v4773_v22 = vcombine.high %v4751_v56, %v4751_v56 }
0x326a   :  { %v4858_v18 = vcombine.low %v4836_v0, %v4843_v43  ;;  %v4882_v24 = vrot.slane %v4875_v21, %v7470_v23  ;;  %v4774_v0 = vcombine.high %v4758_v58, %v4758_v58 }
0x326c   :  { %v4866_v11 = vrot.slane %v4858_v18, %v7470_v23  ;;  %v4889_v32 = vrot.slane %v4882_v24, %v7470_v23  ;;  %v4942_v21 = vcombine.low %v4772_v28, %v4774_v0 }
0x326e   :  { %v4874_v52 = vcombine.low %v4866_v11, %v4873_v29  ;;  %v4949_v11 = vrot.slane %v4939_v34, %v7470_v23  ;;  %v4970_v24 = vrot.slane %v4942_v21, %v7470_v23 }
0x3270   :  { %6867 = vmatmul.mubr.msk.f32.gmra.mrb[24].mxu0 %vm461_vm1, %v4874_v52 }
0x3271   :  { %6869 = vmatprep.mubr.msk.f32.mxu0 %vm7362_vm0, %v7363_v10  ;;  %v4765_v10 = vrot.slane %v4743_v44, %v7470_v23  ;;  %v4988_v44 = vcombine.low %v4776_v38, %v4751_v56 }
0x3273   :  { %v4890_v30 = vcombine.low %v4751_v56, %v4765_v10  ;;  %v6505_v5 = vcombine.high %v4751_v56, %v4765_v10  ;;  %v4775_v43 = vcombine.high %v4765_v10, %v4765_v10  ;;  %v4940_v37 = vcombine.low %v4765_v10, %v4773_v22 }
0x3274   :  { %6870 = vmatmul.mubr.msk.f32.gmra.mrb[26].mxu0 %vm461_vm1, %v4889_v32 }
0x3275   :  { %v4900_v20 = vrot.slane %v4890_v30, %v7470_v23  ;;  %v4907_v31 = vrot.slane %v6505_v5, %v7470_v23  ;;  %v4941_v18 = vcombine.low %v4775_v43, %v4758_v58  ;;  %v4956_v29 = vrot.slane %v4940_v37, %v7470_v23 }
0x3276   :  { %v4995_v58 = vrot.slane %v4988_v44, %v7470_v23 }
0x3277   :  { %v4922_v63 = vcombine.low %v4900_v20, %v4907_v31  ;;  %v4963_v52 = vrot.slane %v4941_v18, %v7470_v23  ;;  %v4971_v32 = vcombine.low %v4949_v11, %v4956_v29 }
0x3278   :  { %v5002_v45 = vrot.slane %v4995_v58, %v7470_v23 }
0x3279   :  { %v4930_v36 = vrot.slane %v4922_v63, %v7470_v23  ;;  %v4972_v54 = vcombine.low %v4963_v52, %v4970_v24  ;;  %v4979_v48 = vrot.slane %v4971_v32, %v7470_v23 }
0x327b   :  { %v4938_v49 = vcombine.low %v4930_v36, %v4937_v7  ;;  %v4986_v53 = vrot.slane %v4972_v54, %v7470_v23 }
0x327d   :  { %v4987_v55 = vcombine.low %v4979_v48, %v4986_v53 }
0x32e4   :  { %v5078_v40 = vpop.f32.mrb[22].mxu0 }
0x32e5   :  { %v5079_v17 = vadd.f32 %v5078_v40, %v4938_v49  ;;  %v6865_v26 = vpop.f32.mrb[23].mxu0 }
0x32e7   :  { %v5095_v2 = vcombine.high %v5079_v17, %v5079_v17  ;;  %v5102_v6 = vrot.slane %v5079_v17, %v7470_v23 }
0x32e9   :  { %v5109_v14 = vrot.slane %v5095_v2, %v7470_v23  ;;  %v5110_v8 = vcombine.high %v5102_v6, %v5102_v6  ;;  %v8520_v62 = vrot.slane %v5102_v6, %v7470_v23 }
0x32eb   :  { %v5111_v12 = vcombine.high %v5109_v14, %v5109_v14  ;;  %v8523_v57 = vrot.slane %v5110_v8, %v7470_v23  ;;  %v8526_v41 = vrot.slane %v5109_v14, %v7470_v23 }
0x32ed   :  { %v8529_v25 = vrot.slane %v5111_v12, %v7470_v23  ;;  %v5233_v1 = vcombine.low %v8520_v62, %v8523_v57  ;;  %v6510_v50 = vcombine.high %v8520_v62, %v8523_v57 }
0x32ef   :  { %v5235_v42 = vcombine.low %v8526_v41, %v8529_v25  ;;  %v6511_v4 = vcombine.high %v8526_v41, %v8529_v25  ;;  %v5243_v35 = vrot.slane %v5233_v1, %v7470_v23  ;;  %v5250_v19 = vrot.slane %v6510_v50, %v7470_v23 }
0x32f1   :  { %v5257_v46 = vrot.slane %v5235_v42, %v7470_v23  ;;  %v5264_v51 = vrot.slane %v6511_v4, %v7470_v23  ;;  %v5265_v9 = vcombine.low %v5243_v35, %v5250_v19 }
0x32f3   :  { %v5266_v61 = vcombine.low %v5257_v46, %v5264_v51  ;;  %v5273_v15 = vrot.slane %v5265_v9, %v7470_v23 }
0x32f5   :  { %v5280_v13 = vrot.slane %v5266_v61, %v7470_v23 }
0x32f7   :  { %v5281_v27 = vcombine.low %v5273_v15, %v5280_v13 }
0x32f9   :  { %5364 = vst.msk [vmem:[%s8984_s9] sm:$0xff] %vm5363_vm3, %v5281_v27  ;;  %v5369_v35 = vsel %vm5363_vm3, %v5281_v27, -inf }
0x3343   :  { %v5083_v10 = vpop.f32.mrb[24].mxu0 }
0x3344   :  { %v5084_v30 = vadd.f32 %v5083_v10, %v4987_v55  ;;  %v6868_v5 = vpop.f32.mrb[25].mxu0 }
0x3346   :  { %v5144_v59 = vcombine.high %v5084_v30, %v5084_v30  ;;  %v5151_v20 = vrot.slane %v5084_v30, %v7470_v23 }
0x3347   :  { %v5088_v31 = vpop.f32.mrb[26].mxu0 }
0x3348   :  { %v5158_v33 = vrot.slane %v5144_v59, %v7470_v23  ;;  %v5159_v28 = vcombine.high %v5151_v20, %v5151_v20  ;;  %v8560_v39 = vrot.slane %v5151_v20, %v7470_v23  ;;  %v5089_v63 = vadd.f32 %v5088_v31, %v5002_v45  ;;  %v6871_v56 = vpop.f32.mrb[27].mxu0 }
0x3349   :  { %v5140_v20 = vcombine.high %v8520_v62, %v8520_v62 }
0x334a   :  { %v5160_v60 = vcombine.high %v5158_v33, %v5158_v33  ;;  %v8563_v36 = vrot.slane %v5158_v33, %v7470_v23  ;;  %v8566_v7 = vrot.slane %v5159_v28, %v7470_v23  ;;  %v8570_v49 = vcombine.high %v8560_v39, %v8560_v39 }
0x334b   :  { %v5288_v40 = vrot.slane %v8560_v39, %v7470_v23  ;;  %v5199_v17 = vrot.slane %v5089_v63, %v7470_v23 }
0x334c   :  { %v8576_v26 = vrot.slane %v5160_v60, %v7470_v23  ;;  %v8580_v2 = vcombine.high %v8563_v36, %v8563_v36  ;;  %v8584_v6 = vcombine.high %v8566_v7, %v8566_v7  ;;  %v5296_v14 = vcombine.low %v8566_v7, %v8570_v49 }
0x334d   :  { %v5295_v8 = vrot.slane %v5288_v40, %v7470_v23  ;;  %v5200_v12 = vcombine.high %v5199_v17, %v5199_v17  ;;  %v8598_v4 = vrot.slane %v5199_v17, %v7470_v23  ;;  %v5142_v17 = vcombine.high %v8523_v57, %v8523_v57 }
0x334e   :  { %v5297_v1 = vcombine.low %v8584_v6, %v8563_v36  ;;  %v5298_v50 = vcombine.low %v8576_v26, %v8580_v2  ;;  %v8595_v42 = vcombine.high %v8576_v26, %v8576_v26  ;;  %v5306_v51 = vrot.slane %v5296_v14, %v7470_v23 }
0x334f   :  { %5366 = vst.msk [vmem:[%s8984_s9 + $0x8] sm:$0x1] %vm5365_vm4, %v5295_v8  ;;  %v5370_v19 = vsel %vm5365_vm4, %v5295_v8, -inf  ;;  %v8607_v46 = vrot.slane %v5200_v12, %v7470_v23 }
0x3350   :  { %v5313_v9 = vrot.slane %v5297_v1, %v7470_v23  ;;  %v5371_v61 = vmax.f32 %v5369_v35, %v5370_v19  ;;  %v5299_v15 = vcombine.low %v8595_v42, %v8598_v4  ;;  %v5320_v27 = vrot.slane %v5298_v50, %v7470_v23 }
0x3351   :  { %v5351_v13 = vrot.slane %v8607_v46, %v7470_v23 }
0x3352   :  { %v5328_v22 = vcombine.low %v5306_v51, %v5313_v9  ;;  %v5372_v0 = vrot.slane %v5371_v61, 4  ;;  %v5327_v43 = vrot.slane %v5299_v15, %v7470_v23 }
0x3353   :  { %v5358_v34 = vrot.slane %v5351_v13, %v7470_v23  ;;  %v5141_v13 = vcombine.high %v8526_v41, %v8526_v41 }
0x3354   :  { %v5373_v37 = vmax.f32 %v5371_v61, %v5372_v0  ;;  %v5329_v18 = vcombine.low %v5320_v27, %v5327_v43  ;;  %v5336_v11 = vrot.slane %v5328_v22, %v7470_v23 }
0x3355   :  { %5368 = vst.msk [vmem:[%s8984_s9 + $0x18] sm:$0x1] %vm5365_vm4, %v5358_v34  ;;  %v5379_v38 = vsel %vm5365_vm4, %v5358_v34, -inf }
0x3356   :  { %v5374_v21 = vrot.slane %v5373_v37, 2  ;;  %v5343_v29 = vrot.slane %v5329_v18, %v7470_v23 }
0x3358   :  { %v5375_v52 = vmax.f32 %v5373_v37, %v5374_v21  ;;  %v5344_v24 = vcombine.low %v5336_v11, %v5343_v29 }
0x335a   :  { %v5376_v32 = vrot.slane %v5375_v52, 1  ;;  %5367 = vst.msk [vmem:[%s8984_s9 + $0x10] sm:$0xff] %vm5363_vm3, %v5344_v24  ;;  %v5378_v54 = vsel %vm5363_vm3, %v5344_v24, -inf  ;;  %s7367_s9 = smov [#allocation3]  }
0x335b   :  { %v5380_v48 = vmax.f32 %v5378_v54, %v5379_v38  ;;  %s6418_s24 = sshll.u32 %s7367_s9, 4  ;;  %s6419_s24 = int_to_ptr.vmem [resolvable:$true] %s6418_s24 }
0x335c   :  { %v5377_v53 = vmax.f32 %v5375_v52, %v5376_v32  ;;  %s7337_s25 = scalar_lea.vmem %s6419_s24, 32  ;;  %p7342_p1 = scmp.lt.s32.totalorder %s6419_s24, %s6419_s24 }
0x335d   :  { %v5381_v44 = vrot.slane %v5380_v48, 4  ;;  %p7338_p0 = scmp.ne.s32.totalorder %s6419_s24, %s7337_s25  ;;  %p7343_p2 = scmp.lt.s32.totalorder %s7337_s25, %s7337_s25 }
0x335e   :  { %v5389_v55 = vcombine.high %v5377_v53, %v5377_v53  ;;  %v5396_v58 = vrot.slane %v5377_v53, %v7470_v23 }
0x335f   :  { %v5382_v10 = vmax.f32 %v5380_v48, %v5381_v44  ;;  %p7344_p3 = por %p7343_p2, %p7342_p1 }
0x3360   :  { %v5403_v30 = vrot.slane %v5389_v55, %v7470_v23  ;;  %v5404_v5 = vcombine.high %v5396_v58, %v5396_v58  ;;  %v5412_v45 = vrot.slane %v5396_v58, %v7470_v23 }
0x3361   :  { %v5383_v59 = vrot.slane %v5382_v10, 2  ;;  %p7345_p4 = pnand %p7344_p3, %p7338_p0 }
0x3362   :  { %v5405_v31 = vcombine.high %v5403_v30, %v5403_v30  ;;  %v5426_v33 = vrot.slane %v5404_v5, %v7470_v23  ;;  %v5434_v28 = vcombine.high %v5412_v45, %v5412_v45  ;;  %v5419_v63 = vrot.slane %v5403_v30, %v7470_v23 }
0x3363   :  { %v5503_v56 = vsub.f32 %v8520_v62, %v5412_v45  ;;  %v5511_v60 = vsub.f32 %v8560_v39, %v5412_v45  ;;  %v5384_v40 = vmax.f32 %v5382_v10, %v5383_v59 }
0x3364   :  { %v5436_v14 = vcombine.high %v5426_v33, %v5426_v33  ;;  %v5504_v8 = vsub.f32 %v8523_v57, %v5426_v33  ;;  %v5433_v12 = vrot.slane %v5405_v31, %v7470_v23  ;;  %v5505_v1 = vsub.f32 %v5140_v20, %v5434_v28 }
0x3365   :  { %v5521_v50 = vmul.f32 1.442695, %v5503_v56  ;;  %v5385_v51 = vrot.slane %v5384_v40, 1  ;;  %v5435_v9 = vcombine.high %v5419_v63, %v5419_v63  ;;  %v5507_v61 = vsub.f32 %v8526_v41, %v5419_v63 }
0x3366   :  { %v5506_v35 = vsub.f32 %v5142_v17, %v5436_v14  ;;  %v5523_v19 = vmul.f32 1.442695, %v5504_v8  ;;  %v5525_v62 = vmul.f32 1.442695, %v5505_v1  ;;  %v5537_v22 = vmul.f32 1.442695, %v5511_v60 }
0x3367   :  { %v5386_v39 = vmax.f32 %v5384_v40, %v5385_v51  ;;  %7297 = vpow2.f32 %v5521_v50  ;;  %v5508_v57 = vsub.f32 %v8529_v25, %v5433_v12  ;;  %v5509_v43 = vsub.f32 %v5141_v13, %v5435_v9 }
0x3368   :  { %v5527_v15 = vmul.f32 1.442695, %v5506_v35  ;;  %7299 = vpow2.f32 %v5523_v19  ;;  %v5529_v34 = vmul.f32 1.442695, %v5507_v61  ;;  %v5437_v11 = vcombine.high %v5433_v12, %v5433_v12 }
0x3369   :  { %v5438_v0 = vcombine.high %v5386_v39, %v5386_v39  ;;  %v5445_v27 = vrot.slane %v5386_v39, %v7470_v23  ;;  %7301 = vpow2.f32 %v5525_v62  ;;  %v5531_v41 = vmul.f32 1.442695, %v5508_v57 }
0x336a   :  { %7303 = vpow2.f32 %v5527_v15  ;;  %v5533_v48 = vmul.f32 1.442695, %v5509_v43  ;;  %v5143_v31 = vcombine.high %v8529_v25, %v8529_v25 }
0x336b   :  { %v5452_v37 = vrot.slane %v5438_v0, %v7470_v23  ;;  %v5453_v18 = vcombine.high %v5445_v27, %v5445_v27  ;;  %v5461_v21 = vrot.slane %v5445_v27, %v7470_v23  ;;  %7305 = vpow2.f32 %v5537_v22 }
0x336c   :  { %7307 = vpow2.f32 %v5529_v34 }
0x336d   :  { %v5454_v29 = vcombine.high %v5452_v37, %v5452_v37  ;;  %v5468_v52 = vrot.slane %v5452_v37, %v7470_v23  ;;  %v5475_v24 = vrot.slane %v5453_v18, %v7470_v23  ;;  %v5483_v32 = vcombine.high %v5461_v21, %v5461_v21 }
0x336e   :  { %v5512_v54 = vsub.f32 %v8566_v7, %v5461_v21  ;;  %v5520_v38 = vsub.f32 %v8607_v46, %v5461_v21  ;;  %7309 = vpow2.f32 %v5531_v41 }
0x336f   :  { %v5482_v53 = vrot.slane %v5454_v29, %v7470_v23  ;;  %v5484_v44 = vcombine.high %v5468_v52, %v5468_v52  ;;  %v5485_v55 = vcombine.high %v5475_v24, %v5475_v24  ;;  %v5513_v58 = vsub.f32 %v8570_v49, %v5475_v24 }
0x3370   :  { %v5514_v10 = vsub.f32 %v8584_v6, %v5483_v32  ;;  %v5516_v30 = vsub.f32 %v8576_v26, %v5468_v52  ;;  %v5539_v5 = vmul.f32 1.442695, %v5512_v54  ;;  %7311 = vpow2.f32 %v5533_v48 }
0x3371   :  { %v5486_v45 = vcombine.high %v5482_v53, %v5482_v53  ;;  %v5515_v59 = vsub.f32 %v8563_v36, %v5485_v55  ;;  %v5517_v7 = vsub.f32 %v8580_v2, %v5482_v53  ;;  %v5518_v46 = vsub.f32 %v8595_v42, %v5484_v44  ;;  %v8661_v20 = vpop.eup %7297 }
0x3372   :  { %v5541_v33 = vmul.f32 1.442695, %v5513_v58  ;;  %v5543_v49 = vmul.f32 1.442695, %v5514_v10  ;;  %v8665_v6 = vpop.eup %7299  ;;  %7313 = vpow2.f32 %v5539_v5  ;;  %v5547_v63 = vmul.f32 1.442695, %v5516_v30 }
0x3373   :  { %v5519_v26 = vsub.f32 %v8598_v4, %v5486_v45  ;;  %v5545_v28 = vmul.f32 1.442695, %v5515_v59  ;;  %v8668_v36 = vpop.eup %7301  ;;  %v5549_v2 = vmul.f32 1.442695, %v5517_v7  ;;  %v5510_v42 = vsub.f32 %v5143_v31, %v5437_v11 }
0x3374   :  { %7315 = vpow2.f32 %v5541_v33  ;;  %v8670_v56 = vpop.eup %7303  ;;  %v5551_v60 = vmul.f32 1.442695, %v5518_v46  ;;  %v5555_v17 = vmul.f32 1.442695, %v5520_v38  ;;  %v5575_v39 = vcombine.low %v8661_v20, %v8665_v6 }
0x3375   :  { %7317 = vpow2.f32 %v5543_v49  ;;  %v8672_v25 = vpop.eup %7305  ;;  %v5553_v40 = vmul.f32 1.442695, %v5519_v26  ;;  %v5535_v4 = vmul.f32 1.442695, %v5510_v42  ;;  %v5576_v61 = vcombine.low %v8668_v36, %v8670_v56 }
0x3376   :  { %7319 = vpow2.f32 %v5545_v28  ;;  %v8674_v14 = vpop.eup %7307  ;;  %v5585_v41 = vrot.slane %v5575_v39, %v7470_v23  ;;  %v5630_v54 = vrot.slane %v8672_v25, %v7470_v23 }
0x3377   :  { %7321 = vpow2.f32 %v5547_v63  ;;  %v5592_v34 = vrot.slane %v5576_v61, %v7470_v23 }
0x3378   :  { %7323 = vpow2.f32 %v5549_v2  ;;  %v8676_v8 = vpop.eup %7309  ;;  %v5637_v45 = vrot.slane %v5630_v54, %v7470_v23 }
0x3379   :  { %7325 = vpow2.f32 %v5551_v60  ;;  %v5577_v21 = vcombine.low %v8674_v14, %v8676_v8  ;;  %v5607_v38 = vcombine.low %v5585_v41, %v5592_v34 }
0x337a   :  { %7327 = vpow2.f32 %v5553_v40  ;;  %v8678_v12 = vpop.eup %7311  ;;  %v5706_v26 = vsel %vm5365_vm4, %v5637_v45, 0.0 }
0x337b   :  { %7329 = vpow2.f32 %v5555_v17  ;;  %v5599_v53 = vrot.slane %v5577_v21, %v7470_v23  ;;  %v5615_v5 = vrot.slane %v5607_v38, %v7470_v23 }
0x337c   :  { %7331 = vpow2.f32 %v5535_v4  ;;  %v8680_v1 = vpop.eup %7313 }
0x337e   :  { %v8682_v50 = vpop.eup %7315 }
0x337f   :  { %v8684_v35 = vpop.eup %7317  ;;  %v5638_v19 = vcombine.low %v8680_v1, %v8682_v50 }
0x3380   :  { %v8688_v51 = vpop.eup %7319 }
0x3381   :  { %v8690_v9 = vpop.eup %7321  ;;  %v5639_v62 = vcombine.low %v8684_v35, %v8688_v51  ;;  %v5648_v57 = vrot.slane %v5638_v19, %v7470_v23 }
0x3382   :  { %v8696_v15 = vpop.eup %7323 }
0x3383   :  { %v8700_v13 = vpop.eup %7325  ;;  %v5640_v22 = vcombine.low %v8690_v9, %v8696_v15  ;;  %v5655_v0 = vrot.slane %v5639_v62, %v7470_v23 }
0x3384   :  { %v8706_v27 = vpop.eup %7327 }
0x3385   :  { %v7330_v43 = vpop.eup %7329  ;;  %v5641_v37 = vcombine.low %v8700_v13, %v8706_v27  ;;  %v5670_v18 = vcombine.low %v5648_v57, %v5655_v0  ;;  %v5662_v29 = vrot.slane %v5640_v22, %v7470_v23 }
0x3386   :  { %v8713_v11 = vpop.eup %7331  ;;  %v5693_v24 = vrot.slane %v7330_v43, %v7470_v23 }
0x3387   :  { %v5669_v52 = vrot.slane %v5641_v37, %v7470_v23  ;;  %v5578_v32 = vcombine.low %v8678_v12, %v8713_v11  ;;  %v5678_v55 = vrot.slane %v5670_v18, %v7470_v23 }
0x3388   :  { %v5700_v10 = vrot.slane %v5693_v24, %v7470_v23 }
0x3389   :  { %v5671_v48 = vcombine.low %v5662_v29, %v5669_v52  ;;  %v5606_v44 = vrot.slane %v5578_v32, %v7470_v23 }
0x338a   :  { %v5715_v31 = vsel %vm5365_vm4, %v5700_v10, 0.0 }
0x338b   :  { %v5685_v58 = vrot.slane %v5671_v48, %v7470_v23  ;;  %v5608_v30 = vcombine.low %v5599_v53, %v5606_v44 }
0x338d   :  { %v5686_v59 = vcombine.low %v5678_v55, %v5685_v58  ;;  %v5622_v7 = vrot.slane %v5608_v30, %v7470_v23 }
0x338f   :  { %v5714_v46 = vsel %vm5363_vm3, %v5686_v59, 0.0  ;;  %v5623_v33 = vcombine.low %v5615_v5, %v5622_v7 }
0x3390   :  { %v5716_v49 = vadd.f32 %v5715_v31, %v5714_v46 }
0x3391   :  { %v5705_v28 = vsel %vm5363_vm3, %v5623_v33, 0.0 }
0x3392   :  { %v5717_v63 = vrot.slane %v5716_v49, 4  ;;  %v5707_v2 = vadd.f32 %v5706_v26, %v5705_v28 }
0x3394   :  { %v5718_v42 = vadd.f32 %v5717_v63, %v5716_v49  ;;  %v5708_v60 = vrot.slane %v5707_v2, 4 }
0x3396   :  { %v5719_v40 = vrot.slane %v5718_v42, 2  ;;  %v5709_v17 = vadd.f32 %v5708_v60, %v5707_v2 }
0x3398   :  { %v5710_v4 = vrot.slane %v5709_v17, 2  ;;  %v5720_v19 = vadd.f32 %v5719_v40, %v5718_v42 }
0x339a   :  { %v5711_v61 = vadd.f32 %v5710_v4, %v5709_v17  ;;  %v5721_v62 = vrot.slane %v5720_v19, 1 }
0x339c   :  { %v5712_v39 = vrot.slane %v5711_v61, 1  ;;  %v5722_v22 = vadd.f32 %v5721_v62, %v5720_v19 }
0x339e   :  { %v5713_v57 = vadd.f32 %v5712_v39, %v5711_v61  ;;  %7333 = vrcp.f32 %v5722_v22 }
0x33a0   :  { %7335 = vrcp.f32 %v5713_v57 }
0x33a8   :  { %v7334_v0 = vpop.eup %7333 }
0x33a9   :  { %v5783_v34 = vrot.slane %v7334_v0, %v7470_v23  ;;  %v5776_v37 = vcombine.high %v7334_v0, %v7334_v0 }
0x33aa   :  { %v7336_v18 = vpop.eup %7335 }
0x33ab   :  { %v5727_v21 = vcombine.high %v7336_v18, %v7336_v18  ;;  %v5734_v41 = vrot.slane %v7336_v18, %v7470_v23  ;;  %v5799_v29 = vrot.slane %v5783_v34, %v7470_v23  ;;  %v5791_v52 = vcombine.high %v5783_v34, %v5783_v34 }
0x33ac   :  { %v5790_v24 = vrot.slane %v5776_v37, %v7470_v23 }
0x33ad   :  { %v5741_v32 = vrot.slane %v5727_v21, %v7470_v23  ;;  %v5742_v54 = vcombine.high %v5734_v41, %v5734_v41  ;;  %v5750_v38 = vrot.slane %v5734_v41, %v7470_v23  ;;  %v8741_v48 = vmul.f32 %v7330_v43, %v5799_v29 }
0x33ae   :  { %v5792_v53 = vcombine.high %v5790_v24, %v5790_v24  ;;  %v5806_v45 = vrot.slane %v5790_v24, %v7470_v23  ;;  %v5813_v59 = vrot.slane %v5791_v52, %v7470_v23 }
0x33af   :  { %v5743_v44 = vcombine.high %v5741_v32, %v5741_v32  ;;  %v5757_v55 = vrot.slane %v5741_v32, %v7470_v23  ;;  %v5764_v58 = vrot.slane %v5742_v54, %v7470_v23  ;;  %v5772_v10 = vcombine.high %v5750_v38, %v5750_v38 }
0x33b0   :  { %v8746_v30 = vmul.f32 %v8661_v20, %v5750_v38  ;;  %v8749_v5 = vmul.f32 %v8672_v25, %v5750_v38  ;;  %v5820_v25 = vrot.slane %v5792_v53, %v7470_v23  ;;  %v5822_v2 = vcombine.high %v5806_v45, %v5806_v45 }
0x33b1   :  { %v5771_v43 = vrot.slane %v5743_v44, %v7470_v23  ;;  %v5773_v7 = vcombine.high %v5757_v55, %v5757_v55  ;;  %v5774_v46 = vcombine.high %v5764_v58, %v5764_v58  ;;  %v8755_v31 = vmul.f32 %v8665_v6, %v5764_v58 }
0x33b2   :  { %v8758_v33 = vmul.f32 %v8668_v36, %v5772_v10  ;;  %v8761_v20 = vmul.f32 %v8674_v14, %v5757_v55  ;;  %v5821_v36 = vcombine.high %v5799_v29, %v5799_v29  ;;  %v5823_v60 = vcombine.high %v5813_v59, %v5813_v59 }
0x33b3   :  { %v5775_v49 = vcombine.high %v5771_v43, %v5771_v43  ;;  %v8765_v26 = vmul.f32 %v8670_v56, %v5774_v46  ;;  %v8768_v28 = vmul.f32 %v8676_v8, %v5771_v43  ;;  %v8771_v63 = vmul.f32 %v8678_v12, %v5773_v7 }
0x33b4   :  { %v5877_v6 = vcombine.low %v8746_v30, %v8755_v31  ;;  %v5824_v40 = vcombine.high %v5820_v25, %v5820_v25  ;;  %v8784_v12 = vmul.f32 %v8680_v1, %v5799_v29  ;;  %v8791_v19 = vmul.f32 %v8682_v50, %v5813_v59 }
0x33b5   :  { %v8776_v14 = vmul.f32 %v8713_v11, %v5775_v49  ;;  %v5878_v42 = vcombine.low %v8758_v33, %v8765_v26  ;;  %v5879_v56 = vcombine.low %v8761_v20, %v8768_v28  ;;  %v8794_v61 = vmul.f32 %v8684_v35, %v5821_v36 }
0x33b6   :  { %v5887_v8 = vrot.slane %v5877_v6, %v7470_v23  ;;  %v8797_v62 = vmul.f32 %v8688_v51, %v5823_v60  ;;  %v8800_v39 = vmul.f32 %v8690_v9, %v5806_v45  ;;  %v8803_v1 = vmul.f32 %v8696_v15, %v5820_v25 }
0x33b7   :  { %v5880_v17 = vcombine.low %v8771_v63, %v8776_v14  ;;  %v5894_v4 = vrot.slane %v5878_v42, %v7470_v23  ;;  %v5901_v11 = vrot.slane %v5879_v56, %v7470_v23  ;;  %v8807_v0 = vmul.f32 %v8700_v13, %v5822_v2 }
0x33b8   :  { %v8810_v50 = vmul.f32 %v8706_v27, %v5824_v40  ;;  %v5940_v35 = vcombine.low %v8784_v12, %v8791_v19  ;;  %v5941_v51 = vcombine.low %v8794_v61, %v8797_v62  ;;  %v5942_v9 = vcombine.low %v8800_v39, %v8803_v1 }
0x33b9   :  { %v5908_v22 = vrot.slane %v5880_v17, %v7470_v23  ;;  %v5909_v57 = vcombine.low %v5887_v8, %v5894_v4  ;;  %v5932_v13 = vrot.slane %v8749_v5, %v7470_v23  ;;  %v5995_v54 = vrot.slane %v8741_v48, %v7470_v23 }
0x33ba   :  { %v5943_v34 = vcombine.low %v8807_v0, %v8810_v50  ;;  %v5950_v37 = vrot.slane %v5940_v35, %v7470_v23  ;;  %v5957_v27 = vrot.slane %v5941_v51, %v7470_v23  ;;  %v5964_v41 = vrot.slane %v5942_v9, %v7470_v23 }
0x33bb   :  { %v5910_v15 = vcombine.low %v5901_v11, %v5908_v22  ;;  %v5917_v18 = vrot.slane %v5909_v57, %v7470_v23  ;;  %v5939_v53 = vrot.slane %v5932_v13, %v7470_v23  ;;  %v6002_v45 = vrot.slane %v5995_v54, %v7470_v23 }
0x33bc   :  { %v5971_v29 = vrot.slane %v5943_v34, %v7470_v23  ;;  %v5972_v52 = vcombine.low %v5950_v37, %v5957_v27  ;;  %v8839_v7 = vand.u32 127, %v61_v3  ;;  %v6031_v60 = vsub.s32 1, %v7457_v16 }
0x33bd   :  { %v5924_v21 = vrot.slane %v5910_v15, %v7470_v23  ;;  %v6010_v10 = vsel %vm5365_vm4, %v5939_v53, -inf  ;;  %v6016_v43 = vsel %vm5365_vm4, %v6002_v45, -inf  ;;  %v6035_v8 = vsub.s32 2, %v7457_v16 }
0x33be   :  { %v5973_v32 = vcombine.low %v5964_v41, %v5971_v29  ;;  %v5980_v44 = vrot.slane %v5972_v52, %v7470_v23  ;;  %v6133_v46 = vcombine.high %v8839_v7, %v8839_v7  ;;  %v6140_v25 = vrot.slane %v8839_v7, %v7470_v23 }
0x33bf   :  { %v5925_v24 = vcombine.low %v5917_v18, %v5924_v21  ;;  %v6039_v40 = vsub.s32 3, %v7457_v16  ;;  %v6043_v17 = vsub.s32 4, %v7457_v16  ;;  %v6047_v4 = vsub.s32 5, %v7457_v16 }
0x33c0   :  { %v5987_v55 = vrot.slane %v5973_v32, %v7470_v23  ;;  %v6147_v49 = vrot.slane %v6133_v46, %v7470_v23  ;;  %v6148_v6 = vcombine.high %v6140_v25, %v6140_v25  ;;  %v8847_v2 = vrot.slane %v6140_v25, %v7470_v23 }
0x33c1   :  { %v6007_v38 = vsel %vm5363_vm3, %v5925_v24, -inf  ;;  %v6051_v11 = vsub.s32 6, %v7457_v16  ;;  %v6055_v22 = vsub.s32 7, %v7457_v16 }
0x33c2   :  { %6008 = vmax.xlane.f32.xlu0 %v6007_v38  ;;  %v5988_v58 = vcombine.low %v5980_v44, %v5987_v55  ;;  %v6149_v36 = vcombine.high %v6147_v49, %v6147_v49  ;;  %v8850_v42 = vrot.slane %v6147_v49, %v7470_v23  ;;  %v8853_v56 = vrot.slane %v6148_v6, %v7470_v23 }
0x33c3   :  { %v8867_v35 = vcombine.high %v8847_v2, %v8847_v2 }
0x33c4   :  { %v6013_v59 = vsel %vm5363_vm3, %v5988_v58, -inf  ;;  %v8856_v3 = vrot.slane %v6149_v36, %v7470_v23  ;;  %v8871_v51 = vcombine.high %v8850_v42, %v8850_v42  ;;  %v8875_v9 = vcombine.high %v8853_v56, %v8853_v56 }
0x33c5   :  { %6014 = vmax.xlane.f32.xlu1 %v6013_v59 }
0x33c6   :  { %6011 = vmax.xlane.f32.xlu0 %v6010_v10  ;;  %v8879_v15 = vcombine.high %v8856_v3, %v8856_v3 }
0x33ca   :  { %6017 = vmax.xlane.f32.xlu0 %v6016_v43 }
0x344f   :  { %v6009_v57 = vpop.xlane.xlu0 %6008 }
0x3450   :  { %v6028_v34 = vrot.slane %v6009_v57, %v7873_v47  ;;  %v6032_v13 = vrot.slane %v6009_v57, %v6031_v60  ;;  %v6036_v37 = vrot.slane %v6009_v57, %v6035_v8  ;;  %v6040_v27 = vrot.slane %v6009_v57, %v6039_v40 }
0x3451   :  { %v6044_v18 = vrot.slane %v6009_v57, %v6043_v17  ;;  %v6048_v21 = vrot.slane %v6009_v57, %v6047_v4  ;;  %v6052_v41 = vrot.slane %v6009_v57, %v6051_v11  ;;  %v6056_v29 = vrot.slane %v6009_v57, %v6055_v22 }
0x3452   :  { %vm8885_vm5 = vcmp.ge.f32.partialorder %v8746_v30, %v6028_v34  ;;  %vm6116_vm6 = vcmp.ge.f32.partialorder %v8755_v31, %v6032_v13  ;;  %vm6117_vm7 = vcmp.ge.f32.partialorder %v8758_v33, %v6036_v37  ;;  %vm6118_vm8 = vcmp.ge.f32.partialorder %v8765_v26, %v6040_v27  ;;  %v6015_v32 = vpop.xlane.xlu1 %6014 }
0x3453   :  { %v6012_v24 = vpop.xlane.xlu0 %6011  ;;  %vm6119_vm9 = vcmp.ge.f32.partialorder %v8761_v20, %v6044_v18  ;;  %vm6120_vm10 = vcmp.ge.f32.partialorder %v8768_v28, %v6048_v21  ;;  %vm6121_vm11 = vcmp.ge.f32.partialorder %v8771_v63, %v6052_v41  ;;  %vm6122_vm12 = vcmp.ge.f32.partialorder %v8776_v14, %v6056_v29 }
0x3454   :  { %v6060_v30 = vrot.slane %v6012_v24, %v7873_v47  ;;  %v6182_v31 = vsel %vm8885_vm5, %v8847_v2, 64  ;;  %v6183_v33 = vsel %vm6116_vm6, %v8853_v56, 64  ;;  %v6184_v26 = vsel %vm6117_vm7, %v8867_v35, 64 }
0x3455   :  { %v6185_v54 = vsel %vm6118_vm8, %v8875_v9, 64  ;;  %v6186_v20 = vsel %vm6119_vm9, %v8850_v42, 64  ;;  %v6187_v28 = vsel %vm6120_vm10, %v8856_v3, 64  ;;  %v6188_v63 = vsel %vm6121_vm11, %v8871_v51, 64 }
0x3456   :  { %vm6123_vm13 = vcmp.ge.f32.partialorder %v8749_v5, %v6060_v30  ;;  %v6189_v14 = vsel %vm6122_vm12, %v8879_v15, 64  ;;  %v6200_v38 = vcombine.low %v6182_v31, %v6183_v33  ;;  %v6201_v53 = vcombine.low %v6184_v26, %v6185_v54 }
0x3457   :  { %v6190_v44 = vsel %vm6123_vm13, %v8847_v2, 64  ;;  %v6018_v55 = vpop.xlane.xlu0 %6017  ;;  %v6202_v58 = vcombine.low %v6186_v20, %v6187_v28  ;;  %v6203_v10 = vcombine.low %v6188_v63, %v6189_v14  ;;  %v6064_v45 = vrot.slane %v6015_v32, %v7873_v47 }
0x3458   :  { %v6255_v59 = vrot.slane %v6190_v44, %v7470_v23  ;;  %v6096_v43 = vrot.slane %v6018_v55, %v7873_v47  ;;  %v6210_v46 = vrot.slane %v6200_v38, %v7470_v23  ;;  %v6217_v25 = vrot.slane %v6201_v53, %v7470_v23 }
0x3459   :  { %v6224_v5 = vrot.slane %v6202_v58, %v7470_v23  ;;  %v6231_v49 = vrot.slane %v6203_v10, %v7470_v23  ;;  %v6068_v6 = vrot.slane %v6015_v32, %v6031_v60  ;;  %v6072_v36 = vrot.slane %v6015_v32, %v6035_v8 }
0x345a   :  { %v6262_v57 = vrot.slane %v6255_v59, %v7470_v23  ;;  %vm6132_vm14 = vcmp.ge.f32.partialorder %v8741_v48, %v6096_v43  ;;  %v6232_v34 = vcombine.low %v6210_v46, %v6217_v25  ;;  %v6076_v13 = vrot.slane %v6015_v32, %v6039_v40 }
0x345b   :  { %v6199_v37 = vsel %vm6132_vm14, %v8847_v2, 64  ;;  %v6233_v27 = vcombine.low %v6224_v5, %v6231_v49  ;;  %v6080_v47 = vrot.slane %v6015_v32, %v6043_v17  ;;  %v6084_v18 = vrot.slane %v6015_v32, %v6047_v4 }
0x345c   :  { %v6318_v21 = vrot.slane %v6199_v37, %v7470_v23  ;;  %v6341_v41 = vsel %vm5365_vm4, %v6262_v57, 2147483647  ;;  %v6240_v29 = vrot.slane %v6232_v34, %v7470_v23  ;;  %v6088_v52 = vrot.slane %v6015_v32, %v6051_v11 }
0x345d   :  { %v6343_v60 = vshra.s32 %v6341_v41, 16  ;;  %v6247_v8 = vrot.slane %v6233_v27, %v7470_v23  ;;  %v6092_v48 = vrot.slane %v6015_v32, %v6055_v22  ;;  %vm8926_vm15 = vcmp.ge.f32.partialorder %v8784_v12, %v6064_v45 }
0x345e   :  { %v6325_v17 = vrot.slane %v6318_v21, %v7470_v23  ;;  %vm6125_vm0 = vcmp.ge.f32.partialorder %v8791_v19, %v6068_v6  ;;  %vm6126_vm1 = vcmp.ge.f32.partialorder %v8794_v61, %v6072_v36  ;;  %vm6127_vm2 = vcmp.ge.f32.partialorder %v8797_v62, %v6076_v13 }
0x345f   :  { %v6345_v4 = vcvt.s32.f32 %v6343_v60  ;;  %v6248_v11 = vcombine.low %v6240_v29, %v6247_v8  ;;  %vm6128_vm5 = vcmp.ge.f32.partialorder %v8800_v39, %v6080_v47  ;;  %vm6129_vm6 = vcmp.ge.f32.partialorder %v8803_v1, %v6084_v18 }
0x3460   :  { %v6371_v22 = vsel %vm5365_vm4, %v6325_v17, 2147483647  ;;  %vm6130_vm7 = vcmp.ge.f32.partialorder %v8807_v0, %v6088_v52  ;;  %vm6131_vm8 = vcmp.ge.f32.partialorder %v8810_v50, %v6092_v48  ;;  %v6191_v12 = vsel %vm8926_vm15, %v8847_v2, 64 }
0x3461   :  { %6346 = vmin.xlane.f32.xlu0 %v6345_v4  ;;  %v6326_v19 = vsel %vm5363_vm3, %v6248_v11, 2147483647  ;;  %v6373_v61 = vshra.s32 %v6371_v22, 16  ;;  %v6192_v62 = vsel %vm6125_vm0, %v8853_v56, 64  ;;  %v6193_v39 = vsel %vm6126_vm1, %v8867_v35, 64 }
0x3462   :  { %v6328_v24 = vshra.s32 %v6326_v19, 16  ;;  %v6194_v1 = vsel %vm6127_vm2, %v8875_v9, 64  ;;  %v6195_v30 = vsel %vm6128_vm5, %v8850_v42, 64  ;;  %v6196_v0 = vsel %vm6129_vm6, %v8856_v3, 64 }
0x3463   :  { %v6375_v50 = vcvt.s32.f32 %v6373_v61  ;;  %v6197_v32 = vsel %vm6130_vm7, %v8871_v51, 64  ;;  %v6198_v2 = vsel %vm6131_vm8, %v8879_v15, 64  ;;  %v6263_v31 = vcombine.low %v6191_v12, %v6192_v62 }
0x3464   :  { %v6330_v33 = vcvt.s32.f32 %v6328_v24  ;;  %v6264_v26 = vcombine.low %v6193_v39, %v6194_v1  ;;  %v6265_v54 = vcombine.low %v6195_v30, %v6196_v0  ;;  %v6266_v20 = vcombine.low %v6197_v32, %v6198_v2 }
0x3465   :  { %6376 = vmin.xlane.f32.xlu0 %v6375_v50  ;;  %v6273_v56 = vrot.slane %v6263_v31, %v7470_v23  ;;  %v6342_v44 = vand.u32 65535, %v6341_v41  ;;  %v6372_v10 = vand.u32 65535, %v6371_v22  ;;  %v6327_v45 = vand.u32 65535, %v6326_v19 }
0x3466   :  { %6331 = vmin.xlane.f32.xlu1 %v6330_v33  ;;  %v6280_v35 = vrot.slane %v6264_v26, %v7470_v23  ;;  %v6287_v42 = vrot.slane %v6265_v54, %v7470_v23  ;;  %v6294_v3 = vrot.slane %v6266_v20, %v7470_v23  ;;  %v6390_v27 = vadd.s32 4294967288, %v8839_v7 }
0x3467   :  { %v6344_v58 = vcvt.s32.f32 %v6342_v44  ;;  %v6374_v46 = vcvt.s32.f32 %v6372_v10  ;;  %v6329_v5 = vcvt.s32.f32 %v6327_v45  ;;  %v6388_v8 = vsub.s32 %v8839_v7, %v7457_v16 }
0x3468   :  { %v6295_v9 = vcombine.low %v6273_v56, %v6280_v35  ;;  %v6296_v28 = vcombine.low %v6287_v42, %v6294_v3  ;;  %v6393_v41 = vsub.s32 %v6390_v27, %v7457_v16  ;;  %vm6395_vm11 = vcmask 130112  }
0x3469   :  { %vm6406_vm12 = vcmask 1041409   ;;  %vm6408_vm13 = vcmask 66560  }
0x346a   :  { %v6303_v51 = vrot.slane %v6295_v9, %v7470_v23  ;;  %v6310_v15 = vrot.slane %v6296_v28, %v7470_v23 }
0x346c   :  { %v6311_v63 = vcombine.low %v6303_v51, %v6310_v15 }
0x346e   :  { %v6356_v14 = vsel %vm5363_vm3, %v6311_v63, 2147483647 }
0x346f   :  { %v6358_v38 = vshra.s32 %v6356_v14, 16  ;;  %v6357_v6 = vand.u32 65535, %v6356_v14 }
0x3471   :  { %v6360_v53 = vcvt.s32.f32 %v6358_v38  ;;  %v6359_v57 = vcvt.s32.f32 %v6357_v6 }
0x3473   :  { %6361 = vmin.xlane.f32.xlu1 %v6360_v53 }
0x34ee   :  { %v6347_v55 = vpop.xlane.xlu0 %6346 }
0x34ef   :  { %vm6348_vm4 = vcmp.eq.f32.partialorder %v6345_v4, %v6347_v55  ;;  %v6353_v13 = vcvt.f32.s32 %v6347_v55 }
0x34f0   :  { %v6349_v59 = vsel %vm6348_vm4, %v6344_v58, inf }
0x34f1   :  { %6350 = vmin.xlane.f32.xlu0 %v6349_v59  ;;  %v6354_v21 = vshll.u32 %v6353_v13, 16 }
0x34f2   :  { %v6377_v43 = vpop.xlane.xlu0 %6376 }
0x34f3   :  { %v6332_v25 = vpop.xlane.xlu1 %6331  ;;  %vm6378_vm9 = vcmp.eq.f32.partialorder %v6375_v50, %v6377_v43  ;;  %v6383_v12 = vcvt.f32.s32 %v6377_v43 }
0x34f4   :  { %vm6333_vm10 = vcmp.eq.f32.partialorder %v6330_v33, %v6332_v25  ;;  %v6379_v23 = vsel %vm6378_vm9, %v6374_v46, inf  ;;  %v6338_v47 = vcvt.f32.s32 %v6332_v25 }
0x34f5   :  { %v6334_v49 = vsel %vm6333_vm10, %v6329_v5, inf  ;;  %6380 = vmin.xlane.f32.xlu0 %v6379_v23  ;;  %v6384_v62 = vshll.u32 %v6383_v12, 16 }
0x34f6   :  { %6335 = vmin.xlane.f32.xlu1 %v6334_v49  ;;  %v6339_v52 = vshll.u32 %v6338_v47, 16 }
0x3500   :  { %v6362_v36 = vpop.xlane.xlu1 %6361 }
0x3501   :  { %vm6363_vm3 = vcmp.eq.f32.partialorder %v6360_v53, %v6362_v36  ;;  %v6368_v19 = vcvt.f32.s32 %v6362_v36 }
0x3502   :  { %v6364_v34 = vsel %vm6363_vm3, %v6359_v57, inf }
0x3503   :  { %6365 = vmin.xlane.f32.xlu1 %v6364_v34  ;;  %v6369_v24 = vshll.u32 %v6368_v19, 16 }
0x357e   :  { %v6351_v37 = vpop.xlane.xlu0 %6350 }
0x357f   :  { %v6352_v18 = vcvt.f32.s32 %v6351_v37 }
0x3581   :  { %v6355_v60 = vadd.s32 %v6354_v21, %v6352_v18 }
0x3582   :  { %v6381_v11 = vpop.xlane.xlu0 %6380 }
0x3583   :  { %v6336_v29 = vpop.xlane.xlu1 %6335  ;;  %v6394_v17 = vrot.slane %v6355_v60, %v6393_v41  ;;  %v6382_v61 = vcvt.f32.s32 %v6381_v11 }
0x3584   :  { %v6337_v48 = vcvt.f32.s32 %v6336_v29 }
0x3585   :  { %v6385_v1 = vadd.s32 %v6384_v62, %v6382_v61 }
0x3586   :  { %v6340_v40 = vadd.s32 %v6339_v52, %v6337_v48 }
0x3587   :  { %v6404_v16 = vrot.slane %v6385_v1, %v6393_v41 }
0x3588   :  { %v6389_v4 = vrot.slane %v6340_v40, %v6388_v8 }
0x358a   :  { %v6396_v22 = vsel %vm6395_vm11, %v6394_v17, %v6389_v4 }
0x3590   :  { %v6366_v39 = vpop.xlane.xlu1 %6365 }
0x3591   :  { %v6367_v30 = vcvt.f32.s32 %v6366_v39 }
0x3593   :  { %v6370_v0 = vadd.s32 %v6369_v24, %v6367_v30 }
0x3595   :  { %v6400_v7 = vrot.slane %v6370_v0, %v6388_v8 }
0x3597   :  { %v6405_v50 = vsel %vm6395_vm11, %v6404_v16, %v6400_v7 }
0x3598   :  { %v6407_v32 = vsel %vm6406_vm12, %v6405_v50, %v6396_v22 }
0x3599   :  { %6409 = vst.msk [vmem:[#allocation3] sm:$0x3] %vm6408_vm13, %v6407_v32 }
0x359a   :  { %7348 = shalt.err (!%p7345_p4)
}
0x359b   :  { %s7349_s28 = scalar_lea.hbm %s8985_s10, 32 }
0x359c   :  { %p7350_p5 = scmp.ne.s32.totalorder %s8985_s10, %s7349_s28  ;;  %p7353_p6 = scmp.lt.u32.totalorder %s7349_s28, %s8985_s10 }
0x359e   :  { %p7355_p7 = pnand %p7353_p6, %p7350_p5 }
0x35a0   :  { %7358 = shalt.err (!%p7355_p7)
}
0x35a1   :  { %6421 = dma.vmem_to_hbm [thread:$0]  %s6419_s24, 32, %s8985_s10, [#allocation4]  }
0x35a2   :  { %7359 = dma.done.wait [#allocation4], 32  }
0x35a3   :  { %7360 = vsyncadd [#allocation4], 4294967264 }
0x35a4   :  { %6427 = vsyncpa [#allocation4], 1 }

</bundles_post_ra>
